<compile_context>
chip_gen: v7x
topology: tpu7x:2x2x1
jax: 0.10.0
libtpu: 0.0.40
codegen_flags: <defaults>
</compile_context>

<pallas_src>
import functools

import jax
import jax.numpy as jnp
from jax.experimental import pallas as pl
from jax.experimental.pallas import tpu as pltpu


def _residual_block_kernel(x_ref, w1_ref, s1_ref, b1_ref, w2_ref, s2_ref,
                           b2_ref, out_ref, pad_ref, col_ref, *, NB, H, W, C):
    """One grid step: NB images, full spatial extent.

    x_ref  : (NB, H,   W,   C)    input block (residual is re-read from here)
    w1_ref : (3, 3*C, C)          conv1 weights, ky-major; rows (kx, cin)
    s1/b1  : (1, C) f32           folded BN1 scale / bias (conv1 bias included)
    w2_ref : (3, 3*C, C)          conv2 weights
    s2/b2  : (1, C) f32           folded BN2 scale / bias
    out_ref: (NB, H, W, C)        relu(layer(x) + x)
    pad_ref: (NB, H+2, W+2, C)    VMEM halo scratch, compute dtype (reused)
    col_ref: (NB, H, W, 3*C)      VMEM im2col scratch, compute dtype (reused)
    """
    # Zero only the 1-pixel halo border.  Done every step (cheap) instead of
    # once at program_id == 0 so it stays correct when the batch axis is
    # sharded "parallel" across TensorCores (each core has its own scratch).
    zrow = jnp.zeros((NB, 1, W + 2, C), pad_ref.dtype)
    zcol = jnp.zeros((NB, H, 1, C), pad_ref.dtype)
    pad_ref[:, 0:1, :, :] = zrow
    pad_ref[:, H + 1:H + 2, :, :] = zrow
    pad_ref[:, 1:H + 1, 0:1, :] = zcol
    pad_ref[:, 1:H + 1, W + 1:W + 2, :] = zcol

    def conv3x3(w_ref):
        # Three accumulated MXU matmuls (one per ky), K = 3*C each.  The col
        # scratch holds only one ky's taps at a time (3x smaller than 9*C).
        acc = None
        for ky in range(3):
            for kx in range(3):
                col_ref[:, :, :, kx * C:(kx + 1) * C] = (
                    pad_ref[:, ky:ky + H, kx:kx + W, :])
            # W % 8 == 0 keeps this flatten relayout-free (true for 16/28/56).
            a = col_ref[...].reshape(NB * H * W, 3 * C)
            part = jnp.dot(a, w_ref[ky], preferred_element_type=jnp.float32)
            acc = part if acc is None else acc + part
        return acc                                          # (NB*H*W, C) f32

    # ---- conv1 + BN1 (eval-mode affine); NO ReLU here (matches module) -----
    # x goes straight from its VMEM input block into the pad interior (cast
    # once to the compute dtype); no loaded copy of x stays live across the
    # two convs — the residual re-reads x_ref in the epilogue.
    pad_ref[:, 1:H + 1, 1:W + 1, :] = x_ref[...].astype(pad_ref.dtype)
    y1 = conv3x3(w1_ref) * s1_ref[...] + b1_ref[...]        # (NB*H*W, C) f32

    # ---- conv2 + BN2 + ReLU (end of self.layer) -----------------------------
    pad_ref[:, 1:H + 1, 1:W + 1, :] = (
        y1.reshape(NB, H, W, C).astype(pad_ref.dtype))
    y2 = conv3x3(w2_ref) * s2_ref[...] + b2_ref[...]
    y2 = jnp.maximum(y2, 0.0)

    # ---- residual add + final ReLU:  out = relu(layer(x) + x) ---------------
    res = x_ref[...].astype(jnp.float32).reshape(NB * H * W, C)
    out = jnp.maximum(y2 + res, 0.0)
    out_ref[...] = out.reshape(NB, H, W, C).astype(out_ref.dtype)


def _round_up(v, m):
    return ((v + m - 1) // m) * m


def _vmem_plan():
    """Return (per-step block budget, vmem_limit_bytes) per TPU generation."""
    try:
        cap = pltpu.get_tpu_info().vmem_capacity_bytes
    except Exception:
        cap = 64 * 1024 * 1024                      # conservative (v7x-sized)
    if cap >= 96 * 1024 * 1024:                     # v5e / v6e: 128 MiB VMEM
        return 56 * 1024 * 1024, 100 * 1024 * 1024
    return 20 * 1024 * 1024, 32 * 1024 * 1024       # v7x: 64 MiB VMEM per TC


def _pick_batch_block(N, H, W, C, x_bytes, cd_bytes, budget_bytes):
    """Largest divisor of N whose per-step working set fits the budget, capped
    so the grid keeps a few steps for pipelining / megacore sharding."""
    c_pad = _round_up(C, 128)                 # lane padding of the channel dim
    per_img = (
        2 * 2 * H * _round_up(W, 8) * c_pad * x_bytes              # x/out, 2x buffered
        + (H + 2) * _round_up(W + 2, 8) * c_pad * cd_bytes         # halo scratch
        + H * _round_up(W, 8) * _round_up(3 * C, 128) * cd_bytes   # im2col scratch
        + 3 * H * _round_up(W, 8) * c_pad * 4)                     # f32 acc / epilogue temps
    if per_img > budget_bytes:
        # TODO(synk): row-tile along H (1-row halo) instead of failing here.
        raise ValueError(
            f"per-image VMEM working set ~{per_img / 2**20:.1f} MiB exceeds "
            f"the block budget {budget_bytes / 2**20:.1f} MiB; this shape "
            "needs H row tiling.")
    nb_max = max(1, int(budget_bytes // per_img))
    desired_steps = min(N, 4)                 # keep >= a few grid steps
    nb = max(1, min(nb_max, N // desired_steps))
    while nb > 1 and N % nb != 0:
        nb -= 1
    return nb


def residual_out_pallas(x_nhwc, params, *, batch_block=None):
    """relu(layer(x) + x) for NHWC `x`; hot path inside a single Pallas kernel."""
    N, H, W, Cin = x_nhwc.shape
    w1, s1, b1, w2, s2, b2 = params
    Cout = w1.shape[-1]
    if w1.shape != (3, 3 * Cin, Cout):
        raise ValueError(f"conv1 weights {w1.shape} do not match Cin={Cin}")
    if Cin != Cout:
        # TODO(synk): downsample (strided 1x1 conv + BN) path not implemented.
        raise NotImplementedError(
            "ResidualBlock Pallas kernel requires in_channels == out_channels "
            "(downsample=None, stride=1).")
    C = Cin
    compute_dtype = w1.dtype
    cd_bytes = jnp.dtype(compute_dtype).itemsize
    budget, vmem_limit = _vmem_plan()
    NB = batch_block or _pick_batch_block(
        N, H, W, C, x_nhwc.dtype.itemsize, cd_bytes, budget)
    assert N % NB == 0, (N, NB)

    # Advisory cost for XLA scheduling around the custom call.
    flops = 2 * (2 * N * H * W * C * 9 * C)               # two 3x3 convs
    bytes_accessed = (2 * x_nhwc.size * x_nhwc.dtype.itemsize
                      + (w1.size + w2.size) * cd_bytes
                      + 4 * C * 4)

    kernel = functools.partial(_residual_block_kernel, NB=NB, H=H, W=W, C=C)
    return pl.pallas_call(
        kernel,
        out_shape=jax.ShapeDtypeStruct((N, H, W, C), x_nhwc.dtype),
        grid_spec=pltpu.PrefetchScalarGridSpec(
            num_scalar_prefetch=0,
            grid=(N // NB,),
            in_specs=[
                pl.BlockSpec((NB, H, W, C), lambda n: (n, 0, 0, 0)),
                pl.BlockSpec((3, 3 * C, C), lambda n: (0, 0, 0)),
                pl.BlockSpec((1, C),        lambda n: (0, 0)),
                pl.BlockSpec((1, C),        lambda n: (0, 0)),
                pl.BlockSpec((3, 3 * C, C), lambda n: (0, 0, 0)),
                pl.BlockSpec((1, C),        lambda n: (0, 0)),
                pl.BlockSpec((1, C),        lambda n: (0, 0)),
            ],
            out_specs=pl.BlockSpec((NB, H, W, C), lambda n: (n, 0, 0, 0)),
            scratch_shapes=[
                pltpu.VMEM((NB, H + 2, W + 2, C), compute_dtype),  # halo
                pltpu.VMEM((NB, H, W, 3 * C), compute_dtype),      # im2col (per ky)
            ],
        ),
        compiler_params=pltpu.CompilerParams(
            dimension_semantics=("parallel",),   # batch steps are independent
            vmem_limit_bytes=vmem_limit,
        ),
        cost_estimate=pl.CostEstimate(
            flops=flops, transcendentals=0, bytes_accessed=bytes_accessed),
    )(x_nhwc, w1, s1, b1, w2, s2, b2)


def residual_block_forward(x_nchw, params):
    """Faithful to the PyTorch forward: computes `out` but RETURNS `x`."""
    x_nhwc = jnp.transpose(x_nchw, (0, 2, 3, 1))
    out_nhwc = residual_out_pallas(x_nhwc, params)       # hot path in Pallas
    out_nchw = jnp.transpose(out_nhwc, (0, 3, 1, 2))
    return x_nchw, out_nchw   # module returns x; out exposed for verification


def fold_params(w1_oihw, bconv1, g1, be1, m1, v1,
                w2_oihw, bconv2, g2, be2, m2, v2,
                *, eps=1e-5, compute_dtype=jnp.float32):
    """Fold eval-mode BN (+ conv bias) into per-channel scale/bias and reshape
    OIHW conv weights to the (3, 3*Cin, Cout) ky-major layout used by the
    kernel.  BN uses running statistics only (training-mode stats unsupported)."""
    Cout, Cin = w1_oihw.shape[0], w1_oihw.shape[1]
    s1 = g1 / jnp.sqrt(v1 + eps)
    b1 = (bconv1 - m1) * s1 + be1
    s2 = g2 / jnp.sqrt(v2 + eps)
    b2 = (bconv2 - m2) * s2 + be2
    # OIHW -> (ky, kx, Cin, Cout) -> (3, 3*Cin, Cout): leading dim = ky (one
    # clean leading-index slice per accumulated matmul); rows inside a ky
    # block are ordered (kx, cin), matching the in-kernel im2col columns.
    w1k = jnp.transpose(w1_oihw, (2, 3, 1, 0)).reshape(3, 3 * Cin, Cout)
    w2k = jnp.transpose(w2_oihw, (2, 3, 1, 0)).reshape(3, 3 * Cout, Cout)
    return (w1k.astype(compute_dtype),
            s1.reshape(1, Cout).astype(jnp.float32),
            b1.reshape(1, Cout).astype(jnp.float32),
            w2k.astype(compute_dtype),
            s2.reshape(1, Cout).astype(jnp.float32),
            b2.reshape(1, Cout).astype(jnp.float32))


# ---------------- pure-JAX reference (for correctness check) -----------------
def _jax_reference_out(x, w1, bc1, g1, be1, m1, v1, w2, bc2, g2, be2, m2, v2,
                       eps=1e-5):
    def conv(x, w, b):
        y = jax.lax.conv_general_dilated(
            x, w, (1, 1), ((1, 1), (1, 1)),
            dimension_numbers=("NCHW", "OIHW", "NCHW"))
        return y + b[None, :, None, None]

    def bn(x, g, be, m, v):
        return ((x - m[None, :, None, None])
                / jnp.sqrt(v[None, :, None, None] + eps)
                * g[None, :, None, None] + be[None, :, None, None])

    out = bn(conv(x, w1, bc1), g1, be1, m1, v1)
    out = bn(conv(out, w2, bc2), g2, be2, m2, v2)
    out = jnp.maximum(out, 0.0)
    return jnp.maximum(out + x, 0.0)


if __name__ == "__main__":
    N, Cin, H, W = 2, 4, 16, 16
    Cout = Cin   # stride=1, downsample=None  =>  out_channels == in_channels
    eps = 1e-5

    key = jax.random.PRNGKey(0)
    ks = jax.random.split(key, 13)
    x = jax.random.normal(ks[0], (N, Cin, H, W), jnp.float32)

    # Deterministic synthetic parameters (PyTorch layouts).
    w1_oihw = 0.1 * jax.random.normal(ks[1], (Cout, Cin, 3, 3), jnp.float32)
    bconv1  = 0.1 * jax.random.normal(ks[2], (Cout,), jnp.float32)
    g1  = 1.0 + 0.1 * jax.random.normal(ks[3], (Cout,), jnp.float32)
    be1 = 0.1 * jax.random.normal(ks[4], (Cout,), jnp.float32)
    m1  = 0.1 * jax.random.normal(ks[5], (Cout,), jnp.float32)
    v1  = 1.0 + 0.1 * jnp.abs(jax.random.normal(ks[6], (Cout,), jnp.float32))

    w2_oihw = 0.1 * jax.random.normal(ks[7], (Cout, Cout, 3, 3), jnp.float32)
    bconv2  = 0.1 * jax.random.normal(ks[8], (Cout,), jnp.float32)
    g2  = 1.0 + 0.1 * jax.random.normal(ks[9], (Cout,), jnp.float32)
    be2 = 0.1 * jax.random.normal(ks[10], (Cout,), jnp.float32)
    m2  = 0.1 * jax.random.normal(ks[11], (Cout,), jnp.float32)
    v2  = 1.0 + 0.1 * jnp.abs(jax.random.normal(ks[12], (Cout,), jnp.float32))

    ref_out = _jax_reference_out(x, w1_oihw, bconv1, g1, be1, m1, v1,
                                 w2_oihw, bconv2, g2, be2, m2, v2, eps)

    # ---- f32 matmul path (exact check) ----
    params_f32 = fold_params(w1_oihw, bconv1, g1, be1, m1, v1,
                             w2_oihw, bconv2, g2, be2, m2, v2,
                             eps=eps, compute_dtype=jnp.float32)
    ret_x, out_f32 = residual_block_forward(x, params_f32)
    jax.block_until_ready((ret_x, out_f32))
    assert jnp.allclose(out_f32, ref_out, atol=1e-4, rtol=1e-4), (
        float(jnp.max(jnp.abs(out_f32 - ref_out))))
    # The module's forward returns x unchanged (reference semantics).
    assert jnp.array_equal(ret_x, x)

    # ---- bf16 matmul operands + bf16 scratches (f32 accumulation) ----
    params_bf16 = fold_params(w1_oihw, bconv1, g1, be1, m1, v1,
                              w2_oihw, bconv2, g2, be2, m2, v2,
                              eps=eps, compute_dtype=jnp.bfloat16)
    _, out_bf16 = residual_block_forward(x, params_bf16)
    jax.block_until_ready(out_bf16)
    assert jnp.allclose(out_bf16, ref_out, atol=5e-2, rtol=5e-2), (
        float(jnp.max(jnp.abs(out_bf16 - ref_out))))

    print("KERNEL_OK")
</pallas_src>

<mosaic_0001>
module attributes {stable_mosaic.version = 11 : i64} {
  func.func @_residual_block_kernel(%arg0: i32, %arg1: memref<1x16x16x4xf32, #tpu.memory_space<vmem>>, %arg2: memref<3x12x4xf32, #tpu.memory_space<vmem>>, %arg3: memref<1x4xf32, #tpu.memory_space<vmem>>, %arg4: memref<1x4xf32, #tpu.memory_space<vmem>>, %arg5: memref<3x12x4xf32, #tpu.memory_space<vmem>>, %arg6: memref<1x4xf32, #tpu.memory_space<vmem>>, %arg7: memref<1x4xf32, #tpu.memory_space<vmem>>, %arg8: memref<1x16x16x4xf32, #tpu.memory_space<vmem>>, %arg9: memref<1x18x18x4xf32, #tpu.memory_space<vmem>>, %arg10: memref<1x16x16x12xf32, #tpu.memory_space<vmem>>) attributes {dimension_semantics = [#tpu.dimension_semantics<parallel>], iteration_bounds = array<i64: 2>, scalar_prefetch = 0 : i64, scratch_operands = 2 : i64, tpu.core_type = #tpu.core_type<tc>, window_params = [{transform_indices = @transform_0, window_bounds = array<i64: 1, 16, 16, 4>}, {pipeline_mode = #tpu.pipeline_mode<synchronous>, transform_indices = @transform_1, window_bounds = array<i64: 3, 12, 4>}, {pipeline_mode = #tpu.pipeline_mode<synchronous>, transform_indices = @transform_2, window_bounds = array<i64: 1, 4>}, {pipeline_mode = #tpu.pipeline_mode<synchronous>, transform_indices = @transform_3, window_bounds = array<i64: 1, 4>}, {pipeline_mode = #tpu.pipeline_mode<synchronous>, transform_indices = @transform_4, window_bounds = array<i64: 3, 12, 4>}, {pipeline_mode = #tpu.pipeline_mode<synchronous>, transform_indices = @transform_5, window_bounds = array<i64: 1, 4>}, {pipeline_mode = #tpu.pipeline_mode<synchronous>, transform_indices = @transform_6, window_bounds = array<i64: 1, 4>}, {transform_indices = @transform_7, window_bounds = array<i64: 1, 16, 16, 4>}]} {
    %cst = arith.constant 0.000000e+00 : f32
    %0 = vector.broadcast %cst : f32 to vector<1x1x18x4xf32>
    %cst_0 = arith.constant 0.000000e+00 : f32
    %1 = vector.broadcast %cst_0 : f32 to vector<1x16x1x4xf32>
    %c0 = arith.constant 0 : index
    %c0_1 = arith.constant 0 : index
    %c0_2 = arith.constant 0 : index
    %c0_3 = arith.constant 0 : index
    %2 = vector.load %arg9[%c0, %c0_1, %c0_2, %c0_3] : memref<1x18x18x4xf32, #tpu.memory_space<vmem>>, vector<1x1x18x4xf32>
    tpu.vector_store %arg9[%c0, %c0_1, %c0_2, %c0_3], %0 {strides = array<i32>} : memref<1x18x18x4xf32, #tpu.memory_space<vmem>>, vector<1x1x18x4xf32>,
    %c0_4 = arith.constant 0 : index
    %c17 = arith.constant 17 : index
    %c0_5 = arith.constant 0 : index
    %c0_6 = arith.constant 0 : index
    %3 = vector.load %arg9[%c0_4, %c17, %c0_5, %c0_6] : memref<1x18x18x4xf32, #tpu.memory_space<vmem>>, vector<1x1x18x4xf32>
    tpu.vector_store %arg9[%c0_4, %c17, %c0_5, %c0_6], %0 {strides = array<i32>} : memref<1x18x18x4xf32, #tpu.memory_space<vmem>>, vector<1x1x18x4xf32>,
    %c0_7 = arith.constant 0 : index
    %c1 = arith.constant 1 : index
    %c0_8 = arith.constant 0 : index
    %c0_9 = arith.constant 0 : index
    %4 = vector.load %arg9[%c0_7, %c1, %c0_8, %c0_9] : memref<1x18x18x4xf32, #tpu.memory_space<vmem>>, vector<1x16x1x4xf32>
    tpu.vector_store %arg9[%c0_7, %c1, %c0_8, %c0_9], %1 {strides = array<i32>} : memref<1x18x18x4xf32, #tpu.memory_space<vmem>>, vector<1x16x1x4xf32>,
    %c0_10 = arith.constant 0 : index
    %c1_11 = arith.constant 1 : index
    %c17_12 = arith.constant 17 : index
    %c0_13 = arith.constant 0 : index
    %5 = vector.load %arg9[%c0_10, %c1_11, %c17_12, %c0_13] : memref<1x18x18x4xf32, #tpu.memory_space<vmem>>, vector<1x16x1x4xf32>
    tpu.vector_store %arg9[%c0_10, %c1_11, %c17_12, %c0_13], %1 {strides = array<i32>} : memref<1x18x18x4xf32, #tpu.memory_space<vmem>>, vector<1x16x1x4xf32>,
    %c0_14 = arith.constant 0 : index
    %c0_15 = arith.constant 0 : index
    %c0_16 = arith.constant 0 : index
    %c0_17 = arith.constant 0 : index
    %6 = vector.load %arg1[%c0_14, %c0_15, %c0_16, %c0_17] : memref<1x16x16x4xf32, #tpu.memory_space<vmem>>, vector<1x16x16x4xf32>
    %c0_18 = arith.constant 0 : index
    %c1_19 = arith.constant 1 : index
    %c1_20 = arith.constant 1 : index
    %c0_21 = arith.constant 0 : index
    %7 = vector.load %arg9[%c0_18, %c1_19, %c1_20, %c0_21] : memref<1x18x18x4xf32, #tpu.memory_space<vmem>>, vector<1x16x16x4xf32>
    tpu.vector_store %arg9[%c0_18, %c1_19, %c1_20, %c0_21], %6 {strides = array<i32>} : memref<1x18x18x4xf32, #tpu.memory_space<vmem>>, vector<1x16x16x4xf32>,
    %c0_22 = arith.constant 0 : index
    %c0_23 = arith.constant 0 : index
    %c0_24 = arith.constant 0 : index
    %c0_25 = arith.constant 0 : index
    %8 = vector.load %arg9[%c0_22, %c0_23, %c0_24, %c0_25] : memref<1x18x18x4xf32, #tpu.memory_space<vmem>>, vector<1x16x16x4xf32>
    %c0_26 = arith.constant 0 : index
    %c0_27 = arith.constant 0 : index
    %c0_28 = arith.constant 0 : index
    %c0_29 = arith.constant 0 : index
    %9 = vector.load %arg10[%c0_26, %c0_27, %c0_28, %c0_29] : memref<1x16x16x12xf32, #tpu.memory_space<vmem>>, vector<1x16x16x4xf32>
    tpu.vector_store %arg10[%c0_26, %c0_27, %c0_28, %c0_29], %8 {strides = array<i32>} : memref<1x16x16x12xf32, #tpu.memory_space<vmem>>, vector<1x16x16x4xf32>,
    %c0_30 = arith.constant 0 : index
    %c0_31 = arith.constant 0 : index
    %c1_32 = arith.constant 1 : index
    %c0_33 = arith.constant 0 : index
    %10 = vector.load %arg9[%c0_30, %c0_31, %c1_32, %c0_33] : memref<1x18x18x4xf32, #tpu.memory_space<vmem>>, vector<1x16x16x4xf32>
    %c0_34 = arith.constant 0 : index
    %c0_35 = arith.constant 0 : index
    %c0_36 = arith.constant 0 : index
    %c4 = arith.constant 4 : index
    %11 = vector.load %arg10[%c0_34, %c0_35, %c0_36, %c4] : memref<1x16x16x12xf32, #tpu.memory_space<vmem>>, vector<1x16x16x4xf32>
    tpu.vector_store %arg10[%c0_34, %c0_35, %c0_36, %c4], %10 {strides = array<i32>} : memref<1x16x16x12xf32, #tpu.memory_space<vmem>>, vector<1x16x16x4xf32>,
    %c0_37 = arith.constant 0 : index
    %c0_38 = arith.constant 0 : index
    %c2 = arith.constant 2 : index
    %c0_39 = arith.constant 0 : index
    %12 = vector.load %arg9[%c0_37, %c0_38, %c2, %c0_39] : memref<1x18x18x4xf32, #tpu.memory_space<vmem>>, vector<1x16x16x4xf32>
    %c0_40 = arith.constant 0 : index
    %c0_41 = arith.constant 0 : index
    %c0_42 = arith.constant 0 : index
    %c8 = arith.constant 8 : index
    %13 = vector.load %arg10[%c0_40, %c0_41, %c0_42, %c8] : memref<1x16x16x12xf32, #tpu.memory_space<vmem>>, vector<1x16x16x4xf32>
    tpu.vector_store %arg10[%c0_40, %c0_41, %c0_42, %c8], %12 {strides = array<i32>} : memref<1x16x16x12xf32, #tpu.memory_space<vmem>>, vector<1x16x16x4xf32>,
    %c0_43 = arith.constant 0 : index
    %c0_44 = arith.constant 0 : index
    %c0_45 = arith.constant 0 : index
    %c0_46 = arith.constant 0 : index
    %14 = vector.load %arg10[%c0_43, %c0_44, %c0_45, %c0_46] : memref<1x16x16x12xf32, #tpu.memory_space<vmem>>, vector<1x16x16x12xf32>
    %15 = vector.shape_cast %14 : vector<1x16x16x12xf32> to vector<256x12xf32>
    %c0_47 = arith.constant 0 : index
    %c0_48 = arith.constant 0 : index
    %c0_49 = arith.constant 0 : index
    %16 = vector.load %arg2[%c0_47, %c0_48, %c0_49] : memref<3x12x4xf32, #tpu.memory_space<vmem>>, vector<1x12x4xf32>
    %17 = vector.shape_cast %16 : vector<1x12x4xf32> to vector<12x4xf32>
    %cst_50 = arith.constant dense<0.000000e+00> : vector<256x4xf32>
    %18 = tpu.matmul %15, %17, %cst_50 {dimension_numbers = #tpu.dot_dimension_numbers<[1], [0], [0], [1], [0, 0, 1, 1], [], []>} : vector<256x12xf32>, vector<12x4xf32>, vector<256x4xf32> -> vector<256x4xf32>
    %c0_51 = arith.constant 0 : index
    %c1_52 = arith.constant 1 : index
    %c0_53 = arith.constant 0 : index
    %c0_54 = arith.constant 0 : index
    %19 = vector.load %arg9[%c0_51, %c1_52, %c0_53, %c0_54] : memref<1x18x18x4xf32, #tpu.memory_space<vmem>>, vector<1x16x16x4xf32>
    %c0_55 = arith.constant 0 : index
    %c0_56 = arith.constant 0 : index
    %c0_57 = arith.constant 0 : index
    %c0_58 = arith.constant 0 : index
    %20 = vector.load %arg10[%c0_55, %c0_56, %c0_57, %c0_58] : memref<1x16x16x12xf32, #tpu.memory_space<vmem>>, vector<1x16x16x4xf32>
    tpu.vector_store %arg10[%c0_55, %c0_56, %c0_57, %c0_58], %19 {strides = array<i32>} : memref<1x16x16x12xf32, #tpu.memory_space<vmem>>, vector<1x16x16x4xf32>,
    %c0_59 = arith.constant 0 : index
    %c1_60 = arith.constant 1 : index
    %c1_61 = arith.constant 1 : index
    %c0_62 = arith.constant 0 : index
    %21 = vector.load %arg9[%c0_59, %c1_60, %c1_61, %c0_62] : memref<1x18x18x4xf32, #tpu.memory_space<vmem>>, vector<1x16x16x4xf32>
    %c0_63 = arith.constant 0 : index
    %c0_64 = arith.constant 0 : index
    %c0_65 = arith.constant 0 : index
    %c4_66 = arith.constant 4 : index
    %22 = vector.load %arg10[%c0_63, %c0_64, %c0_65, %c4_66] : memref<1x16x16x12xf32, #tpu.memory_space<vmem>>, vector<1x16x16x4xf32>
    tpu.vector_store %arg10[%c0_63, %c0_64, %c0_65, %c4_66], %21 {strides = array<i32>} : memref<1x16x16x12xf32, #tpu.memory_space<vmem>>, vector<1x16x16x4xf32>,
    %c0_67 = arith.constant 0 : index
    %c1_68 = arith.constant 1 : index
    %c2_69 = arith.constant 2 : index
    %c0_70 = arith.constant 0 : index
    %23 = vector.load %arg9[%c0_67, %c1_68, %c2_69, %c0_70] : memref<1x18x18x4xf32, #tpu.memory_space<vmem>>, vector<1x16x16x4xf32>
    %c0_71 = arith.constant 0 : index
    %c0_72 = arith.constant 0 : index
    %c0_73 = arith.constant 0 : index
    %c8_74 = arith.constant 8 : index
    %24 = vector.load %arg10[%c0_71, %c0_72, %c0_73, %c8_74] : memref<1x16x16x12xf32, #tpu.memory_space<vmem>>, vector<1x16x16x4xf32>
    tpu.vector_store %arg10[%c0_71, %c0_72, %c0_73, %c8_74], %23 {strides = array<i32>} : memref<1x16x16x12xf32, #tpu.memory_space<vmem>>, vector<1x16x16x4xf32>,
    %c0_75 = arith.constant 0 : index
    %c0_76 = arith.constant 0 : index
    %c0_77 = arith.constant 0 : index
    %c0_78 = arith.constant 0 : index
    %25 = vector.load %arg10[%c0_75, %c0_76, %c0_77, %c0_78] : memref<1x16x16x12xf32, #tpu.memory_space<vmem>>, vector<1x16x16x12xf32>
    %26 = vector.shape_cast %25 : vector<1x16x16x12xf32> to vector<256x12xf32>
    %c1_79 = arith.constant 1 : index
    %c0_80 = arith.constant 0 : index
    %c0_81 = arith.constant 0 : index
    %27 = vector.load %arg2[%c1_79, %c0_80, %c0_81] : memref<3x12x4xf32, #tpu.memory_space<vmem>>, vector<1x12x4xf32>
    %28 = vector.shape_cast %27 : vector<1x12x4xf32> to vector<12x4xf32>
    %cst_82 = arith.constant dense<0.000000e+00> : vector<256x4xf32>
    %29 = tpu.matmul %26, %28, %cst_82 {dimension_numbers = #tpu.dot_dimension_numbers<[1], [0], [0], [1], [0, 0, 1, 1], [], []>} : vector<256x12xf32>, vector<12x4xf32>, vector<256x4xf32> -> vector<256x4xf32>
    %30 = arith.addf %18, %29 : vector<256x4xf32>
    %c0_83 = arith.constant 0 : index
    %c2_84 = arith.constant 2 : index
    %c0_85 = arith.constant 0 : index
    %c0_86 = arith.constant 0 : index
    %31 = vector.load %arg9[%c0_83, %c2_84, %c0_85, %c0_86] : memref<1x18x18x4xf32, #tpu.memory_space<vmem>>, vector<1x16x16x4xf32>
    %c0_87 = arith.constant 0 : index
    %c0_88 = arith.constant 0 : index
    %c0_89 = arith.constant 0 : index
    %c0_90 = arith.constant 0 : index
    %32 = vector.load %arg10[%c0_87, %c0_88, %c0_89, %c0_90] : memref<1x16x16x12xf32, #tpu.memory_space<vmem>>, vector<1x16x16x4xf32>
    tpu.vector_store %arg10[%c0_87, %c0_88, %c0_89, %c0_90], %31 {strides = array<i32>} : memref<1x16x16x12xf32, #tpu.memory_space<vmem>>, vector<1x16x16x4xf32>,
    %c0_91 = arith.constant 0 : index
    %c2_92 = arith.constant 2 : index
    %c1_93 = arith.constant 1 : index
    %c0_94 = arith.constant 0 : index
    %33 = vector.load %arg9[%c0_91, %c2_92, %c1_93, %c0_94] : memref<1x18x18x4xf32, #tpu.memory_space<vmem>>, vector<1x16x16x4xf32>
    %c0_95 = arith.constant 0 : index
    %c0_96 = arith.constant 0 : index
    %c0_97 = arith.constant 0 : index
    %c4_98 = arith.constant 4 : index
    %34 = vector.load %arg10[%c0_95, %c0_96, %c0_97, %c4_98] : memref<1x16x16x12xf32, #tpu.memory_space<vmem>>, vector<1x16x16x4xf32>
    tpu.vector_store %arg10[%c0_95, %c0_96, %c0_97, %c4_98], %33 {strides = array<i32>} : memref<1x16x16x12xf32, #tpu.memory_space<vmem>>, vector<1x16x16x4xf32>,
    %c0_99 = arith.constant 0 : index
    %c2_100 = arith.constant 2 : index
    %c2_101 = arith.constant 2 : index
    %c0_102 = arith.constant 0 : index
    %35 = vector.load %arg9[%c0_99, %c2_100, %c2_101, %c0_102] : memref<1x18x18x4xf32, #tpu.memory_space<vmem>>, vector<1x16x16x4xf32>
    %c0_103 = arith.constant 0 : index
    %c0_104 = arith.constant 0 : index
    %c0_105 = arith.constant 0 : index
    %c8_106 = arith.constant 8 : index
    %36 = vector.load %arg10[%c0_103, %c0_104, %c0_105, %c8_106] : memref<1x16x16x12xf32, #tpu.memory_space<vmem>>, vector<1x16x16x4xf32>
    tpu.vector_store %arg10[%c0_103, %c0_104, %c0_105, %c8_106], %35 {strides = array<i32>} : memref<1x16x16x12xf32, #tpu.memory_space<vmem>>, vector<1x16x16x4xf32>,
    %c0_107 = arith.constant 0 : index
    %c0_108 = arith.constant 0 : index
    %c0_109 = arith.constant 0 : index
    %c0_110 = arith.constant 0 : index
    %37 = vector.load %arg10[%c0_107, %c0_108, %c0_109, %c0_110] : memref<1x16x16x12xf32, #tpu.memory_space<vmem>>, vector<1x16x16x12xf32>
    %38 = vector.shape_cast %37 : vector<1x16x16x12xf32> to vector<256x12xf32>
    %c2_111 = arith.constant 2 : index
    %c0_112 = arith.constant 0 : index
    %c0_113 = arith.constant 0 : index
    %39 = vector.load %arg2[%c2_111, %c0_112, %c0_113] : memref<3x12x4xf32, #tpu.memory_space<vmem>>, vector<1x12x4xf32>
    %40 = vector.shape_cast %39 : vector<1x12x4xf32> to vector<12x4xf32>
    %cst_114 = arith.constant dense<0.000000e+00> : vector<256x4xf32>
    %41 = tpu.matmul %38, %40, %cst_114 {dimension_numbers = #tpu.dot_dimension_numbers<[1], [0], [0], [1], [0, 0, 1, 1], [], []>} : vector<256x12xf32>, vector<12x4xf32>, vector<256x4xf32> -> vector<256x4xf32>
    %42 = arith.addf %30, %41 : vector<256x4xf32>
    %c0_115 = arith.constant 0 : index
    %c0_116 = arith.constant 0 : index
    %43 = vector.load %arg3[%c0_115, %c0_116] : memref<1x4xf32, #tpu.memory_space<vmem>>, vector<1x4xf32>
    %44 = vector.broadcast %43 : vector<1x4xf32> to vector<256x4xf32>
    %45 = arith.mulf %42, %44 : vector<256x4xf32>
    %c0_117 = arith.constant 0 : index
    %c0_118 = arith.constant 0 : index
    %46 = vector.load %arg4[%c0_117, %c0_118] : memref<1x4xf32, #tpu.memory_space<vmem>>, vector<1x4xf32>
    %47 = vector.broadcast %46 : vector<1x4xf32> to vector<256x4xf32>
    %48 = arith.addf %45, %47 : vector<256x4xf32>
    %49 = vector.shape_cast %48 : vector<256x4xf32> to vector<1x16x16x4xf32>
    %c0_119 = arith.constant 0 : index
    %c1_120 = arith.constant 1 : index
    %c1_121 = arith.constant 1 : index
    %c0_122 = arith.constant 0 : index
    %50 = vector.load %arg9[%c0_119, %c1_120, %c1_121, %c0_122] : memref<1x18x18x4xf32, #tpu.memory_space<vmem>>, vector<1x16x16x4xf32>
    tpu.vector_store %arg9[%c0_119, %c1_120, %c1_121, %c0_122], %49 {strides = array<i32>} : memref<1x18x18x4xf32, #tpu.memory_space<vmem>>, vector<1x16x16x4xf32>,
    %c0_123 = arith.constant 0 : index
    %c0_124 = arith.constant 0 : index
    %c0_125 = arith.constant 0 : index
    %c0_126 = arith.constant 0 : index
    %51 = vector.load %arg9[%c0_123, %c0_124, %c0_125, %c0_126] : memref<1x18x18x4xf32, #tpu.memory_space<vmem>>, vector<1x16x16x4xf32>
    %c0_127 = arith.constant 0 : index
    %c0_128 = arith.constant 0 : index
    %c0_129 = arith.constant 0 : index
    %c0_130 = arith.constant 0 : index
    %52 = vector.load %arg10[%c0_127, %c0_128, %c0_129, %c0_130] : memref<1x16x16x12xf32, #tpu.memory_space<vmem>>, vector<1x16x16x4xf32>
    tpu.vector_store %arg10[%c0_127, %c0_128, %c0_129, %c0_130], %51 {strides = array<i32>} : memref<1x16x16x12xf32, #tpu.memory_space<vmem>>, vector<1x16x16x4xf32>,
    %c0_131 = arith.constant 0 : index
    %c0_132 = arith.constant 0 : index
    %c1_133 = arith.constant 1 : index
    %c0_134 = arith.constant 0 : index
    %53 = vector.load %arg9[%c0_131, %c0_132, %c1_133, %c0_134] : memref<1x18x18x4xf32, #tpu.memory_space<vmem>>, vector<1x16x16x4xf32>
    %c0_135 = arith.constant 0 : index
    %c0_136 = arith.constant 0 : index
    %c0_137 = arith.constant 0 : index
    %c4_138 = arith.constant 4 : index
    %54 = vector.load %arg10[%c0_135, %c0_136, %c0_137, %c4_138] : memref<1x16x16x12xf32, #tpu.memory_space<vmem>>, vector<1x16x16x4xf32>
    tpu.vector_store %arg10[%c0_135, %c0_136, %c0_137, %c4_138], %53 {strides = array<i32>} : memref<1x16x16x12xf32, #tpu.memory_space<vmem>>, vector<1x16x16x4xf32>,
    %c0_139 = arith.constant 0 : index
    %c0_140 = arith.constant 0 : index
    %c2_141 = arith.constant 2 : index
    %c0_142 = arith.constant 0 : index
    %55 = vector.load %arg9[%c0_139, %c0_140, %c2_141, %c0_142] : memref<1x18x18x4xf32, #tpu.memory_space<vmem>>, vector<1x16x16x4xf32>
    %c0_143 = arith.constant 0 : index
    %c0_144 = arith.constant 0 : index
    %c0_145 = arith.constant 0 : index
    %c8_146 = arith.constant 8 : index
    %56 = vector.load %arg10[%c0_143, %c0_144, %c0_145, %c8_146] : memref<1x16x16x12xf32, #tpu.memory_space<vmem>>, vector<1x16x16x4xf32>
    tpu.vector_store %arg10[%c0_143, %c0_144, %c0_145, %c8_146], %55 {strides = array<i32>} : memref<1x16x16x12xf32, #tpu.memory_space<vmem>>, vector<1x16x16x4xf32>,
    %c0_147 = arith.constant 0 : index
    %c0_148 = arith.constant 0 : index
    %c0_149 = arith.constant 0 : index
    %c0_150 = arith.constant 0 : index
    %57 = vector.load %arg10[%c0_147, %c0_148, %c0_149, %c0_150] : memref<1x16x16x12xf32, #tpu.memory_space<vmem>>, vector<1x16x16x12xf32>
    %58 = vector.shape_cast %57 : vector<1x16x16x12xf32> to vector<256x12xf32>
    %c0_151 = arith.constant 0 : index
    %c0_152 = arith.constant 0 : index
    %c0_153 = arith.constant 0 : index
    %59 = vector.load %arg5[%c0_151, %c0_152, %c0_153] : memref<3x12x4xf32, #tpu.memory_space<vmem>>, vector<1x12x4xf32>
    %60 = vector.shape_cast %59 : vector<1x12x4xf32> to vector<12x4xf32>
    %cst_154 = arith.constant dense<0.000000e+00> : vector<256x4xf32>
    %61 = tpu.matmul %58, %60, %cst_154 {dimension_numbers = #tpu.dot_dimension_numbers<[1], [0], [0], [1], [0, 0, 1, 1], [], []>} : vector<256x12xf32>, vector<12x4xf32>, vector<256x4xf32> -> vector<256x4xf32>
    %c0_155 = arith.constant 0 : index
    %c1_156 = arith.constant 1 : index
    %c0_157 = arith.constant 0 : index
    %c0_158 = arith.constant 0 : index
    %62 = vector.load %arg9[%c0_155, %c1_156, %c0_157, %c0_158] : memref<1x18x18x4xf32, #tpu.memory_space<vmem>>, vector<1x16x16x4xf32>
    %c0_159 = arith.constant 0 : index
    %c0_160 = arith.constant 0 : index
    %c0_161 = arith.constant 0 : index
    %c0_162 = arith.constant 0 : index
    %63 = vector.load %arg10[%c0_159, %c0_160, %c0_161, %c0_162] : memref<1x16x16x12xf32, #tpu.memory_space<vmem>>, vector<1x16x16x4xf32>
    tpu.vector_store %arg10[%c0_159, %c0_160, %c0_161, %c0_162], %62 {strides = array<i32>} : memref<1x16x16x12xf32, #tpu.memory_space<vmem>>, vector<1x16x16x4xf32>,
    %c0_163 = arith.constant 0 : index
    %c1_164 = arith.constant 1 : index
    %c1_165 = arith.constant 1 : index
    %c0_166 = arith.constant 0 : index
    %64 = vector.load %arg9[%c0_163, %c1_164, %c1_165, %c0_166] : memref<1x18x18x4xf32, #tpu.memory_space<vmem>>, vector<1x16x16x4xf32>
    %c0_167 = arith.constant 0 : index
    %c0_168 = arith.constant 0 : index
    %c0_169 = arith.constant 0 : index
    %c4_170 = arith.constant 4 : index
    %65 = vector.load %arg10[%c0_167, %c0_168, %c0_169, %c4_170] : memref<1x16x16x12xf32, #tpu.memory_space<vmem>>, vector<1x16x16x4xf32>
    tpu.vector_store %arg10[%c0_167, %c0_168, %c0_169, %c4_170], %64 {strides = array<i32>} : memref<1x16x16x12xf32, #tpu.memory_space<vmem>>, vector<1x16x16x4xf32>,
    %c0_171 = arith.constant 0 : index
    %c1_172 = arith.constant 1 : index
    %c2_173 = arith.constant 2 : index
    %c0_174 = arith.constant 0 : index
    %66 = vector.load %arg9[%c0_171, %c1_172, %c2_173, %c0_174] : memref<1x18x18x4xf32, #tpu.memory_space<vmem>>, vector<1x16x16x4xf32>
    %c0_175 = arith.constant 0 : index
    %c0_176 = arith.constant 0 : index
    %c0_177 = arith.constant 0 : index
    %c8_178 = arith.constant 8 : index
    %67 = vector.load %arg10[%c0_175, %c0_176, %c0_177, %c8_178] : memref<1x16x16x12xf32, #tpu.memory_space<vmem>>, vector<1x16x16x4xf32>
    tpu.vector_store %arg10[%c0_175, %c0_176, %c0_177, %c8_178], %66 {strides = array<i32>} : memref<1x16x16x12xf32, #tpu.memory_space<vmem>>, vector<1x16x16x4xf32>,
    %c0_179 = arith.constant 0 : index
    %c0_180 = arith.constant 0 : index
    %c0_181 = arith.constant 0 : index
    %c0_182 = arith.constant 0 : index
    %68 = vector.load %arg10[%c0_179, %c0_180, %c0_181, %c0_182] : memref<1x16x16x12xf32, #tpu.memory_space<vmem>>, vector<1x16x16x12xf32>
    %69 = vector.shape_cast %68 : vector<1x16x16x12xf32> to vector<256x12xf32>
    %c1_183 = arith.constant 1 : index
    %c0_184 = arith.constant 0 : index
    %c0_185 = arith.constant 0 : index
    %70 = vector.load %arg5[%c1_183, %c0_184, %c0_185] : memref<3x12x4xf32, #tpu.memory_space<vmem>>, vector<1x12x4xf32>
    %71 = vector.shape_cast %70 : vector<1x12x4xf32> to vector<12x4xf32>
    %cst_186 = arith.constant dense<0.000000e+00> : vector<256x4xf32>
    %72 = tpu.matmul %69, %71, %cst_186 {dimension_numbers = #tpu.dot_dimension_numbers<[1], [0], [0], [1], [0, 0, 1, 1], [], []>} : vector<256x12xf32>, vector<12x4xf32>, vector<256x4xf32> -> vector<256x4xf32>
    %73 = arith.addf %61, %72 : vector<256x4xf32>
    %c0_187 = arith.constant 0 : index
    %c2_188 = arith.constant 2 : index
    %c0_189 = arith.constant 0 : index
    %c0_190 = arith.constant 0 : index
    %74 = vector.load %arg9[%c0_187, %c2_188, %c0_189, %c0_190] : memref<1x18x18x4xf32, #tpu.memory_space<vmem>>, vector<1x16x16x4xf32>
    %c0_191 = arith.constant 0 : index
    %c0_192 = arith.constant 0 : index
    %c0_193 = arith.constant 0 : index
    %c0_194 = arith.constant 0 : index
    %75 = vector.load %arg10[%c0_191, %c0_192, %c0_193, %c0_194] : memref<1x16x16x12xf32, #tpu.memory_space<vmem>>, vector<1x16x16x4xf32>
    tpu.vector_store %arg10[%c0_191, %c0_192, %c0_193, %c0_194], %74 {strides = array<i32>} : memref<1x16x16x12xf32, #tpu.memory_space<vmem>>, vector<1x16x16x4xf32>,
    %c0_195 = arith.constant 0 : index
    %c2_196 = arith.constant 2 : index
    %c1_197 = arith.constant 1 : index
    %c0_198 = arith.constant 0 : index
    %76 = vector.load %arg9[%c0_195, %c2_196, %c1_197, %c0_198] : memref<1x18x18x4xf32, #tpu.memory_space<vmem>>, vector<1x16x16x4xf32>
    %c0_199 = arith.constant 0 : index
    %c0_200 = arith.constant 0 : index
    %c0_201 = arith.constant 0 : index
    %c4_202 = arith.constant 4 : index
    %77 = vector.load %arg10[%c0_199, %c0_200, %c0_201, %c4_202] : memref<1x16x16x12xf32, #tpu.memory_space<vmem>>, vector<1x16x16x4xf32>
    tpu.vector_store %arg10[%c0_199, %c0_200, %c0_201, %c4_202], %76 {strides = array<i32>} : memref<1x16x16x12xf32, #tpu.memory_space<vmem>>, vector<1x16x16x4xf32>,
    %c0_203 = arith.constant 0 : index
    %c2_204 = arith.constant 2 : index
    %c2_205 = arith.constant 2 : index
    %c0_206 = arith.constant 0 : index
    %78 = vector.load %arg9[%c0_203, %c2_204, %c2_205, %c0_206] : memref<1x18x18x4xf32, #tpu.memory_space<vmem>>, vector<1x16x16x4xf32>
    %c0_207 = arith.constant 0 : index
    %c0_208 = arith.constant 0 : index
    %c0_209 = arith.constant 0 : index
    %c8_210 = arith.constant 8 : index
    %79 = vector.load %arg10[%c0_207, %c0_208, %c0_209, %c8_210] : memref<1x16x16x12xf32, #tpu.memory_space<vmem>>, vector<1x16x16x4xf32>
    tpu.vector_store %arg10[%c0_207, %c0_208, %c0_209, %c8_210], %78 {strides = array<i32>} : memref<1x16x16x12xf32, #tpu.memory_space<vmem>>, vector<1x16x16x4xf32>,
    %c0_211 = arith.constant 0 : index
    %c0_212 = arith.constant 0 : index
    %c0_213 = arith.constant 0 : index
    %c0_214 = arith.constant 0 : index
    %80 = vector.load %arg10[%c0_211, %c0_212, %c0_213, %c0_214] : memref<1x16x16x12xf32, #tpu.memory_space<vmem>>, vector<1x16x16x12xf32>
    %81 = vector.shape_cast %80 : vector<1x16x16x12xf32> to vector<256x12xf32>
    %c2_215 = arith.constant 2 : index
    %c0_216 = arith.constant 0 : index
    %c0_217 = arith.constant 0 : index
    %82 = vector.load %arg5[%c2_215, %c0_216, %c0_217] : memref<3x12x4xf32, #tpu.memory_space<vmem>>, vector<1x12x4xf32>
    %83 = vector.shape_cast %82 : vector<1x12x4xf32> to vector<12x4xf32>
    %cst_218 = arith.constant dense<0.000000e+00> : vector<256x4xf32>
    %84 = tpu.matmul %81, %83, %cst_218 {dimension_numbers = #tpu.dot_dimension_numbers<[1], [0], [0], [1], [0, 0, 1, 1], [], []>} : vector<256x12xf32>, vector<12x4xf32>, vector<256x4xf32> -> vector<256x4xf32>
    %85 = arith.addf %73, %84 : vector<256x4xf32>
    %c0_219 = arith.constant 0 : index
    %c0_220 = arith.constant 0 : index
    %86 = vector.load %arg6[%c0_219, %c0_220] : memref<1x4xf32, #tpu.memory_space<vmem>>, vector<1x4xf32>
    %87 = vector.broadcast %86 : vector<1x4xf32> to vector<256x4xf32>
    %88 = arith.mulf %85, %87 : vector<256x4xf32>
    %c0_221 = arith.constant 0 : index
    %c0_222 = arith.constant 0 : index
    %89 = vector.load %arg7[%c0_221, %c0_222] : memref<1x4xf32, #tpu.memory_space<vmem>>, vector<1x4xf32>
    %90 = vector.broadcast %89 : vector<1x4xf32> to vector<256x4xf32>
    %91 = arith.addf %88, %90 : vector<256x4xf32>
    %cst_223 = arith.constant 0.000000e+00 : f32
    %92 = vector.broadcast %cst_223 : f32 to vector<256x4xf32>
    %93 = arith.maximumf %91, %92 : vector<256x4xf32>
    %c0_224 = arith.constant 0 : index
    %c0_225 = arith.constant 0 : index
    %c0_226 = arith.constant 0 : index
    %c0_227 = arith.constant 0 : index
    %94 = vector.load %arg1[%c0_224, %c0_225, %c0_226, %c0_227] : memref<1x16x16x4xf32, #tpu.memory_space<vmem>>, vector<1x16x16x4xf32>
    %95 = vector.shape_cast %94 : vector<1x16x16x4xf32> to vector<256x4xf32>
    %96 = arith.addf %93, %95 : vector<256x4xf32>
    %cst_228 = arith.constant 0.000000e+00 : f32
    %97 = vector.broadcast %cst_228 : f32 to vector<256x4xf32>
    %98 = arith.maximumf %96, %97 : vector<256x4xf32>
    %99 = vector.shape_cast %98 : vector<256x4xf32> to vector<1x16x16x4xf32>
    %c0_229 = arith.constant 0 : index
    %c0_230 = arith.constant 0 : index
    %c0_231 = arith.constant 0 : index
    %c0_232 = arith.constant 0 : index
    %100 = vector.load %arg8[%c0_229, %c0_230, %c0_231, %c0_232] : memref<1x16x16x4xf32, #tpu.memory_space<vmem>>, vector<1x16x16x4xf32>
    tpu.vector_store %arg8[%c0_229, %c0_230, %c0_231, %c0_232], %99 {strides = array<i32>} : memref<1x16x16x4xf32, #tpu.memory_space<vmem>>, vector<1x16x16x4xf32>,
    return
  }
  func.func @transform_0(%arg0: i32) -> (i32, i32, i32, i32) {
    %c0_i32 = arith.constant 0 : i32
    %c0_i32_0 = arith.constant 0 : i32
    %c0_i32_1 = arith.constant 0 : i32
    %c0_i32_2 = arith.constant 0 : i32
    return %arg0, %c0_i32, %c0_i32_0, %c0_i32_1 : i32, i32, i32, i32
  }
  func.func @transform_1(%arg0: i32) -> (i32, i32, i32) {
    %c0_i32 = arith.constant 0 : i32
    %c0_i32_0 = arith.constant 0 : i32
    %c0_i32_1 = arith.constant 0 : i32
    %c0_i32_2 = arith.constant 0 : i32
    return %c0_i32, %c0_i32_0, %c0_i32_1 : i32, i32, i32
  }
  func.func @transform_2(%arg0: i32) -> (i32, i32) {
    %c0_i32 = arith.constant 0 : i32
    %c0_i32_0 = arith.constant 0 : i32
    %c0_i32_1 = arith.constant 0 : i32
    return %c0_i32, %c0_i32_0 : i32, i32
  }
  func.func @transform_3(%arg0: i32) -> (i32, i32) {
    %c0_i32 = arith.constant 0 : i32
    %c0_i32_0 = arith.constant 0 : i32
    %c0_i32_1 = arith.constant 0 : i32
    return %c0_i32, %c0_i32_0 : i32, i32
  }
  func.func @transform_4(%arg0: i32) -> (i32, i32, i32) {
    %c0_i32 = arith.constant 0 : i32
    %c0_i32_0 = arith.constant 0 : i32
    %c0_i32_1 = arith.constant 0 : i32
    %c0_i32_2 = arith.constant 0 : i32
    return %c0_i32, %c0_i32_0, %c0_i32_1 : i32, i32, i32
  }
  func.func @transform_5(%arg0: i32) -> (i32, i32) {
    %c0_i32 = arith.constant 0 : i32
    %c0_i32_0 = arith.constant 0 : i32
    %c0_i32_1 = arith.constant 0 : i32
    return %c0_i32, %c0_i32_0 : i32, i32
  }
  func.func @transform_6(%arg0: i32) -> (i32, i32) {
    %c0_i32 = arith.constant 0 : i32
    %c0_i32_0 = arith.constant 0 : i32
    %c0_i32_1 = arith.constant 0 : i32
    return %c0_i32, %c0_i32_0 : i32, i32
  }
  func.func @transform_7(%arg0: i32) -> (i32, i32, i32, i32) {
    %c0_i32 = arith.constant 0 : i32
    %c0_i32_0 = arith.constant 0 : i32
    %c0_i32_1 = arith.constant 0 : i32
    %c0_i32_2 = arith.constant 0 : i32
    return %arg0, %c0_i32, %c0_i32_0, %c0_i32_1 : i32, i32, i32, i32
  }
}

</mosaic_0001>

<bundles_post_ra>
// kernel: tpu_custom_call.1
= control target key start
LH: loop header
LB: loop body
LE: loop exit
PB: predicated region body
PF: predicated region fallthrough
CT: control target
= control target key end

     0   :  { %s6665_s24 = smov 0   ;;  %s9105_s0 = inlined_call_operand.vmem [shape: f32[2,16,16,4], index: 0, kind: input, shape index: {}]   ;;  %s9106_s1 = inlined_call_operand.vmem [shape: f32[3,12,4], index: 1, kind: input, shape index: {}]   ;;  %s9107_s2 = inlined_call_operand.vmem [shape: f32[1,4], index: 2, kind: input, shape index: {}]   ;;  %s9108_s3 = inlined_call_operand.vmem [shape: f32[1,4], index: 3, kind: input, shape index: {}]   ;;  %s9109_s4 = inlined_call_operand.vmem [shape: f32[3,12,4], index: 4, kind: input, shape index: {}]   ;;  %s9110_s5 = inlined_call_operand.vmem [shape: f32[1,4], index: 5, kind: input, shape index: {}]   ;;  %s9111_s6 = inlined_call_operand.vmem [shape: f32[1,4], index: 6, kind: input, shape index: {}]   ;;  %s9112_s7 = inlined_call_operand.vmem [shape: f32[2,16,16,4], index: 7, kind: output, shape index: {}]  }
   0x1 LB: > { %s5698_s25 = sadd.s32 4294967295, %s6619_s24   ;;  %p5702_p0 = scmp.ge.s32.totalorder %s6619_s24, 1  ;;  %s6619_s24 = sphi %s6665_s24, %s17_s24  }
   0x2   : > { %p237_p1 = scmp.lt.s32.totalorder %s6619_s24, 3 }
   0x4   : > { %p238_p2 = pnand %p5702_p0, %p237_p1 }
   0x6   : > { %241 = sbr.rel (%p238_p2) target bundleno = 1422 (0x58e), region = 48 }
   0xd   : > { %vm279_vm0 = vcmask 31744   ;;  %vm282_vm1 = vcmask 25600   ;;  %vm289_vm2 = vcmask 24576   ;;  %v6621_v0 = vmov 0.0   ;;  %p6679_p3 = scmp.lt.s32.totalorder %s5698_s25, 1  ;;  %s6622_s8 = smov 4  }
   0xe   : > { %280 = vst.msk [vmem:[#allocation2] sm:$0xff] %vm279_vm0, %v6621_v0  ;;  %281 = vst.msk [vmem:[#allocation2 + $0x8] sm:$0xff] %vm279_vm0, %v6621_v0  ;;  %s6623_s9 = smov 8   ;;  %v5707_v41 = vld [vmem:[%s9106_s1 + $0x10] sm:$0xff]  ;;  %v5708_v42 = vld [vmem:[%s9106_s1 + $0x18] sm:$0xf] }
   0xf   : > { %285 = vst.msk [vmem:[#allocation2 + $0x198] sm:$0xff] %vm279_vm0, %v6621_v0  ;;  %286 = vst.msk [vmem:[#allocation2 + $0x1a0] sm:$0xff] %vm279_vm0, %v6621_v0  ;;  %s9161_s25 = smov (!%p6679_p3, %s5698_s25), 1  ;;  %vm1450_vm3 = vcmask 1043456   ;;  %v6437_v44 = vpack.c.bf16 %v5708_v42, %v5707_v41  ;;  %vm6624_vm4 = vmmov 1   ;;  %vm610_vm6 = vcmask 64544  }
  0x10   : > { %283 = vst.msk [vmem:[#allocation2 + $0x10] sm:$0x3] %vm282_vm1, %v6621_v0  ;;  %287 = vst.msk [vmem:[#allocation2 + $0x1a8] sm:$0x3] %vm282_vm1, %v6621_v0  ;;  %s5919_s27 = sshll.u32 %s9161_s25, 8  ;;  %vm803_vm7 = vcmask 97344  }
  0x11   : > { %306 = vst.msk [vmem:[#allocation2 + $0x29] sm:$0x1] %vm289_vm2, %v6621_v0  ;;  %290 = vst.msk [vmem:[#allocation2 + $0x18] sm:$0x1] %vm289_vm2, %v6621_v0  ;;  %s6727_s30 = scalar_lea.vmem %s9105_s0, %s5919_s27  ;;  %vm1353_vm8 = vcmask 97280   ;;  %s8949_s28 = scalar_lea.vmem %s9112_s7, %s5919_s27 }
  0x12   : > { %291 = vst.msk [vmem:[#allocation2 + $0x30] sm:$0x1] %vm289_vm2, %v6621_v0  ;;  %292 = vst.msk [vmem:[#allocation2 + $0x48] sm:$0x1] %vm289_vm2, %v6621_v0  ;;  %v322_v1 = vld [vmem:[%s6727_s30] sm:$0xff]  ;;  %v323_v2 = vld [vmem:[%s6727_s30 + $0x8] sm:$0xff] }
  0x13   : > { %293 = vst.msk [vmem:[#allocation2 + $0x60] sm:$0x1] %vm289_vm2, %v6621_v0  ;;  %294 = vst.msk [vmem:[#allocation2 + $0x78] sm:$0x1] %vm289_vm2, %v6621_v0  ;;  %v324_v3 = vld [vmem:[%s6727_s30 + $0x10] sm:$0xff]  ;;  %v325_v8 = vld [vmem:[%s6727_s30 + $0x18] sm:$0xff] }
  0x14   : > { %295 = vst.msk [vmem:[#allocation2 + $0x90] sm:$0x1] %vm289_vm2, %v6621_v0  ;;  %296 = vst.msk [vmem:[#allocation2 + $0xa8] sm:$0x1] %vm289_vm2, %v6621_v0  ;;  %v326_v9 = vld [vmem:[%s6727_s30 + $0x20] sm:$0xff]  ;;  %v327_v10 = vld [vmem:[%s6727_s30 + $0x28] sm:$0xff] }
  0x15   : > { %297 = vst.msk [vmem:[#allocation2 + $0xc0] sm:$0x1] %vm289_vm2, %v6621_v0  ;;  %298 = vst.msk [vmem:[#allocation2 + $0xd8] sm:$0x1] %vm289_vm2, %v6621_v0  ;;  %v450_v4 = vld [vmem:[#allocation2 + $0x1] sm:$0xff]  ;;  %v328_v11 = vld [vmem:[%s6727_s30 + $0x30] sm:$0xff] }
  0x16   : > { %299 = vst.msk [vmem:[#allocation2 + $0xf0] sm:$0x1] %vm289_vm2, %v6621_v0  ;;  %300 = vst.msk [vmem:[#allocation2 + $0x108] sm:$0x1] %vm289_vm2, %v6621_v0  ;;  %v643_v5 = vld [vmem:[#allocation2 + $0x2] sm:$0xff]  ;;  %514 = vrot.lane.b32.xlu0 %v450_v4, %s6622_s8  ;;  %v329_v12 = vld [vmem:[%s6727_s30 + $0x38] sm:$0xff] }
  0x17   : > { %301 = vst.msk [vmem:[#allocation2 + $0x120] sm:$0x1] %vm289_vm2, %v6621_v0  ;;  %302 = vst.msk [vmem:[#allocation2 + $0x138] sm:$0x1] %vm289_vm2, %v6621_v0  ;;  %v451_v6 = vld [vmem:[#allocation2 + $0x9] sm:$0xff]  ;;  %707 = vrot.lane.b32.xlu1 %v643_v5, %s6623_s9  ;;  %v330_v13 = vld [vmem:[%s6727_s30 + $0x40] sm:$0xff] }
  0x18   : > { %303 = vst.msk [vmem:[#allocation2 + $0x150] sm:$0x1] %vm289_vm2, %v6621_v0  ;;  %304 = vst.msk [vmem:[#allocation2 + $0x168] sm:$0x1] %vm289_vm2, %v6621_v0  ;;  %v644_v7 = vld [vmem:[#allocation2 + $0xa] sm:$0xff]  ;;  %v333_v16 = vld [vmem:[%s6727_s30 + $0x58] sm:$0xff] }
  0x19   : > { %305 = vst.msk [vmem:[#allocation2 + $0x180] sm:$0x1] %vm289_vm2, %v6621_v0  ;;  %307 = vst.msk [vmem:[#allocation2 + $0x41] sm:$0x1] %vm289_vm2, %v6621_v0  ;;  %v331_v14 = vld [vmem:[%s6727_s30 + $0x48] sm:$0xff]  ;;  %v332_v15 = vld [vmem:[%s6727_s30 + $0x50] sm:$0xff] }
  0x1a   : > { %308 = vst.msk [vmem:[#allocation2 + $0x59] sm:$0x1] %vm289_vm2, %v6621_v0  ;;  %309 = vst.msk [vmem:[#allocation2 + $0x71] sm:$0x1] %vm289_vm2, %v6621_v0  ;;  %v334_v17 = vld [vmem:[%s6727_s30 + $0x60] sm:$0xff]  ;;  %v335_v18 = vld [vmem:[%s6727_s30 + $0x68] sm:$0xff]  ;;  %516 = vrot.lane.b32.xlu0 %v451_v6, %s6622_s8 }
  0x1b   : > { %310 = vst.msk [vmem:[#allocation2 + $0x89] sm:$0x1] %vm289_vm2, %v6621_v0  ;;  %311 = vst.msk [vmem:[#allocation2 + $0xa1] sm:$0x1] %vm289_vm2, %v6621_v0  ;;  %709 = vrot.lane.b32.xlu1 %v644_v7, %s6623_s9  ;;  %v336_v19 = vld [vmem:[%s6727_s30 + $0x70] sm:$0xff]  ;;  %v337_v20 = vld [vmem:[%s6727_s30 + $0x78] sm:$0xff] }
  0x1c   : > { %312 = vst.msk [vmem:[#allocation2 + $0xb9] sm:$0x1] %vm289_vm2, %v6621_v0  ;;  %313 = vst.msk [vmem:[#allocation2 + $0xd1] sm:$0x1] %vm289_vm2, %v6621_v0  ;;  %v386_v21 = vld [vmem:[#allocation2] sm:$0xff]  ;;  %v387_v22 = vld [vmem:[#allocation2 + $0x8] sm:$0xff] }
  0x1d   : > { %314 = vst.msk [vmem:[#allocation2 + $0xe9] sm:$0x1] %vm289_vm2, %v6621_v0  ;;  %315 = vst.msk [vmem:[#allocation2 + $0x101] sm:$0x1] %vm289_vm2, %v6621_v0  ;;  %v338_v23 = vld [vmem:[%s6727_s30 + $0x80] sm:$0xff]  ;;  %v339_v24 = vld [vmem:[%s6727_s30 + $0x88] sm:$0xff] }
  0x1e   : > { %316 = vst.msk [vmem:[#allocation2 + $0x119] sm:$0x1] %vm289_vm2, %v6621_v0  ;;  %317 = vst.msk [vmem:[#allocation2 + $0x131] sm:$0x1] %vm289_vm2, %v6621_v0  ;;  %v340_v37 = vld [vmem:[%s6727_s30 + $0x90] sm:$0xff]  ;;  %v341_v39 = vld [vmem:[%s6727_s30 + $0x98] sm:$0xff] }
  0x1f   : > { %318 = vst.msk [vmem:[#allocation2 + $0x149] sm:$0x1] %vm289_vm2, %v6621_v0  ;;  %319 = vst.msk [vmem:[#allocation2 + $0x161] sm:$0x1] %vm289_vm2, %v6621_v0  ;;  %v342_v43 = vld [vmem:[%s6727_s30 + $0xa0] sm:$0xff]  ;;  %v343_v46 = vld [vmem:[%s6727_s30 + $0xa8] sm:$0xff] }
  0x20   : > { %320 = vst.msk [vmem:[#allocation2 + $0x179] sm:$0x1] %vm289_vm2, %v6621_v0  ;;  %321 = vst.msk [vmem:[#allocation2 + $0x191] sm:$0x1] %vm289_vm2, %v6621_v0  ;;  %v344_v53 = vld [vmem:[%s6727_s30 + $0xb0] sm:$0xff]  ;;  %v345_v54 = vld [vmem:[%s6727_s30 + $0xb8] sm:$0xff] }
  0x21   : > { %354 = vst.msk [vmem:[#allocation2 + $0x19] sm:$0xff] %vm279_vm0, %v322_v1  ;;  %355 = vst.msk [vmem:[#allocation2 + $0x21] sm:$0xff] %vm279_vm0, %v323_v2  ;;  %v346_v61 = vld [vmem:[%s6727_s30 + $0xc0] sm:$0xff]  ;;  %v347_v62 = vld [vmem:[%s6727_s30 + $0xc8] sm:$0xff] }
  0x22   : > { %356 = vst.msk [vmem:[#allocation2 + $0x31] sm:$0xff] %vm279_vm0, %v324_v3  ;;  %357 = vst.msk [vmem:[#allocation2 + $0x39] sm:$0xff] %vm279_vm0, %v325_v8  ;;  %v348_v5 = vld [vmem:[%s6727_s30 + $0xd0] sm:$0xff]  ;;  %v349_v6 = vld [vmem:[%s6727_s30 + $0xd8] sm:$0xff] }
  0x23   : > { %358 = vst.msk [vmem:[#allocation2 + $0x49] sm:$0xff] %vm279_vm0, %v326_v9  ;;  %359 = vst.msk [vmem:[#allocation2 + $0x51] sm:$0xff] %vm279_vm0, %v327_v10 }
  0x24   : > { %360 = vst.msk [vmem:[#allocation2 + $0x61] sm:$0xff] %vm279_vm0, %v328_v11  ;;  %361 = vst.msk [vmem:[#allocation2 + $0x69] sm:$0xff] %vm279_vm0, %v329_v12 }
  0x25   : > { %362 = vst.msk [vmem:[#allocation2 + $0x79] sm:$0xff] %vm279_vm0, %v330_v13  ;;  %363 = vst.msk [vmem:[#allocation2 + $0x81] sm:$0xff] %vm279_vm0, %v331_v14  ;;  %v350_v13 = vld [vmem:[%s6727_s30 + $0xe0] sm:$0xff]  ;;  %v351_v14 = vld [vmem:[%s6727_s30 + $0xe8] sm:$0xff] }
  0x26   : > { %364 = vst.msk [vmem:[#allocation2 + $0x91] sm:$0xff] %vm279_vm0, %v332_v15  ;;  %365 = vst.msk [vmem:[#allocation2 + $0x99] sm:$0xff] %vm279_vm0, %v333_v16 }
  0x27   : > { %366 = vst.msk [vmem:[#allocation2 + $0xa9] sm:$0xff] %vm279_vm0, %v334_v17  ;;  %367 = vst.msk [vmem:[#allocation2 + $0xb1] sm:$0xff] %vm279_vm0, %v335_v18 }
  0x28   : > { %368 = vst.msk [vmem:[#allocation2 + $0xc1] sm:$0xff] %vm279_vm0, %v336_v19  ;;  %369 = vst.msk [vmem:[#allocation2 + $0xc9] sm:$0xff] %vm279_vm0, %v337_v20  ;;  %v452_v25 = vld [vmem:[#allocation2 + $0x19] sm:$0xff]  ;;  %v453_v26 = vld [vmem:[#allocation2 + $0x21] sm:$0xff] }
  0x29   : > { %418 = vst.msk [vmem:[#allocation3] sm:$0xff] %vm279_vm0, %v386_v21  ;;  %419 = vst.msk [vmem:[#allocation3 + $0x8] sm:$0xff] %vm279_vm0, %v387_v22  ;;  %v6771_v27 = vld [vmem:[#allocation2 + $0x18] sm:$0xff]  ;;  %518 = vrot.lane.b32.xlu0 %v452_v25, %s6622_s8  ;;  %520 = vrot.lane.b32.xlu1 %v453_v26, %s6622_s8  ;;  %v646_v29 = vld [vmem:[#allocation2 + $0x22] sm:$0xff] }
  0x2a   : > { %370 = vst.msk [vmem:[#allocation2 + $0xd9] sm:$0xff] %vm279_vm0, %v338_v23  ;;  %371 = vst.msk [vmem:[#allocation2 + $0xe1] sm:$0xff] %vm279_vm0, %v339_v24  ;;  %v645_v28 = vld [vmem:[#allocation2 + $0x1a] sm:$0xff]  ;;  %v454_v30 = vld [vmem:[#allocation2 + $0x31] sm:$0xff] }
  0x2b   : > { %420 = vst.msk [vmem:[#allocation3 + $0x10] sm:$0xff] %vm279_vm0, %v6771_v27  ;;  %v455_v31 = vld [vmem:[#allocation2 + $0x39] sm:$0xff]  ;;  %v6785_v35 = vld [vmem:[#allocation2 + $0x30] sm:$0xff]  ;;  %v6794_v38 = vld [vmem:[#allocation2 + $0x48] sm:$0xff] }
  0x2c   : > { %v647_v32 = vld [vmem:[#allocation2 + $0x32] sm:$0xff]  ;;  %v648_v33 = vld [vmem:[#allocation2 + $0x3a] sm:$0xff]  ;;  %422 = vst.msk [vmem:[#allocation3 + $0x20] sm:$0xff] %vm279_vm0, %v6785_v35  ;;  %372 = vst.msk [vmem:[#allocation2 + $0xf1] sm:$0xff] %vm279_vm0, %v340_v37 }
  0x2d   : > { %711 = vrot.lane.b32.xlu0 %v645_v28, %s6623_s9  ;;  %713 = vrot.lane.b32.xlu1 %v646_v29, %s6623_s9  ;;  %v6781_v34 = vld [vmem:[#allocation2 + $0x20] sm:$0xff]  ;;  %v6787_v36 = vld [vmem:[#allocation2 + $0x38] sm:$0xff]  ;;  %424 = vst.msk [vmem:[#allocation3 + $0x30] sm:$0xff] %vm279_vm0, %v6794_v38  ;;  %v6802_v40 = vld [vmem:[#allocation2 + $0x50] sm:$0xff] }
  0x2e   : > { %421 = vst.msk [vmem:[#allocation3 + $0x18] sm:$0xff] %vm279_vm0, %v6781_v34  ;;  %423 = vst.msk [vmem:[#allocation3 + $0x28] sm:$0xff] %vm279_vm0, %v6787_v36  ;;  %v456_v47 = vld [vmem:[#allocation2 + $0x49] sm:$0xff]  ;;  %v457_v48 = vld [vmem:[#allocation2 + $0x51] sm:$0xff] }
  0x2f   : > { %373 = vst.msk [vmem:[#allocation2 + $0xf9] sm:$0xff] %vm279_vm0, %v341_v39  ;;  %425 = vst.msk [vmem:[#allocation3 + $0x38] sm:$0xff] %vm279_vm0, %v6802_v40  ;;  %v6829_v49 = vld [vmem:[#allocation2 + $0x60] sm:$0xff]  ;;  %v649_v50 = vld [vmem:[#allocation2 + $0x4a] sm:$0xff] }
  0x30   : > { %vm6814_vm5 = vmpackc.low %vm1450_vm3, %vm6624_vm4  ;;  %374 = vst.msk [vmem:[#allocation2 + $0x109] sm:$0xff] %vm279_vm0, %v342_v43  ;;  %v650_v51 = vld [vmem:[#allocation2 + $0x52] sm:$0xff]  ;;  %v6835_v52 = vld [vmem:[#allocation2 + $0x68] sm:$0xff] }
  0x31   : > { %522 = vrot.lane.b32.xlu0 %v454_v30, %s6622_s8  ;;  %524 = vrot.lane.b32.xlu1 %v455_v31, %s6622_s8  ;;  %375 = vst.msk [vmem:[#allocation2 + $0x111] sm:$0xff] %vm279_vm0, %v343_v46  ;;  %426 = vst.msk [vmem:[#allocation3 + $0x40] sm:$0xff] %vm279_vm0, %v6829_v49  ;;  %v458_v55 = vld [vmem:[#allocation2 + $0x61] sm:$0xff]  ;;  %v459_v56 = vld [vmem:[#allocation2 + $0x69] sm:$0xff] }
  0x32   : > { %6439 = vmatprep.subr.msk.bf16.mxu0 %vm6814_vm5, %v6437_v44  ;;  %427 = vst.msk [vmem:[#allocation3 + $0x48] sm:$0xff] %vm279_vm0, %v6835_v52  ;;  %376 = vst.msk [vmem:[#allocation2 + $0x121] sm:$0xff] %vm279_vm0, %v344_v53  ;;  %v6849_v57 = vld [vmem:[#allocation2 + $0x78] sm:$0xff]  ;;  %v651_v58 = vld [vmem:[#allocation2 + $0x62] sm:$0xff] }
  0x33   : > { %6442 = vmatpush3.bf16.msk.msra.mxu0 %vm6814_vm5, %v6437_v44  ;;  %377 = vst.msk [vmem:[#allocation2 + $0x129] sm:$0xff] %vm279_vm0, %v345_v54  ;;  %428 = vst.msk [vmem:[#allocation3 + $0x50] sm:$0xff] %vm279_vm0, %v6849_v57  ;;  %v652_v59 = vld [vmem:[#allocation2 + $0x6a] sm:$0xff]  ;;  %v6855_v60 = vld [vmem:[#allocation2 + $0x80] sm:$0xff] }
  0x34   : > { %429 = vst.msk [vmem:[#allocation3 + $0x58] sm:$0xff] %vm279_vm0, %v6855_v60  ;;  %378 = vst.msk [vmem:[#allocation2 + $0x139] sm:$0xff] %vm279_vm0, %v346_v61  ;;  %v460_v63 = vld [vmem:[#allocation2 + $0x79] sm:$0xff]  ;;  %v461_v0 = vld [vmem:[#allocation2 + $0x81] sm:$0xff] }
  0x35   : > { %715 = vrot.lane.b32.xlu0 %v647_v32, %s6623_s9  ;;  %717 = vrot.lane.b32.xlu1 %v648_v33, %s6623_s9  ;;  %379 = vst.msk [vmem:[#allocation2 + $0x141] sm:$0xff] %vm279_vm0, %v347_v62  ;;  %v6869_v1 = vld [vmem:[#allocation2 + $0x90] sm:$0xff]  ;;  %v653_v2 = vld [vmem:[#allocation2 + $0x7a] sm:$0xff]  ;;  %v654_v3 = vld [vmem:[#allocation2 + $0x82] sm:$0xff] }
  0x36   : > { %430 = vst.msk [vmem:[#allocation3 + $0x60] sm:$0xff] %vm279_vm0, %v6869_v1  ;;  %v6875_v4 = vld [vmem:[#allocation2 + $0x98] sm:$0xff]  ;;  %380 = vst.msk [vmem:[#allocation2 + $0x151] sm:$0xff] %vm279_vm0, %v348_v5  ;;  %v6889_v9 = vld [vmem:[#allocation2 + $0xa8] sm:$0xff] }
  0x37   : > { %431 = vst.msk [vmem:[#allocation3 + $0x68] sm:$0xff] %vm279_vm0, %v6875_v4  ;;  %v462_v7 = vld [vmem:[#allocation2 + $0x91] sm:$0xff]  ;;  %381 = vst.msk [vmem:[#allocation2 + $0x159] sm:$0xff] %vm279_vm0, %v349_v6  ;;  %v463_v8 = vld [vmem:[#allocation2 + $0x99] sm:$0xff] }
  0x38   : > { %432 = vst.msk [vmem:[#allocation3 + $0x70] sm:$0xff] %vm279_vm0, %v6889_v9  ;;  %v655_v10 = vld [vmem:[#allocation2 + $0x92] sm:$0xff]  ;;  %v656_v11 = vld [vmem:[#allocation2 + $0x9a] sm:$0xff]  ;;  %382 = vst.msk [vmem:[#allocation2 + $0x169] sm:$0xff] %vm279_vm0, %v350_v13 }
  0x39   : > { %998 = vrot.lane.b32.xlu0 %v452_v25, %s6622_s8  ;;  %1000 = vrot.lane.b32.xlu1 %v453_v26, %s6622_s8  ;;  %v6895_v12 = vld [vmem:[#allocation2 + $0xb0] sm:$0xff]  ;;  %383 = vst.msk [vmem:[#allocation2 + $0x171] sm:$0xff] %vm279_vm0, %v351_v14  ;;  %v6909_v17 = vld [vmem:[#allocation2 + $0xc0] sm:$0xff]  ;;  %v6915_v20 = vld [vmem:[#allocation2 + $0xc8] sm:$0xff] }
  0x3a   : > { %433 = vst.msk [vmem:[#allocation3 + $0x78] sm:$0xff] %vm279_vm0, %v6895_v12  ;;  %v464_v15 = vld [vmem:[#allocation2 + $0xa9] sm:$0xff]  ;;  %v465_v16 = vld [vmem:[#allocation2 + $0xb1] sm:$0xff]  ;;  %434 = vst.msk [vmem:[#allocation3 + $0x80] sm:$0xff] %vm279_vm0, %v6909_v17 }
  0x3b   : > { %v657_v18 = vld [vmem:[#allocation2 + $0xaa] sm:$0xff]  ;;  %v658_v19 = vld [vmem:[#allocation2 + $0xb2] sm:$0xff]  ;;  %435 = vst.msk [vmem:[#allocation3 + $0x88] sm:$0xff] %vm279_vm0, %v6915_v20  ;;  %v6923_v21 = vld [vmem:[#allocation2 + $0xc1] sm:$0xff] }
  0x3c   : > { %v6928_v22 = vld [vmem:[#allocation2 + $0xc9] sm:$0xff]  ;;  %v6930_v23 = vld [vmem:[#allocation2 + $0xd8] sm:$0xff]  ;;  %v6967_v43 = vld [vmem:[#allocation2 + $0xe1] sm:$0xff] }
  0x3d   : > { %1190 = vrot.lane.b32.xlu0 %v645_v28, %s6623_s9  ;;  %526 = vrot.lane.b32.xlu1 %v456_v47, %s6622_s8  ;;  %436 = vst.msk [vmem:[#allocation3 + $0x90] sm:$0xff] %vm279_vm0, %v6930_v23  ;;  %v352_v24 = vld [vmem:[%s6727_s30 + $0xf0] sm:$0xff]  ;;  %v353_v25 = vld [vmem:[%s6727_s30 + $0xf8] sm:$0xff]  ;;  %v659_v26 = vld [vmem:[#allocation2 + $0xc2] sm:$0xff] }
  0x3e   : > { %384 = vst.msk [vmem:[#allocation2 + $0x181] sm:$0xff] %vm279_vm0, %v352_v24  ;;  %v6940_v28 = vld [vmem:[#allocation2 + $0xca] sm:$0xff]  ;;  %385 = vst.msk [vmem:[#allocation2 + $0x189] sm:$0xff] %vm279_vm0, %v353_v25  ;;  %v6956_v37 = vld [vmem:[#allocation2 + $0xd9] sm:$0xff] }
  0x3f   : > { %v6986_v54 = vld [vmem:[#allocation2 + $0xf8] sm:$0xff]  ;;  %v7058_v13 = vld [vmem:[#allocation2 + $0x109] sm:$0xff]  ;;  %v7073_v25 = vld [vmem:[#allocation2 + $0x120] sm:$0xff] }
  0x40   : > { %439 = vst.msk [vmem:[#allocation3 + $0xa8] sm:$0xff] %vm279_vm0, %v6986_v54  ;;  %v7037_v5 = vld [vmem:[#allocation2 + $0xf2] sm:$0xff]  ;;  %v7039_v6 = vld [vmem:[#allocation2 + $0xfa] sm:$0xff]  ;;  %442 = vst.msk [vmem:[#allocation3 + $0xc0] sm:$0xff] %vm279_vm0, %v7073_v25 }
  0x41   : > { %1192 = vrot.lane.b32.xlu0 %v646_v29, %s6623_s9  ;;  %528 = vrot.lane.b32.xlu1 %v457_v48, %s6622_s8 }
  0x45   : > { %719 = vrot.lane.b32.xlu0 %v649_v50, %s6623_s9  ;;  %721 = vrot.lane.b32.xlu1 %v650_v51, %s6623_s9 }
  0x49   : > { %1002 = vrot.lane.b32.xlu0 %v454_v30, %s6622_s8  ;;  %1004 = vrot.lane.b32.xlu1 %v455_v31, %s6622_s8  ;;  %v6943_v31 = vld [vmem:[#allocation2 + $0xe0] sm:$0xff] }
  0x4a   : > { %437 = vst.msk [vmem:[#allocation3 + $0x98] sm:$0xff] %vm279_vm0, %v6943_v31 }
  0x4d   : > { %1194 = vrot.lane.b32.xlu0 %v647_v32, %s6623_s9  ;;  %530 = vrot.lane.b32.xlu1 %v458_v55, %s6622_s8 }
  0x51   : > { %1196 = vrot.lane.b32.xlu0 %v648_v33, %s6623_s9  ;;  %532 = vrot.lane.b32.xlu1 %v459_v56, %s6622_s8 }
  0x55   : > { %723 = vrot.lane.b32.xlu0 %v651_v58, %s6623_s9  ;;  %725 = vrot.lane.b32.xlu1 %v652_v59, %s6623_s9 }
  0x59   : > { %1006 = vrot.lane.b32.xlu0 %v456_v47, %s6622_s8  ;;  %1008 = vrot.lane.b32.xlu1 %v457_v48, %s6622_s8  ;;  %v6969_v47 = vld [vmem:[#allocation2 + $0xf0] sm:$0xff] }
  0x5a   : > { %438 = vst.msk [vmem:[#allocation3 + $0xa0] sm:$0xff] %vm279_vm0, %v6969_v47 }
  0x5d   : > { %1198 = vrot.lane.b32.xlu0 %v649_v50, %s6623_s9  ;;  %534 = vrot.lane.b32.xlu1 %v460_v63, %s6622_s8  ;;  %v6984_v50 = vld [vmem:[#allocation2 + $0xe2] sm:$0xff] }
  0x61   : > { %1200 = vrot.lane.b32.xlu0 %v650_v51, %s6623_s9  ;;  %536 = vrot.lane.b32.xlu1 %v461_v0, %s6622_s8 }
  0x65   : > { %727 = vrot.lane.b32.xlu0 %v653_v2, %s6623_s9  ;;  %729 = vrot.lane.b32.xlu1 %v654_v3, %s6623_s9 }
  0x69   : > { %1010 = vrot.lane.b32.xlu0 %v458_v55, %s6622_s8  ;;  %1012 = vrot.lane.b32.xlu1 %v459_v56, %s6622_s8 }
  0x6d   : > { %1202 = vrot.lane.b32.xlu0 %v651_v58, %s6623_s9  ;;  %538 = vrot.lane.b32.xlu1 %v462_v7, %s6622_s8 }
  0x71   : > { %1204 = vrot.lane.b32.xlu0 %v652_v59, %s6623_s9  ;;  %540 = vrot.lane.b32.xlu1 %v463_v8, %s6622_s8  ;;  %v7010_v59 = vld [vmem:[#allocation2 + $0xf1] sm:$0xff] }
  0x75   : > { %731 = vrot.lane.b32.xlu0 %v655_v10, %s6623_s9  ;;  %733 = vrot.lane.b32.xlu1 %v656_v11, %s6623_s9 }
  0x79   : > { %1014 = vrot.lane.b32.xlu0 %v460_v63, %s6622_s8  ;;  %1016 = vrot.lane.b32.xlu1 %v461_v0, %s6622_s8 }
  0x7d   : > { %1206 = vrot.lane.b32.xlu0 %v653_v2, %s6623_s9  ;;  %542 = vrot.lane.b32.xlu1 %v464_v15, %s6622_s8 }
  0x81   : > { %1208 = vrot.lane.b32.xlu0 %v654_v3, %s6623_s9  ;;  %544 = vrot.lane.b32.xlu1 %v465_v16, %s6622_s8  ;;  %v7023_v3 = vld [vmem:[#allocation2 + $0x108] sm:$0xff] }
  0x82   : > { %440 = vst.msk [vmem:[#allocation3 + $0xb0] sm:$0xff] %vm279_vm0, %v7023_v3 }
  0x85   : > { %735 = vrot.lane.b32.xlu0 %v657_v18, %s6623_s9  ;;  %737 = vrot.lane.b32.xlu1 %v658_v19, %s6623_s9 }
  0x88   : > { %v515_v29 = vpop.permute.xlu0 %514 }
  0x89   : > { %1018 = vrot.lane.b32.xlu0 %v462_v7, %s6622_s8  ;;  %1020 = vrot.lane.b32.xlu1 %v463_v8, %s6622_s8  ;;  %v708_v30 = vpop.permute.xlu1 %707  ;;  %611 = vst.msk [vmem:[#allocation3] sm:$0xff] %vm610_vm6, %v515_v29 }
  0x8a   : > { %804 = vst.msk [vmem:[#allocation3] sm:$0xff] %vm803_vm7, %v708_v30 }
  0x8c   : > { %v517_v32 = vpop.permute.xlu0 %516 }
  0x8d   : > { %1210 = vrot.lane.b32.xlu0 %v655_v10, %s6623_s9  ;;  %546 = vrot.lane.b32.xlu1 %v6923_v21, %s6622_s8  ;;  %v710_v33 = vpop.permute.xlu1 %709  ;;  %612 = vst.msk [vmem:[#allocation3 + $0x8] sm:$0xff] %vm610_vm6, %v517_v32  ;;  %v7041_v10 = vld [vmem:[#allocation2 + $0x110] sm:$0xff]  ;;  %v7091_v32 = vld [vmem:[#allocation2 + $0x128] sm:$0xff] }
  0x8e   : > { %805 = vst.msk [vmem:[#allocation3 + $0x8] sm:$0xff] %vm803_vm7, %v710_v33 }
  0x8f   : > { %441 = vst.msk [vmem:[#allocation3 + $0xb8] sm:$0xff] %vm279_vm0, %v7041_v10  ;;  %443 = vst.msk [vmem:[#allocation3 + $0xc8] sm:$0xff] %vm279_vm0, %v7091_v32 }
  0x91   : > { %1212 = vrot.lane.b32.xlu0 %v656_v11, %s6623_s9  ;;  %548 = vrot.lane.b32.xlu1 %v6928_v22, %s6622_s8  ;;  %v6960_v42 = vld [vmem:[#allocation3] sm:$0xff] }
  0x92   : > { %902 = vst.msk [vmem:[#allocation3] sm:$0xff] %vm279_vm0, %v6771_v27  ;;  %v6982_v27 = vld [vmem:[#allocation2 + $0xda] sm:$0xff] }
  0x95   : > { %739 = vrot.lane.b32.xlu0 %v659_v26, %s6623_s9  ;;  %741 = vrot.lane.b32.xlu1 %v6940_v28, %s6623_s9  ;;  %v6973_v48 = vld [vmem:[#allocation3 + $0x8] sm:$0xff] }
  0x96   : > { %903 = vst.msk [vmem:[#allocation3 + $0x8] sm:$0xff] %vm279_vm0, %v6781_v34 }
  0x99   : > { %1022 = vrot.lane.b32.xlu0 %v464_v15, %s6622_s8  ;;  %1024 = vrot.lane.b32.xlu1 %v465_v16, %s6622_s8 }
  0x9b   : > { %v519_v39 = vpop.permute.xlu0 %518  ;;  %v521_v41 = vpop.permute.xlu1 %520 }
  0x9c   : > { %613 = vst.msk [vmem:[#allocation3 + $0x10] sm:$0xff] %vm610_vm6, %v519_v39  ;;  %614 = vst.msk [vmem:[#allocation3 + $0x18] sm:$0xff] %vm610_vm6, %v521_v41 }
  0x9d   : > { %1214 = vrot.lane.b32.xlu0 %v657_v18, %s6623_s9  ;;  %550 = vrot.lane.b32.xlu1 %v6956_v37, %s6622_s8  ;;  %v7067_v18 = vld [vmem:[#allocation2 + $0x111] sm:$0xff] }
  0x9f   : > { %v712_v44 = vpop.permute.xlu0 %711  ;;  %v714_v46 = vpop.permute.xlu1 %713 }
  0xa0   : > { %806 = vst.msk [vmem:[#allocation3 + $0x10] sm:$0xff] %vm803_vm7, %v712_v44  ;;  %807 = vst.msk [vmem:[#allocation3 + $0x18] sm:$0xff] %vm803_vm7, %v714_v46  ;;  %v7117_v44 = vld [vmem:[#allocation2 + $0x129] sm:$0xff] }
  0xa1   : > { %1216 = vrot.lane.b32.xlu0 %v658_v19, %s6623_s9  ;;  %552 = vrot.lane.b32.xlu1 %v6967_v43, %s6622_s8 }
  0xa3   : > { %v523_v51 = vpop.permute.xlu0 %522  ;;  %v525_v53 = vpop.permute.xlu1 %524 }
  0xa4   : > { %615 = vst.msk [vmem:[#allocation3 + $0x20] sm:$0xff] %vm610_vm6, %v523_v51  ;;  %616 = vst.msk [vmem:[#allocation3 + $0x28] sm:$0xff] %vm610_vm6, %v525_v53  ;;  %v7123_v53 = vld [vmem:[#allocation2 + $0x138] sm:$0xff] }
  0xa5   : > { %743 = vrot.lane.b32.xlu0 %v6982_v27, %s6623_s9  ;;  %745 = vrot.lane.b32.xlu1 %v6984_v50, %s6623_s9  ;;  %444 = vst.msk [vmem:[#allocation3 + $0xd0] sm:$0xff] %vm279_vm0, %v7123_v53 }
  0xa7   : > { %v716_v34 = vpop.permute.xlu0 %715  ;;  %v718_v55 = vpop.permute.xlu1 %717  ;;  %v6996_v56 = vld [vmem:[#allocation3 + $0x10] sm:$0xff]  ;;  %v6998_v58 = vld [vmem:[#allocation3 + $0x18] sm:$0xff] }
  0xa8   : > { %808 = vst.msk [vmem:[#allocation3 + $0x20] sm:$0xff] %vm803_vm7, %v716_v34  ;;  %809 = vst.msk [vmem:[#allocation3 + $0x28] sm:$0xff] %vm803_vm7, %v718_v55  ;;  %v7137_v34 = vld [vmem:[#allocation2 + $0x122] sm:$0xff]  ;;  %v7139_v55 = vld [vmem:[#allocation2 + $0x12a] sm:$0xff] }
  0xa9   : > { %904 = vst.msk [vmem:[#allocation3 + $0x10] sm:$0xff] %vm279_vm0, %v6785_v35  ;;  %905 = vst.msk [vmem:[#allocation3 + $0x18] sm:$0xff] %vm279_vm0, %v6787_v36  ;;  %1026 = vrot.lane.b32.xlu0 %v6923_v21, %s6622_s8  ;;  %1028 = vrot.lane.b32.xlu1 %v6928_v22, %s6622_s8  ;;  %v7017_v35 = vld [vmem:[#allocation2 + $0xf9] sm:$0xff] }
  0xab   : > { %v999_v61 = vpop.permute.xlu0 %998  ;;  %v1001_v62 = vpop.permute.xlu1 %1000 }
  0xac   : > { %1094 = vst.msk [vmem:[#allocation3] sm:$0xff] %vm610_vm6, %v999_v61  ;;  %1095 = vst.msk [vmem:[#allocation3 + $0x8] sm:$0xff] %vm610_vm6, %v1001_v62  ;;  %v7141_v62 = vld [vmem:[#allocation2 + $0x140] sm:$0xff] }
  0xad   : > { %1218 = vrot.lane.b32.xlu0 %v659_v26, %s6623_s9  ;;  %554 = vrot.lane.b32.xlu1 %v7010_v59, %s6622_s8  ;;  %v7087_v26 = vld [vmem:[#allocation2 + $0x10a] sm:$0xff]  ;;  %445 = vst.msk [vmem:[#allocation3 + $0xd8] sm:$0xff] %vm279_vm0, %v7141_v62 }
  0xaf   : > { %v1191_v36 = vpop.permute.xlu0 %1190  ;;  %v527_v63 = vpop.permute.xlu1 %526  ;;  %v7019_v0 = vld [vmem:[#allocation3 + $0x20] sm:$0xff]  ;;  %v7021_v2 = vld [vmem:[#allocation3 + $0x28] sm:$0xff] }
  0xb0   : > { %1286 = vst.msk [vmem:[#allocation3] sm:$0xff] %vm803_vm7, %v1191_v36  ;;  %v7158_v36 = vld [vmem:[#allocation2 + $0x139] sm:$0xff] }
  0xb1   : > { %617 = vst.msk [vmem:[#allocation3 + $0x30] sm:$0xff] %vm610_vm6, %v527_v63  ;;  %1220 = vrot.lane.b32.xlu0 %v6940_v28, %s6623_s9  ;;  %556 = vrot.lane.b32.xlu1 %v7017_v35, %s6622_s8  ;;  %v7089_v28 = vld [vmem:[#allocation2 + $0x112] sm:$0xff] }
  0xb2   : > { %906 = vst.msk [vmem:[#allocation3 + $0x20] sm:$0xff] %vm279_vm0, %v6794_v38  ;;  %907 = vst.msk [vmem:[#allocation3 + $0x28] sm:$0xff] %vm279_vm0, %v6802_v40 }
  0xb3   : > { %v1193_v7 = vpop.permute.xlu0 %1192  ;;  %v529_v8 = vpop.permute.xlu1 %528 }
  0xb4   : > { %1287 = vst.msk [vmem:[#allocation3 + $0x8] sm:$0xff] %vm803_vm7, %v1193_v7  ;;  %v868_v7 = vld [vmem:[%s9106_s1] sm:$0xff] }
  0xb5   : > { %618 = vst.msk [vmem:[#allocation3 + $0x38] sm:$0xff] %vm610_vm6, %v529_v8  ;;  %747 = vrot.lane.b32.xlu0 %v7037_v5, %s6623_s9  ;;  %749 = vrot.lane.b32.xlu1 %v7039_v6, %s6623_s9  ;;  %v869_v8 = vld [vmem:[%s9106_s1 + $0x8] sm:$0xf] }
  0xb7   : > { %v720_v38 = vpop.permute.xlu0 %719  ;;  %v722_v40 = vpop.permute.xlu1 %721  ;;  %v1318_v11 = vld [vmem:[#allocation3] sm:$0xff] }
  0xb8   : > { %810 = vst.msk [vmem:[#allocation3 + $0x30] sm:$0xff] %vm803_vm7, %v720_v38  ;;  %811 = vst.msk [vmem:[#allocation3 + $0x38] sm:$0xff] %vm803_vm7, %v722_v40  ;;  %6129 = vmatprep.mubr.msk.f32.mxu0 %vm1353_vm8, %v1318_v11  ;;  %v6443_v38 = vpack.c.bf16 %v869_v8, %v868_v7  ;;  %v7173_v40 = vld [vmem:[#allocation2 + $0x141] sm:$0xff]  ;;  %v7251_v7 = vld [vmem:[#allocation2 + $0x170] sm:$0xff] }
  0xb9   : > { %1030 = vrot.lane.b32.xlu0 %v6956_v37, %s6622_s8  ;;  %1032 = vrot.lane.b32.xlu1 %v6967_v43, %s6622_s8  ;;  %v7108_v37 = vld [vmem:[#allocation2 + $0x121] sm:$0xff]  ;;  %449 = vst.msk [vmem:[#allocation3 + $0xf8] sm:$0xff] %vm279_vm0, %v7251_v7 }
  0xba   : > { %6445 = vmatprep.subr.msk.bf16.mxu0 %vm6814_vm5, %v6443_v38 }
  0xbb   : > { %v1003_v14 = vpop.permute.xlu0 %1002  ;;  %v1005_v15 = vpop.permute.xlu1 %1004  ;;  %v1319_v16 = vld [vmem:[#allocation3 + $0x8] sm:$0xff] }
  0xbc   : > { %1096 = vst.msk [vmem:[#allocation3 + $0x10] sm:$0xff] %vm610_vm6, %v1003_v14  ;;  %1097 = vst.msk [vmem:[#allocation3 + $0x18] sm:$0xff] %vm610_vm6, %v1005_v15  ;;  %6130 = vmatmul.mubr.msk.f32.vlgmr.msra.gmra.mrb[0].mxu0 %vm1353_vm8, %v1319_v16  ;;  %v7181_v16 = vld [vmem:[#allocation2 + $0x150] sm:$0xff] }
  0xbd   : > { %1222 = vrot.lane.b32.xlu0 %v6982_v27, %s6623_s9  ;;  %558 = vrot.lane.b32.xlu1 %v7058_v13, %s6622_s8  ;;  %446 = vst.msk [vmem:[#allocation3 + $0xe0] sm:$0xff] %vm279_vm0, %v7181_v16 }
  0xbe   : > { %6448 = vmatpush3.bf16.msk.msra.mxu0 %vm6814_vm5, %v6443_v38  ;;  %v7268_v38 = vld [vmem:[#allocation2 + $0x169] sm:$0xff] }
  0xbf   : > { %v1195_v19 = vpop.permute.xlu0 %1194  ;;  %v531_v21 = vpop.permute.xlu1 %530  ;;  %v7069_v22 = vld [vmem:[#allocation3 + $0x30] sm:$0xff]  ;;  %v7071_v24 = vld [vmem:[#allocation3 + $0x38] sm:$0xff] }
  0xc0   : > { %1288 = vst.msk [vmem:[#allocation3 + $0x10] sm:$0xff] %vm803_vm7, %v1195_v19  ;;  %v7197_v19 = vld [vmem:[#allocation2 + $0x13a] sm:$0xff] }
  0xc1   : > { %619 = vst.msk [vmem:[#allocation3 + $0x40] sm:$0xff] %vm610_vm6, %v531_v21  ;;  %1224 = vrot.lane.b32.xlu0 %v6984_v50, %s6623_s9  ;;  %560 = vrot.lane.b32.xlu1 %v7067_v18, %s6622_s8  ;;  %v7199_v21 = vld [vmem:[#allocation2 + $0x142] sm:$0xff] }
  0xc2   : > { %908 = vst.msk [vmem:[#allocation3 + $0x30] sm:$0xff] %vm279_vm0, %v6829_v49  ;;  %909 = vst.msk [vmem:[#allocation3 + $0x38] sm:$0xff] %vm279_vm0, %v6835_v52 }
  0xc3   : > { %v1197_v29 = vpop.permute.xlu0 %1196  ;;  %v533_v30 = vpop.permute.xlu1 %532 }
  0xc4   : > { %1289 = vst.msk [vmem:[#allocation3 + $0x18] sm:$0xff] %vm803_vm7, %v1197_v29 }
  0xc5   : > { %620 = vst.msk [vmem:[#allocation3 + $0x48] sm:$0xff] %vm610_vm6, %v533_v30  ;;  %751 = vrot.lane.b32.xlu0 %v7087_v26, %s6623_s9  ;;  %753 = vrot.lane.b32.xlu1 %v7089_v28, %s6623_s9  ;;  %v7201_v30 = vld [vmem:[#allocation2 + $0x158] sm:$0xff] }
  0xc6   : > { %447 = vst.msk [vmem:[#allocation3 + $0xe8] sm:$0xff] %vm279_vm0, %v7201_v30 }
  0xc7   : > { %v724_v49 = vpop.permute.xlu0 %723  ;;  %v726_v52 = vpop.permute.xlu1 %725  ;;  %v1320_v33 = vld [vmem:[#allocation3 + $0x10] sm:$0xff] }
  0xc8   : > { %812 = vst.msk [vmem:[#allocation3 + $0x40] sm:$0xff] %vm803_vm7, %v724_v49  ;;  %813 = vst.msk [vmem:[#allocation3 + $0x48] sm:$0xff] %vm803_vm7, %v726_v52  ;;  %6132 = vmatprep.mubr.msk.f32.mxu0 %vm1353_vm8, %v1320_v33  ;;  %v7218_v33 = vld [vmem:[#allocation2 + $0x151] sm:$0xff] }
  0xc9   : > { %1034 = vrot.lane.b32.xlu0 %v7010_v59, %s6622_s8  ;;  %1036 = vrot.lane.b32.xlu1 %v7017_v35, %s6622_s8 }
  0xcb   : > { %v1007_v39 = vpop.permute.xlu0 %1006  ;;  %v1009_v41 = vpop.permute.xlu1 %1008  ;;  %v1321_v43 = vld [vmem:[#allocation3 + $0x18] sm:$0xff] }
  0xcc   : > { %1098 = vst.msk [vmem:[#allocation3 + $0x20] sm:$0xff] %vm610_vm6, %v1007_v39  ;;  %1099 = vst.msk [vmem:[#allocation3 + $0x28] sm:$0xff] %vm610_vm6, %v1009_v41  ;;  %6133 = vmatmul.mubr.msk.f32.gmra.mrb[2].mxu0 %vm1353_vm8, %v1321_v43 }
  0xcd   : > { %1226 = vrot.lane.b32.xlu0 %v7037_v5, %s6623_s9  ;;  %562 = vrot.lane.b32.xlu1 %v7108_v37, %s6622_s8 }
  0xcf   : > { %v1199_v46 = vpop.permute.xlu0 %1198  ;;  %v535_v27 = vpop.permute.xlu1 %534  ;;  %v7119_v50 = vld [vmem:[#allocation3 + $0x40] sm:$0xff]  ;;  %v7121_v51 = vld [vmem:[#allocation3 + $0x48] sm:$0xff] }
  0xd0   : > { %1290 = vst.msk [vmem:[#allocation3 + $0x20] sm:$0xff] %vm803_vm7, %v1199_v46  ;;  %v7227_v46 = vld [vmem:[#allocation2 + $0x159] sm:$0xff] }
  0xd1   : > { %621 = vst.msk [vmem:[#allocation3 + $0x50] sm:$0xff] %vm610_vm6, %v535_v27  ;;  %1228 = vrot.lane.b32.xlu0 %v7039_v6, %s6623_s9  ;;  %564 = vrot.lane.b32.xlu1 %v7117_v44, %s6622_s8 }
  0xd2   : > { %910 = vst.msk [vmem:[#allocation3 + $0x40] sm:$0xff] %vm279_vm0, %v6849_v57  ;;  %911 = vst.msk [vmem:[#allocation3 + $0x48] sm:$0xff] %vm279_vm0, %v6855_v60 }
  0xd3   : > { %v1201_v59 = vpop.permute.xlu0 %1200  ;;  %v537_v61 = vpop.permute.xlu1 %536 }
  0xd4   : > { %1291 = vst.msk [vmem:[#allocation3 + $0x28] sm:$0xff] %vm803_vm7, %v1201_v59 }
  0xd5   : > { %622 = vst.msk [vmem:[#allocation3 + $0x58] sm:$0xff] %vm610_vm6, %v537_v61  ;;  %755 = vrot.lane.b32.xlu0 %v7137_v34, %s6623_s9  ;;  %757 = vrot.lane.b32.xlu1 %v7139_v55, %s6623_s9 }
  0xd7   : > { %v728_v57 = vpop.permute.xlu0 %727  ;;  %v730_v60 = vpop.permute.xlu1 %729  ;;  %v1322_v35 = vld [vmem:[#allocation3 + $0x20] sm:$0xff] }
  0xd8   : > { %814 = vst.msk [vmem:[#allocation3 + $0x50] sm:$0xff] %vm803_vm7, %v728_v57  ;;  %815 = vst.msk [vmem:[#allocation3 + $0x58] sm:$0xff] %vm803_vm7, %v730_v60  ;;  %6135 = vmatprep.mubr.msk.f32.mxu0 %vm1353_vm8, %v1322_v35  ;;  %v7233_v60 = vld [vmem:[#allocation2 + $0x168] sm:$0xff]  ;;  %v7247_v35 = vld [vmem:[#allocation2 + $0x152] sm:$0xff] }
  0xd9   : > { %1038 = vrot.lane.b32.xlu0 %v7058_v13, %s6622_s8  ;;  %1040 = vrot.lane.b32.xlu1 %v7067_v18, %s6622_s8  ;;  %448 = vst.msk [vmem:[#allocation3 + $0xf0] sm:$0xff] %vm279_vm0, %v7233_v60 }
  0xdb   : > { %v1011_v63 = vpop.permute.xlu0 %1010  ;;  %v1013_v5 = vpop.permute.xlu1 %1012  ;;  %v1323_v6 = vld [vmem:[#allocation3 + $0x28] sm:$0xff] }
  0xdc   : > { %1100 = vst.msk [vmem:[#allocation3 + $0x30] sm:$0xff] %vm610_vm6, %v1011_v63  ;;  %1101 = vst.msk [vmem:[#allocation3 + $0x38] sm:$0xff] %vm610_vm6, %v1013_v5  ;;  %6136 = vmatmul.mubr.msk.f32.gmra.mrb[4].mxu0 %vm1353_vm8, %v1323_v6  ;;  %v7249_v63 = vld [vmem:[#allocation2 + $0x15a] sm:$0xff] }
  0xdd   : > { %1230 = vrot.lane.b32.xlu0 %v7087_v26, %s6623_s9  ;;  %566 = vrot.lane.b32.xlu1 %v7158_v36, %s6622_s8 }
  0xdf   : > { %v1203_v11 = vpop.permute.xlu0 %1202  ;;  %v539_v13 = vpop.permute.xlu1 %538  ;;  %v7175_v14 = vld [vmem:[#allocation3 + $0x50] sm:$0xff]  ;;  %v7177_v15 = vld [vmem:[#allocation3 + $0x58] sm:$0xff] }
  0xe0   : > { %1292 = vst.msk [vmem:[#allocation3 + $0x30] sm:$0xff] %vm803_vm7, %v1203_v11 }
  0xe1   : > { %623 = vst.msk [vmem:[#allocation3 + $0x60] sm:$0xff] %vm610_vm6, %v539_v13  ;;  %1232 = vrot.lane.b32.xlu0 %v7089_v28, %s6623_s9  ;;  %568 = vrot.lane.b32.xlu1 %v7173_v40, %s6622_s8 }
  0xe2   : > { %912 = vst.msk [vmem:[#allocation3 + $0x50] sm:$0xff] %vm279_vm0, %v6869_v1  ;;  %913 = vst.msk [vmem:[#allocation3 + $0x58] sm:$0xff] %vm279_vm0, %v6875_v4 }
  0xe3   : > { %v1205_v1 = vpop.permute.xlu0 %1204  ;;  %v541_v29 = vpop.permute.xlu1 %540 }
  0xe4   : > { %1293 = vst.msk [vmem:[#allocation3 + $0x38] sm:$0xff] %vm803_vm7, %v1205_v1 }
  0xe5   : > { %624 = vst.msk [vmem:[#allocation3 + $0x68] sm:$0xff] %vm610_vm6, %v541_v29  ;;  %759 = vrot.lane.b32.xlu0 %v7197_v19, %s6623_s9  ;;  %761 = vrot.lane.b32.xlu1 %v7199_v21, %s6623_s9  ;;  %v7277_v29 = vld [vmem:[#allocation2 + $0x171] sm:$0xff] }
  0xe7   : > { %v732_v4 = vpop.permute.xlu0 %731  ;;  %v734_v49 = vpop.permute.xlu1 %733  ;;  %v1324_v52 = vld [vmem:[#allocation3 + $0x30] sm:$0xff] }
  0xe8   : > { %816 = vst.msk [vmem:[#allocation3 + $0x60] sm:$0xff] %vm803_vm7, %v732_v4  ;;  %817 = vst.msk [vmem:[#allocation3 + $0x68] sm:$0xff] %vm803_vm7, %v734_v49  ;;  %6138 = vmatprep.mubr.msk.f32.mxu0 %vm1353_vm8, %v1324_v52 }
  0xe9   : > { %1042 = vrot.lane.b32.xlu0 %v7108_v37, %s6622_s8  ;;  %1044 = vrot.lane.b32.xlu1 %v7117_v44, %s6622_s8 }
  0xeb   : > { %v1015_v39 = vpop.permute.xlu0 %1014  ;;  %v1017_v41 = vpop.permute.xlu1 %1016  ;;  %v1325_v43 = vld [vmem:[#allocation3 + $0x38] sm:$0xff] }
  0xec   : > { %1102 = vst.msk [vmem:[#allocation3 + $0x40] sm:$0xff] %vm610_vm6, %v1015_v39  ;;  %1103 = vst.msk [vmem:[#allocation3 + $0x48] sm:$0xff] %vm610_vm6, %v1017_v41  ;;  %6139 = vmatmul.mubr.msk.f32.gmra.mrb[6].mxu0 %vm1353_vm8, %v1325_v43  ;;  %v7293_v41 = vld [vmem:[#allocation2 + $0x16a] sm:$0xff]  ;;  %v7295_v43 = vld [vmem:[#allocation2 + $0x172] sm:$0xff] }
  0xed   : > { %1234 = vrot.lane.b32.xlu0 %v7137_v34, %s6623_s9  ;;  %570 = vrot.lane.b32.xlu1 %v7218_v33, %s6622_s8 }
  0xef   : > { %v1207_v27 = vpop.permute.xlu0 %1206  ;;  %v543_v59 = vpop.permute.xlu1 %542  ;;  %v7229_v61 = vld [vmem:[#allocation3 + $0x60] sm:$0xff]  ;;  %v7231_v57 = vld [vmem:[#allocation3 + $0x68] sm:$0xff] }
  0xf0   : > { %1294 = vst.msk [vmem:[#allocation3 + $0x40] sm:$0xff] %vm803_vm7, %v1207_v27 }
  0xf1   : > { %625 = vst.msk [vmem:[#allocation3 + $0x70] sm:$0xff] %vm610_vm6, %v543_v59  ;;  %1236 = vrot.lane.b32.xlu0 %v7139_v55, %s6623_s9  ;;  %572 = vrot.lane.b32.xlu1 %v7227_v46, %s6622_s8 }
  0xf2   : > { %914 = vst.msk [vmem:[#allocation3 + $0x60] sm:$0xff] %vm279_vm0, %v6889_v9  ;;  %915 = vst.msk [vmem:[#allocation3 + $0x68] sm:$0xff] %vm279_vm0, %v6895_v12 }
  0xf3   : > { %v1209_v5 = vpop.permute.xlu0 %1208  ;;  %v545_v6 = vpop.permute.xlu1 %544 }
  0xf4   : > { %1295 = vst.msk [vmem:[#allocation3 + $0x48] sm:$0xff] %vm803_vm7, %v1209_v5 }
  0xf5   : > { %626 = vst.msk [vmem:[#allocation3 + $0x78] sm:$0xff] %vm610_vm6, %v545_v6  ;;  %763 = vrot.lane.b32.xlu0 %v7247_v35, %s6623_s9  ;;  %765 = vrot.lane.b32.xlu1 %v7249_v63, %s6623_s9 }
  0xf7   : > { %v736_v9 = vpop.permute.xlu0 %735  ;;  %v738_v12 = vpop.permute.xlu1 %737  ;;  %v1326_v8 = vld [vmem:[#allocation3 + $0x40] sm:$0xff] }
  0xf8   : > { %818 = vst.msk [vmem:[#allocation3 + $0x70] sm:$0xff] %vm803_vm7, %v736_v9  ;;  %819 = vst.msk [vmem:[#allocation3 + $0x78] sm:$0xff] %vm803_vm7, %v738_v12  ;;  %6141 = vmatprep.mubr.msk.f32.mxu0 %vm1353_vm8, %v1326_v8 }
  0xf9   : > { %1046 = vrot.lane.b32.xlu0 %v7158_v36, %s6622_s8  ;;  %1048 = vrot.lane.b32.xlu1 %v7173_v40, %s6622_s8 }
  0xfb   : > { %v1019_v11 = vpop.permute.xlu0 %1018  ;;  %v1021_v13 = vpop.permute.xlu1 %1020  ;;  %v1327_v1 = vld [vmem:[#allocation3 + $0x48] sm:$0xff] }
  0xfc   : > { %1104 = vst.msk [vmem:[#allocation3 + $0x50] sm:$0xff] %vm610_vm6, %v1019_v11  ;;  %1105 = vst.msk [vmem:[#allocation3 + $0x58] sm:$0xff] %vm610_vm6, %v1021_v13  ;;  %6142 = vmatmul.mubr.msk.f32.gmra.mrb[8].mxu0 %vm1353_vm8, %v1327_v1 }
  0xfd   : > { %1238 = vrot.lane.b32.xlu0 %v7197_v19, %s6623_s9  ;;  %574 = vrot.lane.b32.xlu1 %v7268_v38, %s6622_s8 }
  0xff   : > { %v1211_v4 = vpop.permute.xlu0 %1210  ;;  %v547_v49 = vpop.permute.xlu1 %546  ;;  %v7279_v52 = vld [vmem:[#allocation3 + $0x70] sm:$0xff]  ;;  %v7281_v39 = vld [vmem:[#allocation3 + $0x78] sm:$0xff] }
 0x100   : > { %9116 = vst [vmem:[#allocation4_spill] sm:$0xff] %v7281_v39  ;;  %1296 = vst.msk [vmem:[#allocation3 + $0x50] sm:$0xff] %vm803_vm7, %v1211_v4  ;;  %v2004_v4 = vld [vmem:[#allocation2 + $0x30] sm:$0xff] }
 0x101   : > { %627 = vst.msk [vmem:[#allocation3 + $0x80] sm:$0xff] %vm610_vm6, %v547_v49  ;;  %1240 = vrot.lane.b32.xlu0 %v7199_v21, %s6623_s9  ;;  %576 = vrot.lane.b32.xlu1 %v7277_v29, %s6622_s8 }
 0x102   : > { %916 = vst.msk [vmem:[#allocation3 + $0x70] sm:$0xff] %vm279_vm0, %v6909_v17  ;;  %917 = vst.msk [vmem:[#allocation3 + $0x78] sm:$0xff] %vm279_vm0, %v6915_v20 }
 0x103   : > { %v1213_v27 = vpop.permute.xlu0 %1212  ;;  %v549_v59 = vpop.permute.xlu1 %548  ;;  %2036 = vst.msk [vmem:[#allocation3] sm:$0xff] %vm279_vm0, %v2004_v4 }
 0x104   : > { %1297 = vst.msk [vmem:[#allocation3 + $0x58] sm:$0xff] %vm803_vm7, %v1213_v27 }
 0x105   : > { %628 = vst.msk [vmem:[#allocation3 + $0x88] sm:$0xff] %vm610_vm6, %v549_v59  ;;  %767 = vrot.lane.b32.xlu0 %v7293_v41, %s6623_s9  ;;  %769 = vrot.lane.b32.xlu1 %v7295_v43, %s6623_s9  ;;  %v2005_v59 = vld [vmem:[#allocation2 + $0x38] sm:$0xff] }
 0x106   : > { %2037 = vst.msk [vmem:[#allocation3 + $0x8] sm:$0xff] %vm279_vm0, %v2005_v59  ;;  %v5776_v59 = vld [vmem:[%s9106_s1 + $0x28] sm:$0xf] }
 0x107   : > { %v740_v17 = vpop.permute.xlu0 %739  ;;  %v742_v20 = vpop.permute.xlu1 %741  ;;  %v1328_v5 = vld [vmem:[#allocation3 + $0x50] sm:$0xff] }
 0x108   : > { %820 = vst.msk [vmem:[#allocation3 + $0x80] sm:$0xff] %vm803_vm7, %v740_v17  ;;  %821 = vst.msk [vmem:[#allocation3 + $0x88] sm:$0xff] %vm803_vm7, %v742_v20  ;;  %6144 = vmatprep.mubr.msk.f32.mxu0 %vm1353_vm8, %v1328_v5 }
 0x109   : > { %1050 = vrot.lane.b32.xlu0 %v7218_v33, %s6622_s8  ;;  %1052 = vrot.lane.b32.xlu1 %v7227_v46, %s6622_s8 }
 0x10b   : > { %v1023_v6 = vpop.permute.xlu0 %1022  ;;  %v1025_v9 = vpop.permute.xlu1 %1024  ;;  %v1329_v12 = vld [vmem:[#allocation3 + $0x58] sm:$0xff] }
 0x10c   : > { %1106 = vst.msk [vmem:[#allocation3 + $0x60] sm:$0xff] %vm610_vm6, %v1023_v6  ;;  %1107 = vst.msk [vmem:[#allocation3 + $0x68] sm:$0xff] %vm610_vm6, %v1025_v9  ;;  %6145 = vmatmul.mubr.msk.f32.gmra.mrb[10].mxu0 %vm1353_vm8, %v1329_v12  ;;  %v7350_v6 = vld [vmem:[#allocation2 + $0x182] sm:$0xff]  ;;  %v7352_v9 = vld [vmem:[#allocation2 + $0x18a] sm:$0xff] }
 0x10d   : > { %1242 = vrot.lane.b32.xlu0 %v7247_v35, %s6623_s9  ;;  %1244 = vrot.lane.b32.xlu1 %v7249_v63, %s6623_s9  ;;  %v2006_v12 = vld [vmem:[#allocation2 + $0x48] sm:$0xff] }
 0x10e   : > { %2038 = vst.msk [vmem:[#allocation3 + $0x10] sm:$0xff] %vm279_vm0, %v2006_v12 }
 0x10f   : > { %v1215_v8 = vpop.permute.xlu0 %1214  ;;  %v551_v11 = vpop.permute.xlu1 %550  ;;  %v7317_v13 = vld [vmem:[#allocation3 + $0x80] sm:$0xff]  ;;  %v7319_v1 = vld [vmem:[#allocation3 + $0x88] sm:$0xff] }
 0x110   : > { %9117 = vst [vmem:[#allocation5_spill] sm:$0xff] %v7317_v13  ;;  %9118 = vst [vmem:[#allocation6_spill] sm:$0xff] %v7319_v1 }
 0x111   : > { %1298 = vst.msk [vmem:[#allocation3 + $0x60] sm:$0xff] %vm803_vm7, %v1215_v8  ;;  %1054 = vrot.lane.b32.xlu0 %v7268_v38, %s6622_s8  ;;  %1056 = vrot.lane.b32.xlu1 %v7277_v29, %s6622_s8 }
 0x112   : > { %629 = vst.msk [vmem:[#allocation3 + $0x90] sm:$0xff] %vm610_vm6, %v551_v11 }
 0x113   : > { %918 = vst.msk [vmem:[#allocation3 + $0x80] sm:$0xff] %vm279_vm0, %v6930_v23  ;;  %919 = vst.msk [vmem:[#allocation3 + $0x88] sm:$0xff] %vm279_vm0, %v6943_v31  ;;  %v1217_v49 = vpop.permute.xlu0 %1216  ;;  %v553_v27 = vpop.permute.xlu1 %552  ;;  %v7339_v23 = vld [vmem:[#allocation2 + $0x181] sm:$0xff]  ;;  %v7341_v31 = vld [vmem:[#allocation2 + $0x189] sm:$0xff] }
 0x114   : > { %1299 = vst.msk [vmem:[#allocation3 + $0x68] sm:$0xff] %vm803_vm7, %v1217_v49  ;;  %v2007_v49 = vld [vmem:[#allocation2 + $0x50] sm:$0xff] }
 0x115   : > { %630 = vst.msk [vmem:[#allocation3 + $0x98] sm:$0xff] %vm610_vm6, %v553_v27  ;;  %1246 = vrot.lane.b32.xlu0 %v7293_v41, %s6623_s9  ;;  %1248 = vrot.lane.b32.xlu1 %v7295_v43, %s6623_s9  ;;  %v5775_v27 = vld [vmem:[%s9106_s1 + $0x20] sm:$0xff] }
 0x116   : > { %2039 = vst.msk [vmem:[#allocation3 + $0x18] sm:$0xff] %vm279_vm0, %v2007_v49  ;;  %v2260_v49 = vld [vmem:[#allocation2 + $0x32] sm:$0xff] }
 0x117   : > { %v744_v17 = vpop.permute.xlu0 %743  ;;  %v746_v20 = vpop.permute.xlu1 %745 }
 0x118   : > { %v1330_v5 = vld [vmem:[#allocation3 + $0x60] sm:$0xff]  ;;  %822 = vst.msk [vmem:[#allocation3 + $0x90] sm:$0xff] %vm803_vm7, %v744_v17  ;;  %823 = vst.msk [vmem:[#allocation3 + $0x98] sm:$0xff] %vm803_vm7, %v746_v20  ;;  %v7369_v17 = vpack.c.bf16 %v5776_v59, %v5775_v27  ;;  %v2261_v27 = vld [vmem:[#allocation2 + $0x3a] sm:$0xff] }
 0x119   : > { %6147 = vmatprep.mubr.msk.f32.mxu0 %vm1353_vm8, %v1330_v5  ;;  %1058 = vrot.lane.b32.xlu0 %v7339_v23, %s6622_s8  ;;  %v2068_v20 = vld [vmem:[#allocation2 + $0x31] sm:$0xff]  ;;  %v2069_v5 = vld [vmem:[#allocation2 + $0x39] sm:$0xff] }
 0x11a   : > { %1060 = vrot.lane.b32.xlu1 %v7341_v31, %s6622_s8  ;;  %6451 = vmatprep.subr.msk.bf16.mxu0 %vm6814_vm5, %v7369_v17  ;;  %v2008_v59 = vld [vmem:[#allocation2 + $0x60] sm:$0xff] }
 0x11b   : > { %v1027_v8 = vpop.permute.xlu0 %1026  ;;  %v1029_v11 = vpop.permute.xlu1 %1028  ;;  %v1331_v4 = vld [vmem:[#allocation3 + $0x68] sm:$0xff]  ;;  %2040 = vst.msk [vmem:[#allocation3 + $0x20] sm:$0xff] %vm279_vm0, %v2008_v59 }
 0x11c   : > { %1108 = vst.msk [vmem:[#allocation3 + $0x70] sm:$0xff] %vm610_vm6, %v1027_v8  ;;  %1109 = vst.msk [vmem:[#allocation3 + $0x78] sm:$0xff] %vm610_vm6, %v1029_v11  ;;  %6148 = vmatmul.mubr.msk.f32.gmra.mrb[12].mxu0 %vm1353_vm8, %v1331_v4 }
 0x11d   : > { %1250 = vrot.lane.b32.xlu0 %v7350_v6, %s6623_s9 }
 0x11e   : > { %1252 = vrot.lane.b32.xlu1 %v7352_v9, %s6623_s9 }
 0x11f   : > { %v1219_v12 = vpop.permute.xlu0 %1218  ;;  %v555_v8 = vpop.permute.xlu1 %554  ;;  %v7371_v11 = vld [vmem:[#allocation3 + $0x90] sm:$0xff]  ;;  %v7373_v4 = vld [vmem:[#allocation3 + $0x98] sm:$0xff] }
 0x120   : > { %9119 = vst [vmem:[#allocation7_spill] sm:$0xff] %v7371_v11  ;;  %9120 = vst [vmem:[#allocation8_spill] sm:$0xff] %v7373_v4 }
 0x121   : > { %1300 = vst.msk [vmem:[#allocation3 + $0x70] sm:$0xff] %vm803_vm7, %v1219_v12  ;;  %2132 = vrot.lane.b32.xlu0 %v2068_v20, %s6622_s8  ;;  %v2009_v12 = vld [vmem:[#allocation2 + $0x68] sm:$0xff] }
 0x122   : > { %631 = vst.msk [vmem:[#allocation3 + $0xa0] sm:$0xff] %vm610_vm6, %v555_v8  ;;  %2134 = vrot.lane.b32.xlu1 %v2069_v5, %s6622_s8  ;;  %v2070_v20 = vld [vmem:[#allocation2 + $0x49] sm:$0xff]  ;;  %v2071_v5 = vld [vmem:[#allocation2 + $0x51] sm:$0xff] }
 0x123   : > { %920 = vst.msk [vmem:[#allocation3 + $0x90] sm:$0xff] %vm279_vm0, %v6969_v47  ;;  %921 = vst.msk [vmem:[#allocation3 + $0x98] sm:$0xff] %vm279_vm0, %v6986_v54  ;;  %v1221_v4 = vpop.permute.xlu0 %1220  ;;  %v557_v11 = vpop.permute.xlu1 %556 }
 0x124   : > { %1301 = vst.msk [vmem:[#allocation3 + $0x78] sm:$0xff] %vm803_vm7, %v1221_v4  ;;  %v2263_v4 = vld [vmem:[#allocation2 + $0x52] sm:$0xff] }
 0x125   : > { %632 = vst.msk [vmem:[#allocation3 + $0xa8] sm:$0xff] %vm610_vm6, %v557_v11  ;;  %2324 = vrot.lane.b32.xlu0 %v2260_v49, %s6623_s9  ;;  %v2262_v11 = vld [vmem:[#allocation2 + $0x4a] sm:$0xff]  ;;  %v2010_v49 = vld [vmem:[#allocation2 + $0x78] sm:$0xff] }
 0x126   : > { %2326 = vrot.lane.b32.xlu1 %v2261_v27, %s6623_s9  ;;  %2041 = vst.msk [vmem:[#allocation3 + $0x28] sm:$0xff] %vm279_vm0, %v2009_v12  ;;  %2042 = vst.msk [vmem:[#allocation3 + $0x30] sm:$0xff] %vm279_vm0, %v2010_v49 }
 0x127   : > { %v748_v8 = vpop.permute.xlu0 %747  ;;  %v750_v1 = vpop.permute.xlu1 %749 }
 0x128   : > { %v1332_v13 = vld [vmem:[#allocation3 + $0x70] sm:$0xff]  ;;  %824 = vst.msk [vmem:[#allocation3 + $0xa0] sm:$0xff] %vm803_vm7, %v748_v8  ;;  %825 = vst.msk [vmem:[#allocation3 + $0xa8] sm:$0xff] %vm803_vm7, %v750_v1 }
 0x129   : > { %6150 = vmatprep.mubr.msk.f32.mxu0 %vm1353_vm8, %v1332_v13  ;;  %2136 = vrot.lane.b32.xlu0 %v2070_v20, %s6622_s8  ;;  %v2011_v1 = vld [vmem:[#allocation2 + $0x80] sm:$0xff]  ;;  %v2073_v20 = vld [vmem:[#allocation2 + $0x69] sm:$0xff] }
 0x12a   : > { %2138 = vrot.lane.b32.xlu1 %v2071_v5, %s6622_s8  ;;  %2043 = vst.msk [vmem:[#allocation3 + $0x38] sm:$0xff] %vm279_vm0, %v2011_v1  ;;  %v2072_v13 = vld [vmem:[#allocation2 + $0x61] sm:$0xff]  ;;  %v2013_v1 = vld [vmem:[#allocation2 + $0x98] sm:$0xff] }
 0x12b   : > { %v1031_v27 = vpop.permute.xlu0 %1030  ;;  %v1033_v59 = vpop.permute.xlu1 %1032  ;;  %v1333_v12 = vld [vmem:[#allocation3 + $0x78] sm:$0xff]  ;;  %2045 = vst.msk [vmem:[#allocation3 + $0x48] sm:$0xff] %vm279_vm0, %v2013_v1 }
 0x12c   : > { %1110 = vst.msk [vmem:[#allocation3 + $0x80] sm:$0xff] %vm610_vm6, %v1031_v27  ;;  %1111 = vst.msk [vmem:[#allocation3 + $0x88] sm:$0xff] %vm610_vm6, %v1033_v59  ;;  %6151 = vmatmul.mubr.msk.f32.gmra.mrb[14].mxu0 %vm1353_vm8, %v1333_v12  ;;  %v2012_v27 = vld [vmem:[#allocation2 + $0x90] sm:$0xff] }
 0x12d   : > { %2328 = vrot.lane.b32.xlu0 %v2262_v11, %s6623_s9  ;;  %v2264_v11 = vld [vmem:[#allocation2 + $0x62] sm:$0xff]  ;;  %2044 = vst.msk [vmem:[#allocation3 + $0x40] sm:$0xff] %vm279_vm0, %v2012_v27 }
 0x12e   : > { %2330 = vrot.lane.b32.xlu1 %v2263_v4, %s6623_s9  ;;  %v2265_v4 = vld [vmem:[#allocation2 + $0x6a] sm:$0xff] }
 0x12f   : > { %v1223_v5 = vpop.permute.xlu0 %1222  ;;  %v559_v8 = vpop.permute.xlu1 %558  ;;  %v7404_v39 = vld [vmem:[#allocation3 + $0xa0] sm:$0xff]  ;;  %v7406_v49 = vld [vmem:[#allocation3 + $0xa8] sm:$0xff]  ;;  %v2014_v27 = vld [vmem:[#allocation2 + $0xa8] sm:$0xff] }
 0x130   : > { %9121 = vst [vmem:[#allocation9_spill] sm:$0xff] %v7406_v49  ;;  %1302 = vst.msk [vmem:[#allocation3 + $0x80] sm:$0xff] %vm803_vm7, %v1223_v5 }
 0x131   : > { %633 = vst.msk [vmem:[#allocation3 + $0xb0] sm:$0xff] %vm610_vm6, %v559_v8  ;;  %2140 = vrot.lane.b32.xlu0 %v2072_v13, %s6622_s8  ;;  %v2074_v13 = vld [vmem:[#allocation2 + $0x79] sm:$0xff] }
 0x132   : > { %922 = vst.msk [vmem:[#allocation3 + $0xa0] sm:$0xff] %vm279_vm0, %v7023_v3  ;;  %923 = vst.msk [vmem:[#allocation3 + $0xa8] sm:$0xff] %vm279_vm0, %v7041_v10  ;;  %2142 = vrot.lane.b32.xlu1 %v2073_v20, %s6622_s8  ;;  %v2075_v20 = vld [vmem:[#allocation2 + $0x81] sm:$0xff] }
 0x133   : > { %v1225_v59 = vpop.permute.xlu0 %1224  ;;  %v561_v12 = vpop.permute.xlu1 %560  ;;  %2046 = vst.msk [vmem:[#allocation3 + $0x50] sm:$0xff] %vm279_vm0, %v2014_v27 }
 0x134   : > { %1303 = vst.msk [vmem:[#allocation3 + $0x88] sm:$0xff] %vm803_vm7, %v1225_v59 }
 0x135   : > { %634 = vst.msk [vmem:[#allocation3 + $0xb8] sm:$0xff] %vm610_vm6, %v561_v12  ;;  %2332 = vrot.lane.b32.xlu0 %v2264_v11, %s6623_s9  ;;  %v2266_v11 = vld [vmem:[#allocation2 + $0x7a] sm:$0xff] }
 0x136   : > { %2334 = vrot.lane.b32.xlu1 %v2265_v4, %s6623_s9  ;;  %v2267_v4 = vld [vmem:[#allocation2 + $0x82] sm:$0xff] }
 0x137   : > { %v752_v5 = vpop.permute.xlu0 %751  ;;  %v754_v8 = vpop.permute.xlu1 %753  ;;  %v1334_v49 = vld [vmem:[#allocation3 + $0x80] sm:$0xff] }
 0x138   : > { %826 = vst.msk [vmem:[#allocation3 + $0xb0] sm:$0xff] %vm803_vm7, %v752_v5  ;;  %827 = vst.msk [vmem:[#allocation3 + $0xb8] sm:$0xff] %vm803_vm7, %v754_v8  ;;  %6153 = vmatprep.mubr.msk.f32.mxu0 %vm1353_vm8, %v1334_v49  ;;  %v2015_v49 = vld [vmem:[#allocation2 + $0xb0] sm:$0xff] }
 0x139   : > { %2052 = vst.msk [vmem:[#allocation3 + $0x80] sm:$0xff] %vm279_vm0, %v6969_v47  ;;  %2144 = vrot.lane.b32.xlu0 %v2074_v13, %s6622_s8  ;;  %2047 = vst.msk [vmem:[#allocation3 + $0x58] sm:$0xff] %vm279_vm0, %v2015_v49  ;;  %v2076_v47 = vld [vmem:[#allocation2 + $0x91] sm:$0xff]  ;;  %v2077_v13 = vld [vmem:[#allocation2 + $0x99] sm:$0xff] }
 0x13a   : > { %2146 = vrot.lane.b32.xlu1 %v2075_v20, %s6622_s8  ;;  %v2078_v49 = vld [vmem:[#allocation2 + $0xa9] sm:$0xff] }
 0x13b   : > { %v1035_v59 = vpop.permute.xlu0 %1034  ;;  %v1037_v12 = vpop.permute.xlu1 %1036  ;;  %v1335_v1 = vld [vmem:[#allocation3 + $0x88] sm:$0xff] }
 0x13c   : > { %1112 = vst.msk [vmem:[#allocation3 + $0x90] sm:$0xff] %vm610_vm6, %v1035_v59  ;;  %1113 = vst.msk [vmem:[#allocation3 + $0x98] sm:$0xff] %vm610_vm6, %v1037_v12  ;;  %6154 = vmatmul.mubr.msk.f32.gmra.mrb[16].mxu0 %vm1353_vm8, %v1335_v1  ;;  %v2017_v1 = vld [vmem:[#allocation2 + $0xc8] sm:$0xff] }
 0x13d   : > { %2053 = vst.msk [vmem:[#allocation3 + $0x88] sm:$0xff] %vm279_vm0, %v6986_v54  ;;  %2336 = vrot.lane.b32.xlu0 %v2266_v11, %s6623_s9  ;;  %v2268_v54 = vld [vmem:[#allocation2 + $0x92] sm:$0xff]  ;;  %v2269_v11 = vld [vmem:[#allocation2 + $0x9a] sm:$0xff]  ;;  %2049 = vst.msk [vmem:[#allocation3 + $0x68] sm:$0xff] %vm279_vm0, %v2017_v1 }
 0x13e   : > { %2338 = vrot.lane.b32.xlu1 %v2267_v4, %s6623_s9  ;;  %v2016_v4 = vld [vmem:[#allocation2 + $0xc0] sm:$0xff] }
 0x13f   : > { %v1227_v20 = vpop.permute.xlu0 %1226  ;;  %v563_v5 = vpop.permute.xlu1 %562  ;;  %v7438_v8 = vld [vmem:[#allocation3 + $0xb0] sm:$0xff]  ;;  %v7440_v27 = vld [vmem:[#allocation3 + $0xb8] sm:$0xff]  ;;  %2048 = vst.msk [vmem:[#allocation3 + $0x60] sm:$0xff] %vm279_vm0, %v2016_v4  ;;  %v2018_v4 = vld [vmem:[#allocation2 + $0xd8] sm:$0xff] }
 0x140   : > { %1304 = vst.msk [vmem:[#allocation3 + $0x90] sm:$0xff] %vm803_vm7, %v1227_v20 }
 0x141   : > { %635 = vst.msk [vmem:[#allocation3 + $0xc0] sm:$0xff] %vm610_vm6, %v563_v5  ;;  %2148 = vrot.lane.b32.xlu0 %v2076_v47, %s6622_s8  ;;  %v2079_v47 = vld [vmem:[#allocation2 + $0xb1] sm:$0xff] }
 0x142   : > { %924 = vst.msk [vmem:[#allocation3 + $0xb0] sm:$0xff] %vm279_vm0, %v7073_v25  ;;  %925 = vst.msk [vmem:[#allocation3 + $0xb8] sm:$0xff] %vm279_vm0, %v7091_v32  ;;  %2150 = vrot.lane.b32.xlu1 %v2077_v13, %s6622_s8 }
 0x143   : > { %v1229_v59 = vpop.permute.xlu0 %1228  ;;  %v565_v12 = vpop.permute.xlu1 %564  ;;  %2050 = vst.msk [vmem:[#allocation3 + $0x70] sm:$0xff] %vm279_vm0, %v2018_v4 }
 0x144   : > { %1305 = vst.msk [vmem:[#allocation3 + $0x98] sm:$0xff] %vm803_vm7, %v1229_v59 }
 0x145   : > { %636 = vst.msk [vmem:[#allocation3 + $0xc8] sm:$0xff] %vm610_vm6, %v565_v12  ;;  %2340 = vrot.lane.b32.xlu0 %v2268_v54, %s6623_s9  ;;  %v2270_v54 = vld [vmem:[#allocation2 + $0xaa] sm:$0xff] }
 0x146   : > { %2342 = vrot.lane.b32.xlu1 %v2269_v11, %s6623_s9  ;;  %v2271_v11 = vld [vmem:[#allocation2 + $0xb2] sm:$0xff] }
 0x147   : > { %v756_v13 = vpop.permute.xlu0 %755  ;;  %v758_v20 = vpop.permute.xlu1 %757  ;;  %v1336_v5 = vld [vmem:[#allocation3 + $0x90] sm:$0xff] }
 0x148   : > { %828 = vst.msk [vmem:[#allocation3 + $0xc0] sm:$0xff] %vm803_vm7, %v756_v13  ;;  %829 = vst.msk [vmem:[#allocation3 + $0xc8] sm:$0xff] %vm803_vm7, %v758_v20  ;;  %6156 = vmatprep.mubr.msk.f32.mxu0 %vm1353_vm8, %v1336_v5  ;;  %v2019_v13 = vld [vmem:[#allocation2 + $0xe0] sm:$0xff] }
 0x149   : > { %2054 = vst.msk [vmem:[#allocation3 + $0x90] sm:$0xff] %vm279_vm0, %v7023_v3  ;;  %2152 = vrot.lane.b32.xlu0 %v2078_v49, %s6622_s8  ;;  %2051 = vst.msk [vmem:[#allocation3 + $0x78] sm:$0xff] %vm279_vm0, %v2019_v13  ;;  %v2080_v3 = vld [vmem:[#allocation2 + $0xc1] sm:$0xff]  ;;  %v2081_v49 = vld [vmem:[#allocation2 + $0xc9] sm:$0xff] }
 0x14a   : > { %2154 = vrot.lane.b32.xlu1 %v2079_v47, %s6622_s8 }
 0x14b   : > { %v1039_v59 = vpop.permute.xlu0 %1038  ;;  %v1041_v12 = vpop.permute.xlu1 %1040  ;;  %v1337_v1 = vld [vmem:[#allocation3 + $0x98] sm:$0xff] }
 0x14c   : > { %1114 = vst.msk [vmem:[#allocation3 + $0xa0] sm:$0xff] %vm610_vm6, %v1039_v59  ;;  %1115 = vst.msk [vmem:[#allocation3 + $0xa8] sm:$0xff] %vm610_vm6, %v1041_v12  ;;  %6157 = vmatmul.mubr.msk.f32.gmra.mrb[18].mxu0 %vm1353_vm8, %v1337_v1  ;;  %v2082_v12 = vld [vmem:[#allocation2 + $0xd9] sm:$0xff]  ;;  %v2083_v1 = vld [vmem:[#allocation2 + $0xe1] sm:$0xff] }
 0x14d   : > { %2055 = vst.msk [vmem:[#allocation3 + $0x98] sm:$0xff] %vm279_vm0, %v7041_v10  ;;  %2344 = vrot.lane.b32.xlu0 %v2270_v54, %s6623_s9  ;;  %v2272_v10 = vld [vmem:[#allocation2 + $0xc2] sm:$0xff]  ;;  %v2273_v54 = vld [vmem:[#allocation2 + $0xca] sm:$0xff] }
 0x14e   : > { %2346 = vrot.lane.b32.xlu1 %v2271_v11, %s6623_s9 }
 0x14f   : > { %v1231_v47 = vpop.permute.xlu0 %1230  ;;  %v567_v20 = vpop.permute.xlu1 %566  ;;  %v7472_v5 = vld [vmem:[#allocation3 + $0xc0] sm:$0xff]  ;;  %v7474_v4 = vld [vmem:[#allocation3 + $0xc8] sm:$0xff] }
 0x150   : > { %1306 = vst.msk [vmem:[#allocation3 + $0xa0] sm:$0xff] %vm803_vm7, %v1231_v47 }
 0x151   : > { %637 = vst.msk [vmem:[#allocation3 + $0xd0] sm:$0xff] %vm610_vm6, %v567_v20  ;;  %2156 = vrot.lane.b32.xlu0 %v2080_v3, %s6622_s8  ;;  %v2274_v3 = vld [vmem:[#allocation2 + $0xda] sm:$0xff] }
 0x152   : > { %926 = vst.msk [vmem:[#allocation3 + $0xc0] sm:$0xff] %vm279_vm0, %v7123_v53  ;;  %927 = vst.msk [vmem:[#allocation3 + $0xc8] sm:$0xff] %vm279_vm0, %v7141_v62  ;;  %2158 = vrot.lane.b32.xlu1 %v2081_v49, %s6622_s8  ;;  %v2275_v49 = vld [vmem:[#allocation2 + $0xe2] sm:$0xff] }
 0x153   : > { %v1233_v11 = vpop.permute.xlu0 %1232  ;;  %v569_v59 = vpop.permute.xlu1 %568 }
 0x154   : > { %1307 = vst.msk [vmem:[#allocation3 + $0xa8] sm:$0xff] %vm803_vm7, %v1233_v11 }
 0x155   : > { %638 = vst.msk [vmem:[#allocation3 + $0xd8] sm:$0xff] %vm610_vm6, %v569_v59  ;;  %2348 = vrot.lane.b32.xlu0 %v2272_v10, %s6623_s9  ;;  %v2085_v59 = vld [vmem:[#allocation2 + $0xf9] sm:$0xff] }
 0x156   : > { %2350 = vrot.lane.b32.xlu1 %v2273_v54, %s6623_s9 }
 0x157   : > { %v760_v13 = vpop.permute.xlu0 %759  ;;  %v762_v47 = vpop.permute.xlu1 %761  ;;  %v1338_v20 = vld [vmem:[#allocation3 + $0xa0] sm:$0xff] }
 0x158   : > { %830 = vst.msk [vmem:[#allocation3 + $0xd0] sm:$0xff] %vm803_vm7, %v760_v13  ;;  %831 = vst.msk [vmem:[#allocation3 + $0xd8] sm:$0xff] %vm803_vm7, %v762_v47  ;;  %6159 = vmatprep.mubr.msk.f32.mxu0 %vm1353_vm8, %v1338_v20  ;;  %v2277_v20 = vld [vmem:[#allocation2 + $0xfa] sm:$0xff] }
 0x159   : > { %2056 = vst.msk [vmem:[#allocation3 + $0xa0] sm:$0xff] %vm279_vm0, %v7073_v25  ;;  %2160 = vrot.lane.b32.xlu0 %v2082_v12, %s6622_s8  ;;  %v2084_v25 = vld [vmem:[#allocation2 + $0xf1] sm:$0xff] }
 0x15a   : > { %2162 = vrot.lane.b32.xlu1 %v2083_v1, %s6622_s8 }
 0x15b   : > { %v1043_v10 = vpop.permute.xlu0 %1042  ;;  %v1045_v54 = vpop.permute.xlu1 %1044  ;;  %v1339_v11 = vld [vmem:[#allocation3 + $0xa8] sm:$0xff] }
 0x15c   : > { %1116 = vst.msk [vmem:[#allocation3 + $0xb0] sm:$0xff] %vm610_vm6, %v1043_v10  ;;  %1117 = vst.msk [vmem:[#allocation3 + $0xb8] sm:$0xff] %vm610_vm6, %v1045_v54  ;;  %6160 = vmatmul.mubr.msk.f32.gmra.mrb[20].mxu0 %vm1353_vm8, %v1339_v11  ;;  %v2086_v10 = vld [vmem:[#allocation2 + $0x109] sm:$0xff] }
 0x15d   : > { %2057 = vst.msk [vmem:[#allocation3 + $0xa8] sm:$0xff] %vm279_vm0, %v7091_v32  ;;  %2352 = vrot.lane.b32.xlu0 %v2274_v3, %s6623_s9  ;;  %v2276_v32 = vld [vmem:[#allocation2 + $0xf2] sm:$0xff] }
 0x15e   : > { %2354 = vrot.lane.b32.xlu1 %v2275_v49, %s6623_s9 }
 0x15f   : > { %v1235_v12 = vpop.permute.xlu0 %1234  ;;  %v571_v1 = vpop.permute.xlu1 %570  ;;  %v7502_v13 = vld [vmem:[#allocation3 + $0xd0] sm:$0xff]  ;;  %v7504_v47 = vld [vmem:[#allocation3 + $0xd8] sm:$0xff] }
 0x160   : > { %1308 = vst.msk [vmem:[#allocation3 + $0xb0] sm:$0xff] %vm803_vm7, %v1235_v12 }
 0x161   : > { %639 = vst.msk [vmem:[#allocation3 + $0xe0] sm:$0xff] %vm610_vm6, %v571_v1  ;;  %2164 = vrot.lane.b32.xlu0 %v2084_v25, %s6622_s8 }
 0x162   : > { %928 = vst.msk [vmem:[#allocation3 + $0xd0] sm:$0xff] %vm279_vm0, %v7181_v16  ;;  %929 = vst.msk [vmem:[#allocation3 + $0xd8] sm:$0xff] %vm279_vm0, %v7201_v30  ;;  %2166 = vrot.lane.b32.xlu1 %v2085_v59, %s6622_s8 }
 0x163   : > { %v1237_v3 = vpop.permute.xlu0 %1236  ;;  %v573_v49 = vpop.permute.xlu1 %572 }
 0x164   : > { %1309 = vst.msk [vmem:[#allocation3 + $0xb8] sm:$0xff] %vm803_vm7, %v1237_v3 }
 0x165   : > { %640 = vst.msk [vmem:[#allocation3 + $0xe8] sm:$0xff] %vm610_vm6, %v573_v49  ;;  %2356 = vrot.lane.b32.xlu0 %v2276_v32, %s6623_s9 }
 0x166   : > { %2358 = vrot.lane.b32.xlu1 %v2277_v20, %s6623_s9 }
 0x167   : > { %v764_v54 = vpop.permute.xlu0 %763  ;;  %v766_v11 = vpop.permute.xlu1 %765  ;;  %v1340_v12 = vld [vmem:[#allocation3 + $0xb0] sm:$0xff] }
 0x168   : > { %832 = vst.msk [vmem:[#allocation3 + $0xe0] sm:$0xff] %vm803_vm7, %v764_v54  ;;  %833 = vst.msk [vmem:[#allocation3 + $0xe8] sm:$0xff] %vm803_vm7, %v766_v11  ;;  %6162 = vmatprep.mubr.msk.f32.mxu0 %vm1353_vm8, %v1340_v12 }
 0x169   : > { %2058 = vst.msk [vmem:[#allocation3 + $0xb0] sm:$0xff] %vm279_vm0, %v7123_v53  ;;  %2168 = vrot.lane.b32.xlu0 %v2086_v10, %s6622_s8 }
 0x16a   : > { %2170 = vrot.lane.b32.xlu1 %v7067_v18, %s6622_s8 }
 0x16b   : > { %v1047_v25 = vpop.permute.xlu0 %1046  ;;  %v1049_v59 = vpop.permute.xlu1 %1048  ;;  %v1341_v1 = vld [vmem:[#allocation3 + $0xb8] sm:$0xff] }
 0x16c   : > { %1118 = vst.msk [vmem:[#allocation3 + $0xc0] sm:$0xff] %vm610_vm6, %v1047_v25  ;;  %1119 = vst.msk [vmem:[#allocation3 + $0xc8] sm:$0xff] %vm610_vm6, %v1049_v59  ;;  %6163 = vmatmul.mubr.msk.f32.gmra.mrb[22].mxu0 %vm1353_vm8, %v1341_v1 }
 0x16d   : > { %2059 = vst.msk [vmem:[#allocation3 + $0xb8] sm:$0xff] %vm279_vm0, %v7141_v62  ;;  %2360 = vrot.lane.b32.xlu0 %v7087_v26, %s6623_s9 }
 0x16e   : > { %2362 = vrot.lane.b32.xlu1 %v7089_v28, %s6623_s9 }
 0x16f   : > { %v1239_v53 = vpop.permute.xlu0 %1238  ;;  %v575_v18 = vpop.permute.xlu1 %574  ;;  %v7535_v32 = vld [vmem:[#allocation3 + $0xe0] sm:$0xff]  ;;  %v7537_v20 = vld [vmem:[#allocation3 + $0xe8] sm:$0xff] }
 0x170   : > { %1310 = vst.msk [vmem:[#allocation3 + $0xc0] sm:$0xff] %vm803_vm7, %v1239_v53 }
 0x171   : > { %641 = vst.msk [vmem:[#allocation3 + $0xf0] sm:$0xff] %vm610_vm6, %v575_v18  ;;  %2172 = vrot.lane.b32.xlu0 %v7108_v37, %s6622_s8 }
 0x172   : > { %930 = vst.msk [vmem:[#allocation3 + $0xe0] sm:$0xff] %vm279_vm0, %v7233_v60  ;;  %931 = vst.msk [vmem:[#allocation3 + $0xe8] sm:$0xff] %vm279_vm0, %v7251_v7  ;;  %2174 = vrot.lane.b32.xlu1 %v7117_v44, %s6622_s8 }
 0x173   : > { %v1241_v26 = vpop.permute.xlu0 %1240  ;;  %v577_v28 = vpop.permute.xlu1 %576 }
 0x174   : > { %1311 = vst.msk [vmem:[#allocation3 + $0xc8] sm:$0xff] %vm803_vm7, %v1241_v26 }
 0x175   : > { %642 = vst.msk [vmem:[#allocation3 + $0xf8] sm:$0xff] %vm610_vm6, %v577_v28  ;;  %2364 = vrot.lane.b32.xlu0 %v7137_v34, %s6623_s9  ;;  %v2291_v28 = vld [vmem:[#allocation2 + $0x1a2] sm:$0xff] }
 0x176   : > { %2366 = vrot.lane.b32.xlu1 %v7139_v55, %s6623_s9  ;;  %v900_v55 = vld [vmem:[#allocation2 + $0x180] sm:$0xff] }
 0x177   : > { %v768_v62 = vpop.permute.xlu0 %767  ;;  %v770_v3 = vpop.permute.xlu1 %769  ;;  %v1342_v49 = vld [vmem:[#allocation3 + $0xc0] sm:$0xff] }
 0x178   : > { %834 = vst.msk [vmem:[#allocation3 + $0xf0] sm:$0xff] %vm803_vm7, %v768_v62  ;;  %835 = vst.msk [vmem:[#allocation3 + $0xf8] sm:$0xff] %vm803_vm7, %v770_v3  ;;  %6165 = vmatprep.mubr.msk.f32.mxu0 %vm1353_vm8, %v1342_v49  ;;  %v3018_v49 = vld [vmem:[#allocation2 + $0x9] sm:$0xff] }
 0x179   : > { %2060 = vst.msk [vmem:[#allocation3 + $0xc0] sm:$0xff] %vm279_vm0, %v7181_v16  ;;  %2176 = vrot.lane.b32.xlu0 %v7158_v36, %s6622_s8  ;;  %v901_v36 = vld [vmem:[#allocation2 + $0x188] sm:$0xff] }
 0x17a   : > { %2178 = vrot.lane.b32.xlu1 %v7173_v40, %s6622_s8 }
 0x17b   : > { %v1051_v37 = vpop.permute.xlu0 %1050  ;;  %v1053_v44 = vpop.permute.xlu1 %1052  ;;  %v1343_v34 = vld [vmem:[#allocation3 + $0xc8] sm:$0xff] }
 0x17c   : > { %1120 = vst.msk [vmem:[#allocation3 + $0xd0] sm:$0xff] %vm610_vm6, %v1051_v37  ;;  %1121 = vst.msk [vmem:[#allocation3 + $0xd8] sm:$0xff] %vm610_vm6, %v1053_v44  ;;  %6166 = vmatmul.mubr.msk.f32.gmra.mrb[24].mxu0 %vm1353_vm8, %v1343_v34  ;;  %v3210_v37 = vld [vmem:[#allocation2 + $0xa] sm:$0xff] }
 0x17d   : > { %2061 = vst.msk [vmem:[#allocation3 + $0xc8] sm:$0xff] %vm279_vm0, %v7201_v30  ;;  %2368 = vrot.lane.b32.xlu0 %v7197_v19, %s6623_s9 }
 0x17e   : > { %2370 = vrot.lane.b32.xlu1 %v7199_v21, %s6623_s9 }
 0x17f   : > { %v1243_v40 = vpop.permute.xlu0 %1242  ;;  %v1245_v16 = vpop.permute.xlu1 %1244  ;;  %v7573_v10 = vld [vmem:[#allocation3 + $0xf0] sm:$0xff]  ;;  %v7575_v54 = vld [vmem:[#allocation3 + $0xf8] sm:$0xff] }
 0x180   : > { %1312 = vst.msk [vmem:[#allocation3 + $0xd0] sm:$0xff] %vm803_vm7, %v1243_v40  ;;  %1313 = vst.msk [vmem:[#allocation3 + $0xd8] sm:$0xff] %vm803_vm7, %v1245_v16 }
 0x181   : > { %932 = vst.msk [vmem:[#allocation3 + $0xf0] sm:$0xff] %vm279_vm0, %v900_v55  ;;  %933 = vst.msk [vmem:[#allocation3 + $0xf8] sm:$0xff] %vm279_vm0, %v901_v36  ;;  %2180 = vrot.lane.b32.xlu0 %v7218_v33, %s6622_s8 }
 0x182   : > { %2182 = vrot.lane.b32.xlu1 %v7227_v46, %s6622_s8 }
 0x183   : > { %v1055_v19 = vpop.permute.xlu0 %1054  ;;  %v1057_v21 = vpop.permute.xlu1 %1056 }
 0x184   : > { %1122 = vst.msk [vmem:[#allocation3 + $0xe0] sm:$0xff] %vm610_vm6, %v1055_v19  ;;  %1123 = vst.msk [vmem:[#allocation3 + $0xe8] sm:$0xff] %vm610_vm6, %v1057_v21  ;;  %v9126_v19 = vld [vmem:[#allocation8_spill] sm:$0xff] }
 0x185   : > { %2372 = vrot.lane.b32.xlu0 %v7247_v35, %s6623_s9 }
 0x186   : > { %2374 = vrot.lane.b32.xlu1 %v7249_v63, %s6623_s9 }
 0x187   : > { %v1247_v30 = vpop.permute.xlu0 %1246  ;;  %v1249_v11 = vpop.permute.xlu1 %1248  ;;  %v1344_v12 = vld [vmem:[#allocation3 + $0xd0] sm:$0xff]  ;;  %v1345_v25 = vld [vmem:[#allocation3 + $0xd8] sm:$0xff] }
 0x188   : > { %1314 = vst.msk [vmem:[#allocation3 + $0xe0] sm:$0xff] %vm803_vm7, %v1247_v30  ;;  %1315 = vst.msk [vmem:[#allocation3 + $0xe8] sm:$0xff] %vm803_vm7, %v1249_v11  ;;  %6168 = vmatprep.mubr.msk.f32.mxu0 %vm1353_vm8, %v1344_v12  ;;  %v9127_v11 = vld [vmem:[#allocation9_spill] sm:$0xff] }
 0x189   : > { %2062 = vst.msk [vmem:[#allocation3 + $0xd0] sm:$0xff] %vm279_vm0, %v7233_v60  ;;  %2063 = vst.msk [vmem:[#allocation3 + $0xd8] sm:$0xff] %vm279_vm0, %v7251_v7  ;;  %2184 = vrot.lane.b32.xlu0 %v7268_v38, %s6622_s8  ;;  %6169 = vmatmul.mubr.msk.f32.gmra.mrb[26].mxu0 %vm1353_vm8, %v1345_v25 }
 0x18a   : > { %2186 = vrot.lane.b32.xlu1 %v7277_v29, %s6622_s8 }
 0x18b   : > { %v1059_v33 = vpop.permute.xlu0 %1058 }
 0x18c   : > { %v1061_v46 = vpop.permute.xlu1 %1060  ;;  %1124 = vst.msk [vmem:[#allocation3 + $0xf0] sm:$0xff] %vm610_vm6, %v1059_v33 }
 0x18d   : > { %1125 = vst.msk [vmem:[#allocation3 + $0xf8] sm:$0xff] %vm610_vm6, %v1061_v46  ;;  %2376 = vrot.lane.b32.xlu0 %v7293_v41, %s6623_s9  ;;  %v2034_v41 = vld [vmem:[#allocation2 + $0x198] sm:$0xff] }
 0x18e   : > { %2378 = vrot.lane.b32.xlu1 %v7295_v43, %s6623_s9  ;;  %v2035_v43 = vld [vmem:[#allocation2 + $0x1a0] sm:$0xff] }
 0x18f   : > { %v1251_v60 = vpop.permute.xlu0 %1250  ;;  %v1346_v63 = vld [vmem:[#allocation3 + $0xe0] sm:$0xff]  ;;  %v1347_v7 = vld [vmem:[#allocation3 + $0xe8] sm:$0xff] }
 0x190   : > { %v1253_v35 = vpop.permute.xlu1 %1252  ;;  %1316 = vst.msk [vmem:[#allocation3 + $0xf0] sm:$0xff] %vm803_vm7, %v1251_v60  ;;  %6171 = vmatprep.mubr.msk.f32.mxu0 %vm1353_vm8, %v1346_v63 }
 0x191   : > { %1317 = vst.msk [vmem:[#allocation3 + $0xf8] sm:$0xff] %vm803_vm7, %v1253_v35  ;;  %2188 = vrot.lane.b32.xlu0 %v7339_v23, %s6622_s8  ;;  %6172 = vmatmul.mubr.msk.f32.gmra.mrb[28].mxu0 %vm1353_vm8, %v1347_v7  ;;  %v2098_v23 = vld [vmem:[#allocation2 + $0x199] sm:$0xff] }
 0x192   : > { %2064 = vst.msk [vmem:[#allocation3 + $0xe0] sm:$0xff] %vm279_vm0, %v900_v55  ;;  %2065 = vst.msk [vmem:[#allocation3 + $0xe8] sm:$0xff] %vm279_vm0, %v901_v36  ;;  %2190 = vrot.lane.b32.xlu1 %v7341_v31, %s6622_s8  ;;  %v2099_v31 = vld [vmem:[#allocation2 + $0x1a1] sm:$0xff] }
 0x193   : > { %v2133_v38 = vpop.permute.xlu0 %2132 }
 0x194   : > { %v2135_v29 = vpop.permute.xlu1 %2134  ;;  %2228 = vst.msk [vmem:[#allocation3] sm:$0xff] %vm610_vm6, %v2133_v38 }
 0x195   : > { %2229 = vst.msk [vmem:[#allocation3 + $0x8] sm:$0xff] %vm610_vm6, %v2135_v29  ;;  %2380 = vrot.lane.b32.xlu0 %v7350_v6, %s6623_s9  ;;  %v2290_v6 = vld [vmem:[#allocation2 + $0x19a] sm:$0xff] }
 0x196   : > { %2382 = vrot.lane.b32.xlu1 %v7352_v9, %s6623_s9 }
 0x197   : > { %v2325_v59 = vpop.permute.xlu0 %2324  ;;  %v1348_v53 = vld [vmem:[#allocation3 + $0xf0] sm:$0xff] }
 0x198   : > { %v2327_v1 = vpop.permute.xlu1 %2326  ;;  %v1349_v18 = vld [vmem:[#allocation3 + $0xf8] sm:$0xff]  ;;  %2420 = vst.msk [vmem:[#allocation3] sm:$0xff] %vm803_vm7, %v2325_v59  ;;  %6174 = vmatprep.mubr.msk.f32.mxu0 %vm1353_vm8, %v1348_v53 }
 0x199   : > { %2421 = vst.msk [vmem:[#allocation3 + $0x8] sm:$0xff] %vm803_vm7, %v2327_v1  ;;  %2192 = vrot.lane.b32.xlu0 %v2098_v23, %s6622_s8  ;;  %6175 = vmatmul.mubr.msk.f32.gmra.mrb[30].mxu0 %vm1353_vm8, %v1349_v18 }
 0x19a   : > { %2066 = vst.msk [vmem:[#allocation3 + $0xf0] sm:$0xff] %vm279_vm0, %v2034_v41  ;;  %2067 = vst.msk [vmem:[#allocation3 + $0xf8] sm:$0xff] %vm279_vm0, %v2035_v43  ;;  %2194 = vrot.lane.b32.xlu1 %v2099_v31, %s6622_s8  ;;  %6181 = vmatprep.mubr.msk.f32.mxu0 %vm1353_vm8, %v6960_v42  ;;  %v3017_v42 = vld [vmem:[#allocation2 + $0x1] sm:$0xff] }
 0x19b   : > { %v2137_v9 = vpop.permute.xlu0 %2136 }
 0x19c   : > { %v2139_v26 = vpop.permute.xlu1 %2138  ;;  %2230 = vst.msk [vmem:[#allocation3 + $0x10] sm:$0xff] %vm610_vm6, %v2137_v9 }
 0x19d   : > { %2231 = vst.msk [vmem:[#allocation3 + $0x18] sm:$0xff] %vm610_vm6, %v2139_v26  ;;  %2384 = vrot.lane.b32.xlu0 %v2290_v6, %s6623_s9  ;;  %6182 = vmatmul.mubr.msk.f32.vlgmr.msra.gmra.mrb[0].mxu0 %vm1353_vm8, %v6973_v48  ;;  %v3209_v48 = vld [vmem:[#allocation2 + $0x2] sm:$0xff] }
 0x19e   : > { %6454 = vmatpush3.bf16.msk.msra.mxu0 %vm6814_vm5, %v7369_v17  ;;  %2386 = vrot.lane.b32.xlu1 %v2291_v28, %s6623_s9 }
 0x19f   : > { %6184 = vmatprep.mubr.msk.f32.mxu0 %vm1353_vm8, %v6996_v56  ;;  %v2329_v62 = vpop.permute.xlu0 %2328  ;;  %v2452_v60 = vld [vmem:[#allocation3] sm:$0xff] }
 0x1a0   : > { %v2331_v3 = vpop.permute.xlu1 %2330  ;;  %2422 = vst.msk [vmem:[#allocation3 + $0x10] sm:$0xff] %vm803_vm7, %v2329_v62 }
 0x1a1   : > { %2423 = vst.msk [vmem:[#allocation3 + $0x18] sm:$0xff] %vm803_vm7, %v2331_v3  ;;  %6185 = vmatmul.mubr.msk.f32.gmra.mrb[2].mxu0 %vm1353_vm8, %v6998_v58  ;;  %3081 = vrot.lane.b32.xlu0 %v3017_v42, %s6622_s8 }
 0x1a2   : > { %6187 = vmatprep.mubr.msk.f32.mxu0 %vm1353_vm8, %v7019_v0  ;;  %3083 = vrot.lane.b32.xlu1 %v3018_v49, %s6622_s8 }
 0x1a3   : > { %v2141_v17 = vpop.permute.xlu0 %2140 }
 0x1a4   : > { %v2143_v56 = vpop.permute.xlu1 %2142  ;;  %2232 = vst.msk [vmem:[#allocation3 + $0x20] sm:$0xff] %vm610_vm6, %v2141_v17 }
 0x1a5   : > { %2233 = vst.msk [vmem:[#allocation3 + $0x28] sm:$0xff] %vm610_vm6, %v2143_v56  ;;  %6188 = vmatmul.mubr.msk.f32.gmra.mrb[4].mxu0 %vm1353_vm8, %v7021_v2  ;;  %3273 = vrot.lane.b32.xlu0 %v3209_v48, %s6623_s9 }
 0x1a6   : > { %6190 = vmatprep.mubr.msk.f32.mxu0 %vm1353_vm8, %v7069_v22  ;;  %3275 = vrot.lane.b32.xlu1 %v3210_v37, %s6623_s9 }
 0x1a7   : > { %v2333_v58 = vpop.permute.xlu0 %2332  ;;  %v2454_v63 = vld [vmem:[#allocation3 + $0x10] sm:$0xff] }
 0x1a8   : > { %v2335_v0 = vpop.permute.xlu1 %2334  ;;  %2424 = vst.msk [vmem:[#allocation3 + $0x20] sm:$0xff] %vm803_vm7, %v2333_v58 }
 0x1a9   : > { %2425 = vst.msk [vmem:[#allocation3 + $0x28] sm:$0xff] %vm803_vm7, %v2335_v0  ;;  %6191 = vmatmul.mubr.msk.f32.gmra.mrb[6].mxu0 %vm1353_vm8, %v7071_v24 }
 0x1aa   : > { %6193 = vmatprep.mubr.msk.f32.mxu0 %vm1353_vm8, %v7119_v50 }
 0x1ab   : > { %v2145_v2 = vpop.permute.xlu0 %2144 }
 0x1ac   : > { %v2147_v44 = vpop.permute.xlu1 %2146  ;;  %2234 = vst.msk [vmem:[#allocation3 + $0x30] sm:$0xff] %vm610_vm6, %v2145_v2 }
 0x1ad   : > { %2235 = vst.msk [vmem:[#allocation3 + $0x38] sm:$0xff] %vm610_vm6, %v2147_v44  ;;  %6194 = vmatmul.mubr.msk.f32.gmra.mrb[8].mxu0 %vm1353_vm8, %v7121_v51 }
 0x1ae   : > { %6196 = vmatprep.mubr.msk.f32.mxu0 %vm1353_vm8, %v7175_v14 }
 0x1af   : > { %v2337_v22 = vpop.permute.xlu0 %2336  ;;  %v2456_v38 = vld [vmem:[#allocation3 + $0x20] sm:$0xff] }
 0x1b0   : > { %v2339_v34 = vpop.permute.xlu1 %2338  ;;  %2426 = vst.msk [vmem:[#allocation3 + $0x30] sm:$0xff] %vm803_vm7, %v2337_v22 }
 0x1b1   : > { %2427 = vst.msk [vmem:[#allocation3 + $0x38] sm:$0xff] %vm803_vm7, %v2339_v34  ;;  %6197 = vmatmul.mubr.msk.f32.gmra.mrb[10].mxu0 %vm1353_vm8, %v7177_v15  ;;  %v9122_v15 = vld [vmem:[#allocation4_spill] sm:$0xff] }
 0x1b2   : > { %6199 = vmatprep.mubr.msk.f32.mxu0 %vm1353_vm8, %v7229_v61  ;;  %v9123_v61 = vld [vmem:[#allocation5_spill] sm:$0xff] }
 0x1b3   : > { %v2149_v24 = vpop.permute.xlu0 %2148 }
 0x1b4   : > { %v2151_v50 = vpop.permute.xlu1 %2150  ;;  %2236 = vst.msk [vmem:[#allocation3 + $0x40] sm:$0xff] %vm610_vm6, %v2149_v24 }
 0x1b5   : > { %2237 = vst.msk [vmem:[#allocation3 + $0x48] sm:$0xff] %vm610_vm6, %v2151_v50  ;;  %6200 = vmatmul.mubr.msk.f32.gmra.mrb[12].mxu0 %vm1353_vm8, %v7231_v57  ;;  %v9124_v57 = vld [vmem:[#allocation6_spill] sm:$0xff] }
 0x1b6   : > { %6202 = vmatprep.mubr.msk.f32.mxu0 %vm1353_vm8, %v7279_v52  ;;  %v9125_v52 = vld [vmem:[#allocation7_spill] sm:$0xff] }
 0x1b7   : > { %v2341_v51 = vpop.permute.xlu0 %2340  ;;  %v2458_v43 = vld [vmem:[#allocation3 + $0x30] sm:$0xff] }
 0x1b8   : > { %v2343_v14 = vpop.permute.xlu1 %2342  ;;  %2428 = vst.msk [vmem:[#allocation3 + $0x40] sm:$0xff] %vm803_vm7, %v2341_v51  ;;  %v2459_v23 = vld [vmem:[#allocation3 + $0x38] sm:$0xff] }
 0x1b9   : > { %2429 = vst.msk [vmem:[#allocation3 + $0x48] sm:$0xff] %vm803_vm7, %v2343_v14  ;;  %6203 = vmatmul.mubr.msk.f32.gmra.mrb[14].mxu0 %vm1353_vm8, %v9122_v15 }
 0x1ba   : > { %6205 = vmatprep.mubr.msk.f32.mxu0 %vm1353_vm8, %v9123_v61 }
 0x1bb   : > { %v2153_v55 = vpop.permute.xlu0 %2152 }
 0x1bc   : > { %v2155_v36 = vpop.permute.xlu1 %2154  ;;  %2238 = vst.msk [vmem:[#allocation3 + $0x50] sm:$0xff] %vm610_vm6, %v2153_v55 }
 0x1bd   : > { %2239 = vst.msk [vmem:[#allocation3 + $0x58] sm:$0xff] %vm610_vm6, %v2155_v36  ;;  %6206 = vmatmul.mubr.msk.f32.gmra.mrb[16].mxu0 %vm1353_vm8, %v9124_v57 }
 0x1be   : > { %6208 = vmatprep.mubr.msk.f32.mxu0 %vm1353_vm8, %v9125_v52 }
 0x1bf   : > { %v2345_v40 = vpop.permute.xlu0 %2344  ;;  %v2460_v53 = vld [vmem:[#allocation3 + $0x40] sm:$0xff] }
 0x1c0   : > { %v2347_v16 = vpop.permute.xlu1 %2346  ;;  %2430 = vst.msk [vmem:[#allocation3 + $0x50] sm:$0xff] %vm803_vm7, %v2345_v40  ;;  %v2461_v18 = vld [vmem:[#allocation3 + $0x48] sm:$0xff] }
 0x1c1   : > { %2431 = vst.msk [vmem:[#allocation3 + $0x58] sm:$0xff] %vm803_vm7, %v2347_v16  ;;  %6209 = vmatmul.mubr.msk.f32.gmra.mrb[18].mxu0 %vm1353_vm8, %v9126_v19 }
 0x1c2   : > { %6211 = vmatprep.mubr.msk.f32.mxu0 %vm1353_vm8, %v7404_v39 }
 0x1c3   : > { %v2157_v21 = vpop.permute.xlu0 %2156 }
 0x1c4   : > { %v2159_v30 = vpop.permute.xlu1 %2158  ;;  %2240 = vst.msk [vmem:[#allocation3 + $0x60] sm:$0xff] %vm610_vm6, %v2157_v21 }
 0x1c5   : > { %2241 = vst.msk [vmem:[#allocation3 + $0x68] sm:$0xff] %vm610_vm6, %v2159_v30  ;;  %6212 = vmatmul.mubr.msk.f32.gmra.mrb[20].mxu0 %vm1353_vm8, %v9127_v11 }
 0x1c6   : > { %6214 = vmatprep.mubr.msk.f32.mxu0 %vm1353_vm8, %v7438_v8 }
 0x1c7   : > { %v2349_v12 = vpop.permute.xlu0 %2348  ;;  %v2462_v9 = vld [vmem:[#allocation3 + $0x50] sm:$0xff] }
 0x1c8   : > { %v2351_v25 = vpop.permute.xlu1 %2350  ;;  %2432 = vst.msk [vmem:[#allocation3 + $0x60] sm:$0xff] %vm803_vm7, %v2349_v12  ;;  %v2463_v26 = vld [vmem:[#allocation3 + $0x58] sm:$0xff] }
 0x1c9   : > { %2433 = vst.msk [vmem:[#allocation3 + $0x68] sm:$0xff] %vm803_vm7, %v2351_v25  ;;  %6215 = vmatmul.mubr.msk.f32.gmra.mrb[22].mxu0 %vm1353_vm8, %v7440_v27 }
 0x1ca   : > { %6217 = vmatprep.mubr.msk.f32.mxu0 %vm1353_vm8, %v7472_v5 }
 0x1cb   : > { %v2161_v39 = vpop.permute.xlu0 %2160 }
 0x1cc   : > { %v2163_v33 = vpop.permute.xlu1 %2162  ;;  %2242 = vst.msk [vmem:[#allocation3 + $0x70] sm:$0xff] %vm610_vm6, %v2161_v39 }
 0x1cd   : > { %2243 = vst.msk [vmem:[#allocation3 + $0x78] sm:$0xff] %vm610_vm6, %v2163_v33  ;;  %6218 = vmatmul.mubr.msk.f32.gmra.mrb[24].mxu0 %vm1353_vm8, %v7474_v4 }
 0x1ce   : > { %6220 = vmatprep.mubr.msk.f32.mxu0 %vm1353_vm8, %v7502_v13 }
 0x1cf   : > { %v2353_v8 = vpop.permute.xlu0 %2352  ;;  %v2464_v62 = vld [vmem:[#allocation3 + $0x60] sm:$0xff] }
 0x1d0   : > { %v2355_v46 = vpop.permute.xlu1 %2354  ;;  %2434 = vst.msk [vmem:[#allocation3 + $0x70] sm:$0xff] %vm803_vm7, %v2353_v8  ;;  %v2465_v3 = vld [vmem:[#allocation3 + $0x68] sm:$0xff] }
 0x1d1   : > { %2435 = vst.msk [vmem:[#allocation3 + $0x78] sm:$0xff] %vm803_vm7, %v2355_v46  ;;  %6221 = vmatmul.mubr.msk.f32.gmra.mrb[26].mxu0 %vm1353_vm8, %v7504_v47  ;;  %v2453_v47 = vld [vmem:[#allocation3 + $0x8] sm:$0xff] }
 0x1d2   : > { %6223 = vmatprep.mubr.msk.f32.mxu0 %vm1353_vm8, %v7535_v32 }
 0x1d3   : > { %v2165_v27 = vpop.permute.xlu0 %2164 }
 0x1d4   : > { %v2167_v5 = vpop.permute.xlu1 %2166  ;;  %2244 = vst.msk [vmem:[#allocation3 + $0x80] sm:$0xff] %vm610_vm6, %v2165_v27 }
 0x1d5   : > { %2245 = vst.msk [vmem:[#allocation3 + $0x88] sm:$0xff] %vm610_vm6, %v2167_v5  ;;  %6224 = vmatmul.mubr.msk.f32.gmra.mrb[28].mxu0 %vm1353_vm8, %v7537_v20  ;;  %v2455_v20 = vld [vmem:[#allocation3 + $0x18] sm:$0xff] }
 0x1d6   : > { %6226 = vmatprep.mubr.msk.f32.mxu0 %vm1353_vm8, %v7573_v10 }
 0x1d7   : > { %v2357_v4 = vpop.permute.xlu0 %2356  ;;  %v2466_v17 = vld [vmem:[#allocation3 + $0x70] sm:$0xff] }
 0x1d8   : > { %v2359_v13 = vpop.permute.xlu1 %2358  ;;  %2436 = vst.msk [vmem:[#allocation3 + $0x80] sm:$0xff] %vm803_vm7, %v2357_v4  ;;  %v2467_v56 = vld [vmem:[#allocation3 + $0x78] sm:$0xff] }
 0x1d9   : > { %2437 = vst.msk [vmem:[#allocation3 + $0x88] sm:$0xff] %vm803_vm7, %v2359_v13  ;;  %6227 = vmatmul.mubr.msk.f32.gmra.mrb[30].mxu0 %vm1353_vm8, %v7575_v54  ;;  %v2457_v54 = vld [vmem:[#allocation3 + $0x28] sm:$0xff]  ;;  %v2954_v13 = vld [vmem:[#allocation2 + $0x8] sm:$0xff] }
 0x1da   : > { %6233 = vmatprep.mubr.msk.f32.mxu0 %vm1353_vm8, %v2452_v60  ;;  %v2953_v60 = vld [vmem:[#allocation2] sm:$0xff]  ;;  %2986 = vst.msk [vmem:[#allocation3 + $0x8] sm:$0xff] %vm279_vm0, %v2954_v13 }
 0x1db   : > { %v2169_v32 = vpop.permute.xlu0 %2168  ;;  %2985 = vst.msk [vmem:[#allocation3] sm:$0xff] %vm279_vm0, %v2953_v60 }
 0x1dc   : > { %v2171_v35 = vpop.permute.xlu1 %2170  ;;  %2246 = vst.msk [vmem:[#allocation3 + $0x90] sm:$0xff] %vm610_vm6, %v2169_v32 }
 0x1dd   : > { %2247 = vst.msk [vmem:[#allocation3 + $0x98] sm:$0xff] %vm610_vm6, %v2171_v35  ;;  %6234 = vmatmul.mubr.msk.f32.vlgmr.msra.gmra.mrb[0].mxu0 %vm1353_vm8, %v2453_v47  ;;  %v7807_v35 = vld [vmem:[%s9107_s2] ss:$0 sm:$0xff] }
 0x1de   : > { %6236 = vmatprep.mubr.msk.f32.mxu0 %vm1353_vm8, %v2454_v63 }
 0x1df   : > { %v2361_v10 = vpop.permute.xlu0 %2360  ;;  %v2468_v0 = vld [vmem:[#allocation3 + $0x80] sm:$0xff] }
 0x1e0   : > { %v2363_v7 = vpop.permute.xlu1 %2362  ;;  %2438 = vst.msk [vmem:[#allocation3 + $0x90] sm:$0xff] %vm803_vm7, %v2361_v10  ;;  %v2469_v2 = vld [vmem:[#allocation3 + $0x88] sm:$0xff] }
 0x1e1   : > { %2439 = vst.msk [vmem:[#allocation3 + $0x98] sm:$0xff] %vm803_vm7, %v2363_v7  ;;  %6237 = vmatmul.mubr.msk.f32.gmra.mrb[2].mxu0 %vm1353_vm8, %v2455_v20  ;;  %v7812_v20 = vld [vmem:[%s9108_s3] ss:$0 sm:$0xff] }
 0x1e2   : > { %6239 = vmatprep.mubr.msk.f32.mxu0 %vm1353_vm8, %v2456_v38 }
 0x1e3   : > { %v2173_v29 = vpop.permute.xlu0 %2172 }
 0x1e4   : > { %v2175_v41 = vpop.permute.xlu1 %2174  ;;  %2248 = vst.msk [vmem:[#allocation3 + $0xa0] sm:$0xff] %vm610_vm6, %v2173_v29 }
 0x1e5   : > { %2249 = vst.msk [vmem:[#allocation3 + $0xa8] sm:$0xff] %vm610_vm6, %v2175_v41  ;;  %6240 = vmatmul.mubr.msk.f32.gmra.mrb[4].mxu0 %vm1353_vm8, %v2457_v54 }
 0x1e6   : > { %6242 = vmatprep.mubr.msk.f32.mxu0 %vm1353_vm8, %v2458_v43 }
 0x1e7   : > { %v2365_v59 = vpop.permute.xlu0 %2364  ;;  %v2470_v22 = vld [vmem:[#allocation3 + $0x90] sm:$0xff] }
 0x1e8   : > { %v2367_v1 = vpop.permute.xlu1 %2366  ;;  %2440 = vst.msk [vmem:[#allocation3 + $0xa0] sm:$0xff] %vm803_vm7, %v2365_v59  ;;  %v2471_v24 = vld [vmem:[#allocation3 + $0x98] sm:$0xff] }
 0x1e9   : > { %2441 = vst.msk [vmem:[#allocation3 + $0xa8] sm:$0xff] %vm803_vm7, %v2367_v1  ;;  %6243 = vmatmul.mubr.msk.f32.gmra.mrb[6].mxu0 %vm1353_vm8, %v2459_v23 }
 0x1ea   : > { %6245 = vmatprep.mubr.msk.f32.mxu0 %vm1353_vm8, %v2460_v53 }
 0x1eb   : > { %v2177_v31 = vpop.permute.xlu0 %2176 }
 0x1ec   : > { %v2179_v6 = vpop.permute.xlu1 %2178  ;;  %2250 = vst.msk [vmem:[#allocation3 + $0xb0] sm:$0xff] %vm610_vm6, %v2177_v31 }
 0x1ed   : > { %2251 = vst.msk [vmem:[#allocation3 + $0xb8] sm:$0xff] %vm610_vm6, %v2179_v6  ;;  %6246 = vmatmul.mubr.msk.f32.gmra.mrb[8].mxu0 %vm1353_vm8, %v2461_v18 }
 0x1ee   : > { %6248 = vmatprep.mubr.msk.f32.mxu0 %vm1353_vm8, %v2462_v9 }
 0x1ef   : > { %v2369_v28 = vpop.permute.xlu0 %2368  ;;  %v2472_v51 = vld [vmem:[#allocation3 + $0xa0] sm:$0xff] }
 0x1f0   : > { %v2371_v42 = vpop.permute.xlu1 %2370  ;;  %2442 = vst.msk [vmem:[#allocation3 + $0xb0] sm:$0xff] %vm803_vm7, %v2369_v28  ;;  %v2473_v15 = vld [vmem:[#allocation3 + $0xa8] sm:$0xff] }
 0x1f1   : > { %2443 = vst.msk [vmem:[#allocation3 + $0xb8] sm:$0xff] %vm803_vm7, %v2371_v42  ;;  %6249 = vmatmul.mubr.msk.f32.gmra.mrb[10].mxu0 %vm1353_vm8, %v2463_v26 }
 0x1f2   : > { %6251 = vmatprep.mubr.msk.f32.mxu0 %vm1353_vm8, %v2464_v62 }
 0x1f3   : > { %v2181_v49 = vpop.permute.xlu0 %2180 }
 0x1f4   : > { %v2183_v48 = vpop.permute.xlu1 %2182  ;;  %2252 = vst.msk [vmem:[#allocation3 + $0xc0] sm:$0xff] %vm610_vm6, %v2181_v49 }
 0x1f5   : > { %2253 = vst.msk [vmem:[#allocation3 + $0xc8] sm:$0xff] %vm610_vm6, %v2183_v48  ;;  %6252 = vmatmul.mubr.msk.f32.gmra.mrb[12].mxu0 %vm1353_vm8, %v2465_v3 }
 0x1f6   : > { %6254 = vmatprep.mubr.msk.f32.mxu0 %vm1353_vm8, %v2466_v17 }
 0x1f7   : > { %v2373_v37 = vpop.permute.xlu0 %2372  ;;  %v2474_v55 = vld [vmem:[#allocation3 + $0xb0] sm:$0xff] }
 0x1f8   : > { %v2375_v58 = vpop.permute.xlu1 %2374  ;;  %2444 = vst.msk [vmem:[#allocation3 + $0xc0] sm:$0xff] %vm803_vm7, %v2373_v37  ;;  %v2475_v57 = vld [vmem:[#allocation3 + $0xb8] sm:$0xff] }
 0x1f9   : > { %2445 = vst.msk [vmem:[#allocation3 + $0xc8] sm:$0xff] %vm803_vm7, %v2375_v58  ;;  %6255 = vmatmul.mubr.msk.f32.gmra.mrb[14].mxu0 %vm1353_vm8, %v2467_v56 }
 0x1fa   : > { %6257 = vmatprep.mubr.msk.f32.mxu0 %vm1353_vm8, %v2468_v0 }
 0x1fb   : > { %v2185_v44 = vpop.permute.xlu0 %2184 }
 0x1fc   : > { %2254 = vst.msk [vmem:[#allocation3 + $0xd0] sm:$0xff] %vm610_vm6, %v2185_v44  ;;  %v2187_v34 = vpop.permute.xlu1 %2186 }
 0x1fd   : > { %2255 = vst.msk [vmem:[#allocation3 + $0xd8] sm:$0xff] %vm610_vm6, %v2187_v34  ;;  %6258 = vmatmul.mubr.msk.f32.gmra.mrb[16].mxu0 %vm1353_vm8, %v2469_v2 }
 0x1fe   : > { %6260 = vmatprep.mubr.msk.f32.mxu0 %vm1353_vm8, %v2470_v22 }
 0x1ff   : > { %v2377_v50 = vpop.permute.xlu0 %2376  ;;  %v2476_v40 = vld [vmem:[#allocation3 + $0xc0] sm:$0xff] }
 0x200   : > { %2446 = vst.msk [vmem:[#allocation3 + $0xd0] sm:$0xff] %vm803_vm7, %v2377_v50  ;;  %v2379_v14 = vpop.permute.xlu1 %2378  ;;  %v2477_v19 = vld [vmem:[#allocation3 + $0xc8] sm:$0xff] }
 0x201   : > { %2447 = vst.msk [vmem:[#allocation3 + $0xd8] sm:$0xff] %vm803_vm7, %v2379_v14  ;;  %6261 = vmatmul.mubr.msk.f32.gmra.mrb[18].mxu0 %vm1353_vm8, %v2471_v24 }
 0x202   : > { %6263 = vmatprep.mubr.msk.f32.mxu0 %vm1353_vm8, %v2472_v51 }
 0x203   : > { %v2189_v61 = vpop.permute.xlu0 %2188 }
 0x204   : > { %2256 = vst.msk [vmem:[#allocation3 + $0xe0] sm:$0xff] %vm610_vm6, %v2189_v61  ;;  %v2191_v36 = vpop.permute.xlu1 %2190 }
 0x205   : > { %2257 = vst.msk [vmem:[#allocation3 + $0xe8] sm:$0xff] %vm610_vm6, %v2191_v36  ;;  %6264 = vmatmul.mubr.msk.f32.gmra.mrb[20].mxu0 %vm1353_vm8, %v2473_v15  ;;  %v5813_v36 = vld [vmem:[%s9109_s4 + $0x18] sm:$0xf] }
 0x206   : > { %6266 = vmatprep.mubr.msk.f32.mxu0 %vm1353_vm8, %v2474_v55  ;;  %v5812_v55 = vld [vmem:[%s9109_s4 + $0x10] sm:$0xff] }
 0x207   : > { %v2381_v52 = vpop.permute.xlu0 %2380  ;;  %v2478_v30 = vld [vmem:[#allocation3 + $0xd0] sm:$0xff] }
 0x208   : > { %2448 = vst.msk [vmem:[#allocation3 + $0xe0] sm:$0xff] %vm803_vm7, %v2381_v52  ;;  %v2383_v16 = vpop.permute.xlu1 %2382  ;;  %v2479_v12 = vld [vmem:[#allocation3 + $0xd8] sm:$0xff] }
 0x209   : > { %2449 = vst.msk [vmem:[#allocation3 + $0xe8] sm:$0xff] %vm803_vm7, %v2383_v16  ;;  %6267 = vmatmul.mubr.msk.f32.gmra.mrb[22].mxu0 %vm1353_vm8, %v2475_v57  ;;  %v6455_v16 = vpack.c.bf16 %v5813_v36, %v5812_v55 }
 0x20a   : > { %6269 = vmatprep.mubr.msk.f32.mxu0 %vm1353_vm8, %v2476_v40 }
 0x20b   : > { %v2193_v21 = vpop.permute.xlu0 %2192  ;;  %6457 = vmatprep.subr.msk.bf16.mxu1 %vm6814_vm5, %v6455_v16 }
 0x20c   : > { %2258 = vst.msk [vmem:[#allocation3 + $0xf0] sm:$0xff] %vm610_vm6, %v2193_v21  ;;  %v2195_v11 = vpop.permute.xlu1 %2194  ;;  %6460 = vmatpush3.bf16.msk.msra.mxu1 %vm6814_vm5, %v6455_v16 }
 0x20d   : > { %2259 = vst.msk [vmem:[#allocation3 + $0xf8] sm:$0xff] %vm610_vm6, %v2195_v11  ;;  %6270 = vmatmul.mubr.msk.f32.gmra.mrb[24].mxu0 %vm1353_vm8, %v2477_v19 }
 0x20e   : > { %6272 = vmatprep.mubr.msk.f32.mxu0 %vm1353_vm8, %v2478_v30 }
 0x20f   : > { %v2385_v25 = vpop.permute.xlu0 %2384  ;;  %v2480_v39 = vld [vmem:[#allocation3 + $0xe0] sm:$0xff] }
 0x210   : > { %2450 = vst.msk [vmem:[#allocation3 + $0xf0] sm:$0xff] %vm803_vm7, %v2385_v25  ;;  %v2387_v33 = vpop.permute.xlu1 %2386  ;;  %v2481_v8 = vld [vmem:[#allocation3 + $0xe8] sm:$0xff] }
 0x211   : > { %2451 = vst.msk [vmem:[#allocation3 + $0xf8] sm:$0xff] %vm803_vm7, %v2387_v33  ;;  %6273 = vmatmul.mubr.msk.f32.gmra.mrb[26].mxu0 %vm1353_vm8, %v2479_v12 }
 0x212   : > { %6275 = vmatprep.mubr.msk.f32.mxu0 %vm1353_vm8, %v2480_v39 }
 0x213   : > { %v3082_v4 = vpop.permute.xlu0 %3081 }
 0x214   : > { %v3084_v5 = vpop.permute.xlu1 %3083  ;;  %3177 = vst.msk [vmem:[#allocation3] sm:$0xff] %vm610_vm6, %v3082_v4 }
 0x215   : > { %6276 = vmatmul.mubr.msk.f32.gmra.mrb[28].mxu0 %vm1353_vm8, %v2481_v8  ;;  %3178 = vst.msk [vmem:[#allocation3 + $0x8] sm:$0xff] %vm610_vm6, %v3084_v5 }
 0x217   : > { %v2482_v46 = vld [vmem:[#allocation3 + $0xf0] sm:$0xff]  ;;  %v3274_v32 = vpop.permute.xlu0 %3273 }
 0x218   : > { %6278 = vmatprep.mubr.msk.f32.mxu0 %vm1353_vm8, %v2482_v46  ;;  %v2483_v27 = vld [vmem:[#allocation3 + $0xf8] sm:$0xff]  ;;  %v3276_v47 = vpop.permute.xlu1 %3275  ;;  %3369 = vst.msk [vmem:[#allocation3] sm:$0xff] %vm803_vm7, %v3274_v32 }
 0x219   : > { %6279 = vmatmul.mubr.msk.f32.gmra.mrb[30].mxu0 %vm1353_vm8, %v2483_v27  ;;  %3370 = vst.msk [vmem:[#allocation3 + $0x8] sm:$0xff] %vm803_vm7, %v3276_v47 }
 0x21f   : > { %v7832_v48 = vld [vmem:[#allocation3] sm:$0xff] }
 0x220   : > { %v7829_v28 = vld [vmem:[#allocation3 + $0x8] sm:$0xff] }
 0x2b0   : > { %v6235_v63 = vpop.f32.mrb[0].mxu0 }
 0x2b1   : > { %v2851_v10 = vmul.f32 %v6235_v63, %v7807_v35  ;;  %v2652_v7 = vpop.f32.mrb[1].mxu0 }
 0x2b2   : > { %v2850_v38 = vmul.f32 %v7807_v35, %v2652_v7 }
 0x2b3   : > { %v2890_v54 = vadd.f32 %v7812_v20, %v2851_v10 }
 0x2b4   : > { %v2889_v29 = vadd.f32 %v7812_v20, %v2850_v38  ;;  %v6238_v41 = vpop.f32.mrb[2].mxu0 }
 0x2b5   : > { %2922 = vst.msk [vmem:[#allocation2 + $0x21] sm:$0xff] %vm279_vm0, %v2890_v54  ;;  %v2853_v43 = vmul.f32 %v6238_v41, %v7807_v35  ;;  %v2662_v23 = vpop.f32.mrb[3].mxu0 }
 0x2b6   : > { %2921 = vst.msk [vmem:[#allocation2 + $0x19] sm:$0xff] %vm279_vm0, %v2889_v29  ;;  %v2852_v59 = vmul.f32 %v7807_v35, %v2662_v23 }
 0x2b7   : > { %v2892_v1 = vadd.f32 %v7812_v20, %v2853_v43 }
 0x2b8   : > { %v2891_v53 = vadd.f32 %v7812_v20, %v2852_v59  ;;  %v6241_v18 = vpop.f32.mrb[4].mxu0 }
 0x2b9   : > { %2924 = vst.msk [vmem:[#allocation2 + $0x39] sm:$0xff] %vm279_vm0, %v2892_v1  ;;  %v2855_v31 = vmul.f32 %v6241_v18, %v7807_v35  ;;  %v2672_v6 = vpop.f32.mrb[5].mxu0 }
 0x2ba   : > { %2923 = vst.msk [vmem:[#allocation2 + $0x31] sm:$0xff] %vm279_vm0, %v2891_v53  ;;  %v2854_v9 = vmul.f32 %v7807_v35, %v2672_v6 }
 0x2bb   : > { %v2894_v26 = vadd.f32 %v7812_v20, %v2855_v31 }
 0x2bc   : > { %v2893_v42 = vadd.f32 %v7812_v20, %v2854_v9  ;;  %v6244_v62 = vpop.f32.mrb[6].mxu0  ;;  %v3692_v3 = vld [vmem:[#allocation2 + $0x22] sm:$0xff] }
 0x2bd   : > { %v3020_v49 = vld [vmem:[#allocation2 + $0x21] sm:$0xff]  ;;  %2926 = vst.msk [vmem:[#allocation2 + $0x51] sm:$0xff] %vm279_vm0, %v2894_v26  ;;  %v2857_v17 = vmul.f32 %v6244_v62, %v7807_v35  ;;  %3757 = vrot.lane.b32.xlu0 %v3692_v3, %s6623_s9  ;;  %v2682_v56 = vpop.f32.mrb[7].mxu0  ;;  %v2955_v0 = vld [vmem:[#allocation2 + $0x18] sm:$0xff] }
 0x2be   : > { %3087 = vrot.lane.b32.xlu1 %v3020_v49, %s6622_s8  ;;  %v2956_v37 = vld [vmem:[#allocation2 + $0x20] sm:$0xff]  ;;  %2925 = vst.msk [vmem:[#allocation2 + $0x49] sm:$0xff] %vm279_vm0, %v2893_v42  ;;  %v2856_v58 = vmul.f32 %v7807_v35, %v2682_v56  ;;  %2987 = vst.msk [vmem:[#allocation3 + $0x10] sm:$0xff] %vm279_vm0, %v2955_v0 }
 0x2bf   : > { %2988 = vst.msk [vmem:[#allocation3 + $0x18] sm:$0xff] %vm279_vm0, %v2956_v37  ;;  %3468 = vst.msk [vmem:[#allocation3 + $0x8] sm:$0xff] %vm279_vm0, %v2956_v37  ;;  %v2896_v2 = vadd.f32 %v7812_v20, %v2857_v17  ;;  %v3019_v34 = vld [vmem:[#allocation2 + $0x19] sm:$0xff] }
 0x2c0   : > { %3467 = vst.msk [vmem:[#allocation3] sm:$0xff] %vm279_vm0, %v2955_v0  ;;  %v2895_v44 = vadd.f32 %v7812_v20, %v2856_v58  ;;  %v6247_v22 = vpop.f32.mrb[8].mxu0  ;;  %v3211_v40 = vld [vmem:[#allocation2 + $0x1a] sm:$0xff] }
 0x2c1   : > { %2928 = vst.msk [vmem:[#allocation2 + $0x69] sm:$0xff] %vm279_vm0, %v2896_v2  ;;  %v2859_v24 = vmul.f32 %v6247_v22, %v7807_v35  ;;  %3085 = vrot.lane.b32.xlu0 %v3019_v34, %s6622_s8  ;;  %v2692_v50 = vpop.f32.mrb[9].mxu0  ;;  %v7850_v51 = vld [vmem:[#allocation2 + $0x38] sm:$0xff]  ;;  %v7856_v15 = vld [vmem:[#allocation2 + $0x30] sm:$0xff] }
 0x2c2   : > { %3279 = vrot.lane.b32.xlu1 %v3692_v3, %s6623_s9  ;;  %2927 = vst.msk [vmem:[#allocation2 + $0x61] sm:$0xff] %vm279_vm0, %v2895_v44  ;;  %v2858_v14 = vmul.f32 %v7807_v35, %v2692_v50  ;;  %2990 = vst.msk [vmem:[#allocation3 + $0x28] sm:$0xff] %vm279_vm0, %v7850_v51  ;;  %v3022_v8 = vld [vmem:[#allocation2 + $0x39] sm:$0xff]  ;;  %v3021_v42 = vld [vmem:[#allocation2 + $0x31] sm:$0xff] }
 0x2c3   : > { %v2898_v61 = vadd.f32 %v7812_v20, %v2859_v24  ;;  %2989 = vst.msk [vmem:[#allocation3 + $0x20] sm:$0xff] %vm279_vm0, %v7856_v15  ;;  %v3214_v63 = vld [vmem:[#allocation2 + $0x3a] sm:$0xff]  ;;  %v3213_v44 = vld [vmem:[#allocation2 + $0x32] sm:$0xff] }
 0x2c4   : > { %v2897_v57 = vadd.f32 %v7812_v20, %v2858_v14  ;;  %v6250_v52 = vpop.f32.mrb[10].mxu0  ;;  %v3024_v62 = vld [vmem:[#allocation2 + $0x51] sm:$0xff] }
 0x2c5   : > { %2930 = vst.msk [vmem:[#allocation2 + $0x81] sm:$0xff] %vm279_vm0, %v2898_v61  ;;  %v2861_v19 = vmul.f32 %v6250_v52, %v7807_v35  ;;  %3277 = vrot.lane.b32.xlu0 %v3211_v40, %s6623_s9  ;;  %v2702_v21 = vpop.f32.mrb[11].mxu0  ;;  %v7872_v30 = vld [vmem:[#allocation2 + $0x50] sm:$0xff]  ;;  %v7880_v12 = vld [vmem:[#allocation2 + $0x48] sm:$0xff] }
 0x2c6   : > { %3565 = vrot.lane.b32.xlu1 %v3020_v49, %s6622_s8  ;;  %2929 = vst.msk [vmem:[#allocation2 + $0x79] sm:$0xff] %vm279_vm0, %v2897_v57  ;;  %v2860_v11 = vmul.f32 %v7807_v35, %v2702_v21  ;;  %2992 = vst.msk [vmem:[#allocation3 + $0x38] sm:$0xff] %vm279_vm0, %v7872_v30  ;;  %v3216_v22 = vld [vmem:[#allocation2 + $0x52] sm:$0xff] }
 0x2c7   : > { %v2900_v25 = vadd.f32 %v7812_v20, %v2861_v19  ;;  %2991 = vst.msk [vmem:[#allocation3 + $0x30] sm:$0xff] %vm279_vm0, %v7880_v12 }
 0x2c8   : > { %v2899_v39 = vadd.f32 %v7812_v20, %v2860_v11  ;;  %v6253_v33 = vpop.f32.mrb[12].mxu0 }
 0x2c9   : > { %2932 = vst.msk [vmem:[#allocation2 + $0x99] sm:$0xff] %vm279_vm0, %v2900_v25  ;;  %v2863_v46 = vmul.f32 %v6253_v33, %v7807_v35  ;;  %3563 = vrot.lane.b32.xlu0 %v3019_v34, %s6622_s8  ;;  %v2712_v27 = vpop.f32.mrb[13].mxu0  ;;  %v7892_v5 = vld [vmem:[#allocation2 + $0x68] sm:$0xff]  ;;  %v7898_v13 = vld [vmem:[#allocation2 + $0x60] sm:$0xff] }
 0x2ca   : > { %3091 = vrot.lane.b32.xlu1 %v3022_v8, %s6622_s8  ;;  %2931 = vst.msk [vmem:[#allocation2 + $0x91] sm:$0xff] %vm279_vm0, %v2899_v39  ;;  %v2862_v4 = vmul.f32 %v7807_v35, %v2712_v27  ;;  %2994 = vst.msk [vmem:[#allocation3 + $0x48] sm:$0xff] %vm279_vm0, %v7892_v5  ;;  %v3023_v33 = vld [vmem:[#allocation2 + $0x49] sm:$0xff] }
 0x2cb   : > { %v2902_v60 = vadd.f32 %v7812_v20, %v2863_v46  ;;  %2993 = vst.msk [vmem:[#allocation3 + $0x40] sm:$0xff] %vm279_vm0, %v7898_v13 }
 0x2cc   : > { %v2901_v47 = vadd.f32 %v7812_v20, %v2862_v4  ;;  %v6256_v32 = vpop.f32.mrb[14].mxu0 }
 0x2cd   : > { %2934 = vst.msk [vmem:[#allocation2 + $0xb1] sm:$0xff] %vm279_vm0, %v2902_v60  ;;  %v2865_v10 = vmul.f32 %v6256_v32, %v7807_v35  ;;  %3755 = vrot.lane.b32.xlu0 %v3211_v40, %s6623_s9  ;;  %v2722_v7 = vpop.f32.mrb[15].mxu0  ;;  %v7908_v38 = vld [vmem:[#allocation2 + $0x80] sm:$0xff]  ;;  %v7914_v29 = vld [vmem:[#allocation2 + $0x78] sm:$0xff] }
 0x2ce   : > { %3283 = vrot.lane.b32.xlu1 %v3214_v63, %s6623_s9  ;;  %2933 = vst.msk [vmem:[#allocation2 + $0xa9] sm:$0xff] %vm279_vm0, %v2901_v47  ;;  %v2864_v54 = vmul.f32 %v7807_v35, %v2722_v7  ;;  %2996 = vst.msk [vmem:[#allocation3 + $0x58] sm:$0xff] %vm279_vm0, %v7908_v38 }
 0x2cf   : > { %v2904_v41 = vadd.f32 %v7812_v20, %v2865_v10  ;;  %2995 = vst.msk [vmem:[#allocation3 + $0x50] sm:$0xff] %vm279_vm0, %v7914_v29  ;;  %v3026_v10 = vld [vmem:[#allocation2 + $0x69] sm:$0xff] }
 0x2d0   : > { %v2903_v43 = vadd.f32 %v7812_v20, %v2864_v54  ;;  %v6259_v23 = vpop.f32.mrb[16].mxu0 }
 0x2d1   : > { %2936 = vst.msk [vmem:[#allocation2 + $0xc9] sm:$0xff] %vm279_vm0, %v2904_v41  ;;  %v2867_v59 = vmul.f32 %v6259_v23, %v7807_v35  ;;  %3761 = vrot.lane.b32.xlu0 %v3214_v63, %s6623_s9  ;;  %v2732_v1 = vpop.f32.mrb[17].mxu0  ;;  %v7924_v53 = vld [vmem:[#allocation2 + $0x98] sm:$0xff]  ;;  %v7930_v31 = vld [vmem:[#allocation2 + $0x90] sm:$0xff] }
 0x2d2   : > { %3569 = vrot.lane.b32.xlu1 %v3022_v8, %s6622_s8  ;;  %2935 = vst.msk [vmem:[#allocation2 + $0xc1] sm:$0xff] %vm279_vm0, %v2903_v43  ;;  %v2866_v18 = vmul.f32 %v7807_v35, %v2732_v1  ;;  %2998 = vst.msk [vmem:[#allocation3 + $0x68] sm:$0xff] %vm279_vm0, %v7924_v53 }
 0x2d3   : > { %v2906_v6 = vadd.f32 %v7812_v20, %v2867_v59  ;;  %2997 = vst.msk [vmem:[#allocation3 + $0x60] sm:$0xff] %vm279_vm0, %v7930_v31 }
 0x2d4   : > { %v2905_v9 = vadd.f32 %v7812_v20, %v2866_v18  ;;  %v6262_v26 = vpop.f32.mrb[18].mxu0 }
 0x2d5   : > { %2938 = vst.msk [vmem:[#allocation2 + $0xe1] sm:$0xff] %vm279_vm0, %v2906_v6  ;;  %v2869_v3 = vmul.f32 %v6262_v26, %v7807_v35  ;;  %3089 = vrot.lane.b32.xlu0 %v3021_v42, %s6622_s8  ;;  %v2742_v49 = vpop.f32.mrb[19].mxu0  ;;  %v7940_v17 = vld [vmem:[#allocation2 + $0xb0] sm:$0xff]  ;;  %v7946_v37 = vld [vmem:[#allocation2 + $0xa8] sm:$0xff] }
 0x2d6   : > { %3095 = vrot.lane.b32.xlu1 %v3024_v62, %s6622_s8  ;;  %2937 = vst.msk [vmem:[#allocation2 + $0xd9] sm:$0xff] %vm279_vm0, %v2905_v9  ;;  %v2868_v56 = vmul.f32 %v7807_v35, %v2742_v49  ;;  %3000 = vst.msk [vmem:[#allocation3 + $0x78] sm:$0xff] %vm279_vm0, %v7940_v17  ;;  %v8016_v6 = vld [vmem:[#allocation2 + $0x4a] sm:$0xff] }
 0x2d7   : > { %v2908_v58 = vadd.f32 %v7812_v20, %v2869_v3  ;;  %2999 = vst.msk [vmem:[#allocation3 + $0x70] sm:$0xff] %vm279_vm0, %v7946_v37  ;;  %v3218_v9 = vld [vmem:[#allocation2 + $0x6a] sm:$0xff] }
 0x2d8   : > { %v2907_v0 = vadd.f32 %v7812_v20, %v2868_v56  ;;  %v6265_v2 = vpop.f32.mrb[20].mxu0 }
 0x2d9   : > { %2940 = vst.msk [vmem:[#allocation2 + $0xf9] sm:$0xff] %vm279_vm0, %v2908_v58  ;;  %v2871_v34 = vmul.f32 %v6265_v2, %v7807_v35  ;;  %3281 = vrot.lane.b32.xlu0 %v3213_v44, %s6623_s9  ;;  %v2752_v24 = vpop.f32.mrb[21].mxu0  ;;  %v7956_v50 = vld [vmem:[#allocation2 + $0xc8] sm:$0xff]  ;;  %v7962_v61 = vld [vmem:[#allocation2 + $0xc0] sm:$0xff] }
 0x2da   : > { %3287 = vrot.lane.b32.xlu1 %v3216_v22, %s6623_s9  ;;  %2939 = vst.msk [vmem:[#allocation2 + $0xf1] sm:$0xff] %vm279_vm0, %v2907_v0  ;;  %v2870_v14 = vmul.f32 %v7807_v35, %v2752_v24  ;;  %3002 = vst.msk [vmem:[#allocation3 + $0x88] sm:$0xff] %vm279_vm0, %v7956_v50 }
 0x2db   : > { %v2910_v55 = vadd.f32 %v7812_v20, %v2871_v34  ;;  %3001 = vst.msk [vmem:[#allocation3 + $0x80] sm:$0xff] %vm279_vm0, %v7962_v61 }
 0x2dc   : > { %v2909_v36 = vadd.f32 %v7812_v20, %v2870_v14  ;;  %v6268_v57 = vpop.f32.mrb[22].mxu0 }
 0x2dd   : > { %2942 = vst.msk [vmem:[#allocation2 + $0x111] sm:$0xff] %vm279_vm0, %v2910_v55  ;;  %v2873_v52 = vmul.f32 %v6268_v57, %v7807_v35  ;;  %3567 = vrot.lane.b32.xlu0 %v3021_v42, %s6622_s8  ;;  %v2762_v40 = vpop.f32.mrb[23].mxu0  ;;  %v7972_v16 = vld [vmem:[#allocation2 + $0xe0] sm:$0xff]  ;;  %v7978_v21 = vld [vmem:[#allocation2 + $0xd8] sm:$0xff] }
 0x2de   : > { %3573 = vrot.lane.b32.xlu1 %v3024_v62, %s6622_s8  ;;  %2941 = vst.msk [vmem:[#allocation2 + $0x109] sm:$0xff] %vm279_vm0, %v2909_v36  ;;  %v2872_v19 = vmul.f32 %v7807_v35, %v2762_v40  ;;  %3004 = vst.msk [vmem:[#allocation3 + $0x98] sm:$0xff] %vm279_vm0, %v7972_v16  ;;  %v8051_v36 = vld [vmem:[#allocation2 + $0x61] sm:$0xff] }
 0x2df   : > { %v2912_v11 = vadd.f32 %v7812_v20, %v2873_v52  ;;  %3003 = vst.msk [vmem:[#allocation3 + $0x90] sm:$0xff] %vm279_vm0, %v7978_v21 }
 0x2e0   : > { %v2911_v25 = vadd.f32 %v7812_v20, %v2872_v19  ;;  %v6271_v39 = vpop.f32.mrb[24].mxu0  ;;  %v8080_v19 = vld [vmem:[#allocation2 + $0x62] sm:$0xff] }
 0x2e1   : > { %2944 = vst.msk [vmem:[#allocation2 + $0x129] sm:$0xff] %vm279_vm0, %v2912_v11  ;;  %v2875_v8 = vmul.f32 %v6271_v39, %v7807_v35  ;;  %3759 = vrot.lane.b32.xlu0 %v3213_v44, %s6623_s9  ;;  %v2772_v46 = vpop.f32.mrb[25].mxu0  ;;  %v7988_v27 = vld [vmem:[#allocation2 + $0xf8] sm:$0xff]  ;;  %v7994_v60 = vld [vmem:[#allocation2 + $0xf0] sm:$0xff]  ;;  %v3220_v11 = vld [vmem:[#allocation2 + $0x82] sm:$0xff] }
 0x2e2   : > { %3093 = vrot.lane.b32.xlu1 %v3023_v33, %s6622_s8  ;;  %2943 = vst.msk [vmem:[#allocation2 + $0x121] sm:$0xff] %vm279_vm0, %v2911_v25  ;;  %v2874_v4 = vmul.f32 %v7807_v35, %v2772_v46  ;;  %3006 = vst.msk [vmem:[#allocation3 + $0xa8] sm:$0xff] %vm279_vm0, %v7988_v27  ;;  %v8089_v25 = vld [vmem:[#allocation2 + $0x79] sm:$0xff]  ;;  %v8105_v46 = vld [vmem:[#allocation2 + $0x91] sm:$0xff] }
 0x2e3   : > { %v2914_v47 = vadd.f32 %v7812_v20, %v2875_v8  ;;  %3005 = vst.msk [vmem:[#allocation3 + $0xa0] sm:$0xff] %vm279_vm0, %v7994_v60  ;;  %v3030_v39 = vld [vmem:[#allocation2 + $0x99] sm:$0xff] }
 0x2e4   : > { %v2913_v32 = vadd.f32 %v7812_v20, %v2874_v4  ;;  %v6274_v63 = vpop.f32.mrb[26].mxu0  ;;  %v3222_v8 = vld [vmem:[#allocation2 + $0x9a] sm:$0xff]  ;;  %v3032_v4 = vld [vmem:[#allocation2 + $0xb1] sm:$0xff] }
 0x2e5   : > { %2946 = vst.msk [vmem:[#allocation2 + $0x141] sm:$0xff] %vm279_vm0, %v2914_v47  ;;  %v2877_v7 = vmul.f32 %v6274_v63, %v7807_v35  ;;  %3765 = vrot.lane.b32.xlu0 %v3216_v22, %s6623_s9  ;;  %v2782_v54 = vpop.f32.mrb[27].mxu0  ;;  %v8004_v41 = vld [vmem:[#allocation2 + $0x108] sm:$0xff]  ;;  %v8010_v23 = vld [vmem:[#allocation2 + $0x110] sm:$0xff] }
 0x2e6   : > { %3099 = vrot.lane.b32.xlu1 %v3026_v10, %s6622_s8  ;;  %2945 = vst.msk [vmem:[#allocation2 + $0x139] sm:$0xff] %vm279_vm0, %v2913_v32  ;;  %v2876_v43 = vmul.f32 %v7807_v35, %v2782_v54  ;;  %3007 = vst.msk [vmem:[#allocation3 + $0xb0] sm:$0xff] %vm279_vm0, %v8004_v41  ;;  %v3221_v47 = vld [vmem:[#allocation2 + $0x92] sm:$0xff]  ;;  %v3031_v63 = vld [vmem:[#allocation2 + $0xa9] sm:$0xff] }
 0x2e7   : > { %v2916_v59 = vadd.f32 %v7812_v20, %v2877_v7  ;;  %3008 = vst.msk [vmem:[#allocation3 + $0xb8] sm:$0xff] %vm279_vm0, %v8010_v23  ;;  %v3224_v32 = vld [vmem:[#allocation2 + $0xb2] sm:$0xff]  ;;  %v3223_v7 = vld [vmem:[#allocation2 + $0xaa] sm:$0xff] }
 0x2e8   : > { %v2915_v1 = vadd.f32 %v7812_v20, %v2876_v43  ;;  %v6277_v18 = vpop.f32.mrb[28].mxu0  ;;  %v3226_v54 = vld [vmem:[#allocation2 + $0xca] sm:$0xff] }
 0x2e9   : > { %2948 = vst.msk [vmem:[#allocation2 + $0x159] sm:$0xff] %vm279_vm0, %v2916_v59  ;;  %v2879_v26 = vmul.f32 %v6277_v18, %v7807_v35  ;;  %3285 = vrot.lane.b32.xlu0 %v8016_v6, %s6623_s9  ;;  %v2792_v42 = vpop.f32.mrb[29].mxu0  ;;  %v8023_v62 = vld [vmem:[#allocation2 + $0x120] sm:$0xff]  ;;  %v8029_v49 = vld [vmem:[#allocation2 + $0x128] sm:$0xff] }
 0x2ea   : > { %3291 = vrot.lane.b32.xlu1 %v3218_v9, %s6623_s9  ;;  %2947 = vst.msk [vmem:[#allocation2 + $0x151] sm:$0xff] %vm279_vm0, %v2915_v1  ;;  %v2878_v3 = vmul.f32 %v7807_v35, %v2792_v42  ;;  %3009 = vst.msk [vmem:[#allocation3 + $0xc0] sm:$0xff] %vm279_vm0, %v8023_v62  ;;  %v3033_v1 = vld [vmem:[#allocation2 + $0xc1] sm:$0xff] }
 0x2eb   : > { %v2918_v56 = vadd.f32 %v7812_v20, %v2879_v26  ;;  %3010 = vst.msk [vmem:[#allocation3 + $0xc8] sm:$0xff] %vm279_vm0, %v8029_v49  ;;  %v8131_v26 = vld [vmem:[#allocation2 + $0xe1] sm:$0xff] }
 0x2ec   : > { %v2917_v58 = vadd.f32 %v7812_v20, %v2878_v3  ;;  %v6280_v0 = vpop.f32.mrb[30].mxu0 }
 0x2ed   : > { %2950 = vst.msk [vmem:[#allocation2 + $0x171] sm:$0xff] %vm279_vm0, %v2918_v56  ;;  %v2881_v2 = vmul.f32 %v6280_v0, %v7807_v35  ;;  %3571 = vrot.lane.b32.xlu0 %v3023_v33, %s6622_s8  ;;  %v2802_v44 = vpop.f32.mrb[31].mxu0  ;;  %v8039_v22 = vld [vmem:[#allocation2 + $0x138] sm:$0xff]  ;;  %v8045_v24 = vld [vmem:[#allocation2 + $0x140] sm:$0xff] }
 0x2ee   : > { %3577 = vrot.lane.b32.xlu1 %v3026_v10, %s6622_s8  ;;  %2949 = vst.msk [vmem:[#allocation2 + $0x169] sm:$0xff] %vm279_vm0, %v2917_v58  ;;  %v2880_v34 = vmul.f32 %v7807_v35, %v2802_v44  ;;  %3011 = vst.msk [vmem:[#allocation3 + $0xd0] sm:$0xff] %vm279_vm0, %v8039_v22  ;;  %v8097_v33 = vld [vmem:[#allocation2 + $0x7a] sm:$0xff]  ;;  %v3034_v10 = vld [vmem:[#allocation2 + $0xc9] sm:$0xff] }
 0x2ef   : > { %v2920_v14 = vadd.f32 %v7812_v20, %v2881_v2  ;;  %3012 = vst.msk [vmem:[#allocation3 + $0xd8] sm:$0xff] %vm279_vm0, %v8045_v24  ;;  %v8138_v56 = vld [vmem:[#allocation2 + $0xc2] sm:$0xff] }
 0x2f0   : > { %v2919_v55 = vadd.f32 %v7812_v20, %v2880_v34  ;;  %v8067_v20 = vld [vmem:[#allocation2 + $0x81] sm:$0xff]  ;;  %v8151_v34 = vld [vmem:[#allocation2 + $0xd9] sm:$0xff] }
 0x2f1   : > { %2952 = vst.msk [vmem:[#allocation2 + $0x189] sm:$0xff] %vm279_vm0, %v2920_v14  ;;  %3763 = vrot.lane.b32.xlu0 %v8016_v6, %s6623_s9  ;;  %v8058_v35 = vld [vmem:[#allocation2 + $0x150] sm:$0xff]  ;;  %v8063_v57 = vld [vmem:[#allocation2 + $0x158] sm:$0xff]  ;;  %v8140_v58 = vld [vmem:[#allocation2 + $0xe2] sm:$0xff] }
 0x2f2   : > { %3097 = vrot.lane.b32.xlu1 %v8051_v36, %s6622_s8  ;;  %2951 = vst.msk [vmem:[#allocation2 + $0x181] sm:$0xff] %vm279_vm0, %v2919_v55  ;;  %3013 = vst.msk [vmem:[#allocation3 + $0xe0] sm:$0xff] %vm279_vm0, %v8058_v35 }
 0x2f3   : > { %3014 = vst.msk [vmem:[#allocation3 + $0xe8] sm:$0xff] %vm279_vm0, %v8063_v57 }
 0x2f5   : > { %3769 = vrot.lane.b32.xlu0 %v3218_v9, %s6623_s9  ;;  %v8072_v52 = vld [vmem:[#allocation2 + $0x168] sm:$0xff]  ;;  %v8076_v40 = vld [vmem:[#allocation2 + $0x170] sm:$0xff] }
 0x2f6   : > { %3103 = vrot.lane.b32.xlu1 %v8067_v20, %s6622_s8  ;;  %3015 = vst.msk [vmem:[#allocation3 + $0xf0] sm:$0xff] %vm279_vm0, %v8072_v52  ;;  %3016 = vst.msk [vmem:[#allocation3 + $0xf8] sm:$0xff] %vm279_vm0, %v8076_v40 }
 0x2f9   : > { %3289 = vrot.lane.b32.xlu0 %v8080_v19, %s6623_s9 }
 0x2fa   : > { %3295 = vrot.lane.b32.xlu1 %v3220_v11, %s6623_s9 }
 0x2fd   : > { %3575 = vrot.lane.b32.xlu0 %v8051_v36, %s6622_s8 }
 0x2fe   : > { %3581 = vrot.lane.b32.xlu1 %v8067_v20, %s6622_s8 }
 0x301   : > { %3767 = vrot.lane.b32.xlu0 %v8080_v19, %s6623_s9 }
 0x302   : > { %3101 = vrot.lane.b32.xlu1 %v8089_v25, %s6622_s8 }
 0x305   : > { %3773 = vrot.lane.b32.xlu0 %v3220_v11, %s6623_s9 }
 0x306   : > { %3107 = vrot.lane.b32.xlu1 %v3030_v39, %s6622_s8 }
 0x309   : > { %3293 = vrot.lane.b32.xlu0 %v8097_v33, %s6623_s9 }
 0x30a   : > { %3299 = vrot.lane.b32.xlu1 %v3222_v8, %s6623_s9 }
 0x30d   : > { %3579 = vrot.lane.b32.xlu0 %v8089_v25, %s6622_s8 }
 0x30e   : > { %3585 = vrot.lane.b32.xlu1 %v3030_v39, %s6622_s8  ;;  %v8162_v39 = vld [vmem:[#allocation2 + $0xf9] sm:$0xff] }
 0x311   : > { %3771 = vrot.lane.b32.xlu0 %v8097_v33, %s6623_s9 }
 0x312   : > { %3105 = vrot.lane.b32.xlu1 %v8105_v46, %s6622_s8 }
 0x315   : > { %3777 = vrot.lane.b32.xlu0 %v3222_v8, %s6623_s9 }
 0x316   : > { %3111 = vrot.lane.b32.xlu1 %v3032_v4, %s6622_s8 }
 0x319   : > { %3297 = vrot.lane.b32.xlu0 %v3221_v47, %s6623_s9 }
 0x31a   : > { %3303 = vrot.lane.b32.xlu1 %v3224_v32, %s6623_s9 }
 0x31d   : > { %3583 = vrot.lane.b32.xlu0 %v8105_v46, %s6622_s8 }
 0x31e   : > { %3589 = vrot.lane.b32.xlu1 %v3032_v4, %s6622_s8 }
 0x321   : > { %3775 = vrot.lane.b32.xlu0 %v3221_v47, %s6623_s9 }
 0x322   : > { %3109 = vrot.lane.b32.xlu1 %v3031_v63, %s6622_s8 }
 0x325   : > { %3781 = vrot.lane.b32.xlu0 %v3224_v32, %s6623_s9  ;;  %v8172_v32 = vld [vmem:[#allocation2 + $0xda] sm:$0xff] }
 0x326   : > { %3115 = vrot.lane.b32.xlu1 %v3034_v10, %s6622_s8 }
 0x329   : > { %3301 = vrot.lane.b32.xlu0 %v3223_v7, %s6623_s9 }
 0x32a   : > { %3307 = vrot.lane.b32.xlu1 %v3226_v54, %s6623_s9 }
 0x32d   : > { %3587 = vrot.lane.b32.xlu0 %v3031_v63, %s6622_s8  ;;  %v8174_v63 = vld [vmem:[#allocation2 + $0xfa] sm:$0xff] }
 0x32e   : > { %3593 = vrot.lane.b32.xlu1 %v3034_v10, %s6622_s8 }
 0x32f   : > { %v3758_v43 = vpop.permute.xlu0 %3757 }
 0x330   : > { %v3088_v59 = vpop.permute.xlu1 %3087 }
 0x331   : > { %3180 = vst.msk [vmem:[#allocation3 + $0x18] sm:$0xff] %vm610_vm6, %v3088_v59  ;;  %3779 = vrot.lane.b32.xlu0 %v3223_v7, %s6623_s9  ;;  %v8186_v59 = vld [vmem:[#allocation2 + $0xf2] sm:$0xff] }
 0x332   : > { %3113 = vrot.lane.b32.xlu1 %v3033_v1, %s6622_s8 }
 0x333   : > { %v3086_v9 = vpop.permute.xlu0 %3085 }
 0x334   : > { %v3280_v18 = vpop.permute.xlu1 %3279  ;;  %3179 = vst.msk [vmem:[#allocation3 + $0x10] sm:$0xff] %vm610_vm6, %v3086_v9 }
 0x335   : > { %3372 = vst.msk [vmem:[#allocation3 + $0x18] sm:$0xff] %vm803_vm7, %v3280_v18  ;;  %3785 = vrot.lane.b32.xlu0 %v3226_v54, %s6623_s9 }
 0x336   : > { %3119 = vrot.lane.b32.xlu1 %v8131_v26, %s6622_s8 }
 0x337   : > { %v3278_v3 = vpop.permute.xlu0 %3277 }
 0x338   : > { %v3566_v42 = vpop.permute.xlu1 %3565  ;;  %3371 = vst.msk [vmem:[#allocation3 + $0x10] sm:$0xff] %vm803_vm7, %v3278_v3 }
 0x339   : > { %3660 = vst.msk [vmem:[#allocation3 + $0x8] sm:$0xff] %vm610_vm6, %v3566_v42  ;;  %3305 = vrot.lane.b32.xlu0 %v8138_v56, %s6623_s9 }
 0x33a   : > { %3852 = vst.msk [vmem:[#allocation3 + $0x8] sm:$0xff] %vm803_vm7, %v3758_v43  ;;  %3311 = vrot.lane.b32.xlu1 %v8140_v58, %s6623_s9  ;;  %v4566_v43 = vld [vmem:[#allocation2 + $0x30] sm:$0xff] }
 0x33b   : > { %v3564_v0 = vpop.permute.xlu0 %3563 }
 0x33c   : > { %v3092_v2 = vpop.permute.xlu1 %3091  ;;  %v8147_v44 = vld [vmem:[#allocation3 + $0x18] sm:$0xff]  ;;  %3659 = vst.msk [vmem:[#allocation3] sm:$0xff] %vm610_vm6, %v3564_v0 }
 0x33d   : > { %9128 = vst [vmem:[#allocation4_spill] sm:$0xff] %v8147_v44  ;;  %3182 = vst.msk [vmem:[#allocation3 + $0x28] sm:$0xff] %vm610_vm6, %v3092_v2  ;;  %3591 = vrot.lane.b32.xlu0 %v3033_v1, %s6622_s8  ;;  %v8194_v1 = vld [vmem:[#allocation2 + $0xf1] sm:$0xff]  ;;  %v8209_v2 = vld [vmem:[#allocation2 + $0x109] sm:$0xff] }
 0x33e   : > { %3470 = vst.msk [vmem:[#allocation3 + $0x18] sm:$0xff] %vm279_vm0, %v7850_v51  ;;  %3117 = vrot.lane.b32.xlu1 %v8151_v34, %s6622_s8  ;;  %v4567_v51 = vld [vmem:[#allocation2 + $0x38] sm:$0xff] }
 0x33f   : > { %v3756_v14 = vpop.permute.xlu0 %3755  ;;  %v8158_v11 = vld [vmem:[#allocation3 + $0x10] sm:$0xff] }
 0x340   : > { %v3284_v55 = vpop.permute.xlu1 %3283  ;;  %3851 = vst.msk [vmem:[#allocation3] sm:$0xff] %vm803_vm7, %v3756_v14 }
 0x341   : > { %3374 = vst.msk [vmem:[#allocation3 + $0x28] sm:$0xff] %vm803_vm7, %v3284_v55  ;;  %v3884_v8 = vld [vmem:[#allocation3 + $0x8] sm:$0xff]  ;;  %3783 = vrot.lane.b32.xlu0 %v8138_v56, %s6623_s9 }
 0x342   : > { %3469 = vst.msk [vmem:[#allocation3 + $0x10] sm:$0xff] %vm279_vm0, %v7856_v15  ;;  %3123 = vrot.lane.b32.xlu1 %v8162_v39, %s6622_s8  ;;  %4599 = vst.msk [vmem:[#allocation3 + $0x8] sm:$0xff] %vm279_vm0, %v4567_v51 }
 0x343   : > { %v3762_v4 = vpop.permute.xlu0 %3761 }
 0x344   : > { %v3570_v47 = vpop.permute.xlu1 %3569 }
 0x345   : > { %3662 = vst.msk [vmem:[#allocation3 + $0x18] sm:$0xff] %vm610_vm6, %v3570_v47  ;;  %3309 = vrot.lane.b32.xlu0 %v8172_v32, %s6623_s9 }
 0x346   : > { %3854 = vst.msk [vmem:[#allocation3 + $0x18] sm:$0xff] %vm803_vm7, %v3762_v4  ;;  %3315 = vrot.lane.b32.xlu1 %v8174_v63, %s6623_s9 }
 0x347   : > { %v3090_v15 = vpop.permute.xlu0 %3089  ;;  %v3883_v7 = vld [vmem:[#allocation3] sm:$0xff] }
 0x348   : > { %v3096_v10 = vpop.permute.xlu1 %3095  ;;  %v8181_v54 = vld [vmem:[#allocation3 + $0x28] sm:$0xff]  ;;  %3181 = vst.msk [vmem:[#allocation3 + $0x20] sm:$0xff] %vm610_vm6, %v3090_v15  ;;  %6285 = vmatprep.mubr.msk.f32.mxu1 %vm1353_vm8, %v3883_v7  ;;  %v8231_v15 = vld [vmem:[#allocation2 + $0x10a] sm:$0xff] }
 0x349   : > { %9129 = vst [vmem:[#allocation5_spill] sm:$0xff] %v8181_v54  ;;  %3184 = vst.msk [vmem:[#allocation3 + $0x38] sm:$0xff] %vm610_vm6, %v3096_v10  ;;  %6286 = vmatmul.mubr.msk.f32.vlgmr.msra.gmra.mrb[0].mxu1 %vm1353_vm8, %v3884_v8  ;;  %3313 = vrot.lane.b32.xlu0 %v8186_v59, %s6623_s9  ;;  %v4568_v7 = vld [vmem:[#allocation2 + $0x48] sm:$0xff]  ;;  %v4630_v54 = vld [vmem:[#allocation2 + $0x31] sm:$0xff] }
 0x34a   : > { %3472 = vst.msk [vmem:[#allocation3 + $0x28] sm:$0xff] %vm279_vm0, %v7872_v30  ;;  %4598 = vst.msk [vmem:[#allocation3] sm:$0xff] %vm279_vm0, %v4566_v43  ;;  %3121 = vrot.lane.b32.xlu1 %v8194_v1, %s6622_s8  ;;  %v4569_v30 = vld [vmem:[#allocation2 + $0x50] sm:$0xff] }
 0x34b   : > { %v3282_v18 = vpop.permute.xlu0 %3281 }
 0x34c   : > { %v3288_v9 = vpop.permute.xlu1 %3287  ;;  %3373 = vst.msk [vmem:[#allocation3 + $0x20] sm:$0xff] %vm803_vm7, %v3282_v18 }
 0x34d   : > { %3376 = vst.msk [vmem:[#allocation3 + $0x38] sm:$0xff] %vm803_vm7, %v3288_v9  ;;  %v3886_v42 = vld [vmem:[#allocation3 + $0x18] sm:$0xff]  ;;  %3595 = vrot.lane.b32.xlu0 %v8151_v34, %s6622_s8 }
 0x34e   : > { %4601 = vst.msk [vmem:[#allocation3 + $0x18] sm:$0xff] %vm279_vm0, %v4569_v30  ;;  %3597 = vrot.lane.b32.xlu1 %v8131_v26, %s6622_s8  ;;  %v8225_v26 = vld [vmem:[#allocation2 + $0x111] sm:$0xff]  ;;  %v4571_v30 = vld [vmem:[#allocation2 + $0x68] sm:$0xff] }
 0x34f   : > { %v3568_v3 = vpop.permute.xlu0 %3567 }
 0x350   : > { %v3574_v0 = vpop.permute.xlu1 %3573  ;;  %3661 = vst.msk [vmem:[#allocation3 + $0x10] sm:$0xff] %vm610_vm6, %v3568_v3 }
 0x351   : > { %3664 = vst.msk [vmem:[#allocation3 + $0x28] sm:$0xff] %vm610_vm6, %v3574_v0  ;;  %3787 = vrot.lane.b32.xlu0 %v8172_v32, %s6623_s9 }
 0x352   : > { %3125 = vrot.lane.b32.xlu1 %v8209_v2, %s6622_s8 }
 0x353   : > { %v3760_v14 = vpop.permute.xlu0 %3759  ;;  %v8213_v8 = vld [vmem:[#allocation3 + $0x20] sm:$0xff] }
 0x354   : > { %v3094_v55 = vpop.permute.xlu1 %3093  ;;  %9130 = vst [vmem:[#allocation6_spill] sm:$0xff] %v8213_v8  ;;  %v8215_v51 = vld [vmem:[#allocation3 + $0x38] sm:$0xff]  ;;  %3853 = vst.msk [vmem:[#allocation3 + $0x10] sm:$0xff] %vm803_vm7, %v3760_v14 }
 0x355   : > { %9131 = vst [vmem:[#allocation7_spill] sm:$0xff] %v8215_v51  ;;  %3183 = vst.msk [vmem:[#allocation3 + $0x30] sm:$0xff] %vm610_vm6, %v3094_v55  ;;  %3789 = vrot.lane.b32.xlu0 %v8140_v58, %s6623_s9  ;;  %v8269_v55 = vld [vmem:[#allocation2 + $0x129] sm:$0xff] }
 0x356   : > { %3471 = vst.msk [vmem:[#allocation3 + $0x20] sm:$0xff] %vm279_vm0, %v7880_v12  ;;  %3474 = vst.msk [vmem:[#allocation3 + $0x38] sm:$0xff] %vm279_vm0, %v7892_v5  ;;  %3127 = vrot.lane.b32.xlu1 %v8225_v26, %s6622_s8  ;;  %v8235_v12 = vld [vmem:[#allocation2 + $0x112] sm:$0xff]  ;;  %v4579_v51 = vld [vmem:[#allocation2 + $0xc8] sm:$0xff] }
 0x357   : > { %v3766_v4 = vpop.permute.xlu0 %3765 }
 0x358   : > { %v3100_v47 = vpop.permute.xlu1 %3099  ;;  %3856 = vst.msk [vmem:[#allocation3 + $0x28] sm:$0xff] %vm803_vm7, %v3766_v4 }
 0x359   : > { %3186 = vst.msk [vmem:[#allocation3 + $0x48] sm:$0xff] %vm610_vm6, %v3100_v47  ;;  %3317 = vrot.lane.b32.xlu0 %v8231_v15, %s6623_s9 }
 0x35a   : > { %3319 = vrot.lane.b32.xlu1 %v8235_v12, %s6623_s9 }
 0x35b   : > { %v3286_v5 = vpop.permute.xlu0 %3285  ;;  %v3885_v10 = vld [vmem:[#allocation3 + $0x10] sm:$0xff] }
 0x35c   : > { %v3292_v58 = vpop.permute.xlu1 %3291  ;;  %3375 = vst.msk [vmem:[#allocation3 + $0x30] sm:$0xff] %vm803_vm7, %v3286_v5  ;;  %6288 = vmatprep.mubr.msk.f32.mxu1 %vm1353_vm8, %v3885_v10  ;;  %v8275_v5 = vld [vmem:[#allocation2 + $0x122] sm:$0xff] }
 0x35d   : > { %3378 = vst.msk [vmem:[#allocation3 + $0x48] sm:$0xff] %vm803_vm7, %v3292_v58  ;;  %6289 = vmatmul.mubr.msk.f32.gmra.mrb[2].mxu1 %vm1353_vm8, %v3886_v42  ;;  %3599 = vrot.lane.b32.xlu0 %v8194_v1, %s6622_s8  ;;  %v8253_v42 = vld [vmem:[#allocation2 + $0x121] sm:$0xff] }
 0x35e   : > { %4600 = vst.msk [vmem:[#allocation3 + $0x10] sm:$0xff] %vm279_vm0, %v4568_v7  ;;  %3601 = vrot.lane.b32.xlu1 %v8162_v39, %s6622_s8  ;;  %v4570_v10 = vld [vmem:[#allocation2 + $0x60] sm:$0xff] }
 0x35f   : > { %v3572_v43 = vpop.permute.xlu0 %3571  ;;  %v3888_v9 = vld [vmem:[#allocation3 + $0x28] sm:$0xff] }
 0x360   : > { %v3578_v18 = vpop.permute.xlu1 %3577  ;;  %3663 = vst.msk [vmem:[#allocation3 + $0x20] sm:$0xff] %vm610_vm6, %v3572_v43 }
 0x361   : > { %3666 = vst.msk [vmem:[#allocation3 + $0x38] sm:$0xff] %vm610_vm6, %v3578_v18  ;;  %3791 = vrot.lane.b32.xlu0 %v8186_v59, %s6623_s9 }
 0x362   : > { %4603 = vst.msk [vmem:[#allocation3 + $0x28] sm:$0xff] %vm279_vm0, %v4571_v30  ;;  %3129 = vrot.lane.b32.xlu1 %v8253_v42, %s6622_s8  ;;  %v4573_v30 = vld [vmem:[#allocation2 + $0x80] sm:$0xff] }
 0x363   : > { %v3764_v3 = vpop.permute.xlu0 %3763  ;;  %v8257_v0 = vld [vmem:[#allocation3 + $0x30] sm:$0xff] }
 0x364   : > { %v3098_v39 = vpop.permute.xlu1 %3097  ;;  %9132 = vst [vmem:[#allocation8_spill] sm:$0xff] %v8257_v0  ;;  %v8259_v14 = vld [vmem:[#allocation3 + $0x48] sm:$0xff]  ;;  %3855 = vst.msk [vmem:[#allocation3 + $0x20] sm:$0xff] %vm803_vm7, %v3764_v3  ;;  %v3433_v3 = vld [vmem:[%s9109_s4] sm:$0xff] }
 0x365   : > { %9133 = vst [vmem:[#allocation9_spill] sm:$0xff] %v8259_v14  ;;  %3185 = vst.msk [vmem:[#allocation3 + $0x40] sm:$0xff] %vm610_vm6, %v3098_v39  ;;  %3793 = vrot.lane.b32.xlu0 %v8174_v63, %s6623_s9  ;;  %v3434_v39 = vld [vmem:[%s9109_s4 + $0x8] sm:$0xf]  ;;  %v4577_v14 = vld [vmem:[#allocation2 + $0xb0] sm:$0xff] }
 0x366   : > { %3473 = vst.msk [vmem:[#allocation3 + $0x30] sm:$0xff] %vm279_vm0, %v7898_v13  ;;  %3476 = vst.msk [vmem:[#allocation3 + $0x48] sm:$0xff] %vm279_vm0, %v7908_v38  ;;  %3131 = vrot.lane.b32.xlu1 %v8269_v55, %s6622_s8  ;;  %v8279_v13 = vld [vmem:[#allocation2 + $0x12a] sm:$0xff] }
 0x367   : > { %v3770_v4 = vpop.permute.xlu0 %3769 }
 0x368   : > { %v3104_v47 = vpop.permute.xlu1 %3103  ;;  %3858 = vst.msk [vmem:[#allocation3 + $0x38] sm:$0xff] %vm803_vm7, %v3770_v4  ;;  %v6461_v4 = vpack.c.bf16 %v3434_v39, %v3433_v3 }
 0x369   : > { %3188 = vst.msk [vmem:[#allocation3 + $0x58] sm:$0xff] %vm610_vm6, %v3104_v47  ;;  %3321 = vrot.lane.b32.xlu0 %v8275_v5, %s6623_s9 }
 0x36a   : > { %3323 = vrot.lane.b32.xlu1 %v8279_v13, %s6623_s9  ;;  %6463 = vmatprep.subr.msk.bf16.mxu1 %vm6814_vm5, %v6461_v4 }
 0x36b   : > { %v3290_v38 = vpop.permute.xlu0 %3289  ;;  %v3887_v58 = vld [vmem:[#allocation3 + $0x20] sm:$0xff]  ;;  %6466 = vmatpush3.bf16.msk.msra.mxu1 %vm6814_vm5, %v6461_v4  ;;  %v4572_v4 = vld [vmem:[#allocation2 + $0x78] sm:$0xff] }
 0x36c   : > { %v3296_v63 = vpop.permute.xlu1 %3295  ;;  %3377 = vst.msk [vmem:[#allocation3 + $0x40] sm:$0xff] %vm803_vm7, %v3290_v38  ;;  %6291 = vmatprep.mubr.msk.f32.mxu1 %vm1353_vm8, %v3887_v58 }
 0x36d   : > { %3380 = vst.msk [vmem:[#allocation3 + $0x58] sm:$0xff] %vm803_vm7, %v3296_v63  ;;  %6292 = vmatmul.mubr.msk.f32.gmra.mrb[4].mxu1 %vm1353_vm8, %v3888_v9  ;;  %3603 = vrot.lane.b32.xlu0 %v8209_v2, %s6622_s8  ;;  %v8297_v9 = vld [vmem:[#allocation2 + $0x139] sm:$0xff] }
 0x36e   : > { %4602 = vst.msk [vmem:[#allocation3 + $0x20] sm:$0xff] %vm279_vm0, %v4570_v10  ;;  %3605 = vrot.lane.b32.xlu1 %v8225_v26, %s6622_s8  ;;  %v8321_v10 = vld [vmem:[#allocation2 + $0x141] sm:$0xff] }
 0x36f   : > { %v3576_v7 = vpop.permute.xlu0 %3575  ;;  %v3890_v18 = vld [vmem:[#allocation3 + $0x38] sm:$0xff] }
 0x370   : > { %v3582_v43 = vpop.permute.xlu1 %3581  ;;  %3665 = vst.msk [vmem:[#allocation3 + $0x30] sm:$0xff] %vm610_vm6, %v3576_v7 }
 0x371   : > { %3668 = vst.msk [vmem:[#allocation3 + $0x48] sm:$0xff] %vm610_vm6, %v3582_v43  ;;  %3795 = vrot.lane.b32.xlu0 %v8231_v15, %s6623_s9 }
 0x372   : > { %4605 = vst.msk [vmem:[#allocation3 + $0x38] sm:$0xff] %vm279_vm0, %v4573_v30  ;;  %3133 = vrot.lane.b32.xlu1 %v8297_v9, %s6622_s8 }
 0x373   : > { %v3768_v47 = vpop.permute.xlu0 %3767  ;;  %v8307_v63 = vld [vmem:[#allocation3 + $0x40] sm:$0xff] }
 0x374   : > { %v3102_v38 = vpop.permute.xlu1 %3101  ;;  %9134 = vst [vmem:[#allocation10_spill] sm:$0xff] %v8307_v63  ;;  %v8309_v58 = vld [vmem:[#allocation3 + $0x58] sm:$0xff]  ;;  %3857 = vst.msk [vmem:[#allocation3 + $0x30] sm:$0xff] %vm803_vm7, %v3768_v47 }
 0x375   : > { %9135 = vst [vmem:[#allocation11_spill] sm:$0xff] %v8309_v58  ;;  %3187 = vst.msk [vmem:[#allocation3 + $0x50] sm:$0xff] %vm610_vm6, %v3102_v38  ;;  %3797 = vrot.lane.b32.xlu0 %v8235_v12, %s6623_s9  ;;  %v4574_v58 = vld [vmem:[#allocation2 + $0x90] sm:$0xff] }
 0x376   : > { %3475 = vst.msk [vmem:[#allocation3 + $0x40] sm:$0xff] %vm279_vm0, %v7914_v29  ;;  %3478 = vst.msk [vmem:[#allocation3 + $0x58] sm:$0xff] %vm279_vm0, %v7924_v53  ;;  %3135 = vrot.lane.b32.xlu1 %v8321_v10, %s6622_s8  ;;  %v8329_v29 = vld [vmem:[#allocation2 + $0x13a] sm:$0xff]  ;;  %v8333_v53 = vld [vmem:[#allocation2 + $0x142] sm:$0xff] }
 0x377   : > { %v3774_v7 = vpop.permute.xlu0 %3773 }
 0x378   : > { %v3108_v43 = vpop.permute.xlu1 %3107  ;;  %3860 = vst.msk [vmem:[#allocation3 + $0x48] sm:$0xff] %vm803_vm7, %v3774_v7 }
 0x379   : > { %3190 = vst.msk [vmem:[#allocation3 + $0x68] sm:$0xff] %vm610_vm6, %v3108_v43  ;;  %3325 = vrot.lane.b32.xlu0 %v8329_v29, %s6623_s9  ;;  %v4575_v43 = vld [vmem:[#allocation2 + $0x98] sm:$0xff] }
 0x37a   : > { %3327 = vrot.lane.b32.xlu1 %v8333_v53, %s6623_s9 }
 0x37b   : > { %v3294_v30 = vpop.permute.xlu0 %3293  ;;  %v3889_v39 = vld [vmem:[#allocation3 + $0x30] sm:$0xff] }
 0x37c   : > { %v3300_v3 = vpop.permute.xlu1 %3299  ;;  %3379 = vst.msk [vmem:[#allocation3 + $0x50] sm:$0xff] %vm803_vm7, %v3294_v30  ;;  %6294 = vmatprep.mubr.msk.f32.mxu1 %vm1353_vm8, %v3889_v39 }
 0x37d   : > { %3382 = vst.msk [vmem:[#allocation3 + $0x68] sm:$0xff] %vm803_vm7, %v3300_v3  ;;  %6295 = vmatmul.mubr.msk.f32.gmra.mrb[6].mxu1 %vm1353_vm8, %v3890_v18  ;;  %3607 = vrot.lane.b32.xlu0 %v8253_v42, %s6622_s8  ;;  %v8351_v18 = vld [vmem:[#allocation2 + $0x151] sm:$0xff] }
 0x37e   : > { %4604 = vst.msk [vmem:[#allocation3 + $0x30] sm:$0xff] %vm279_vm0, %v4572_v4  ;;  %3609 = vrot.lane.b32.xlu1 %v8269_v55, %s6622_s8 }
 0x37f   : > { %v3580_v47 = vpop.permute.xlu0 %3579  ;;  %v3892_v7 = vld [vmem:[#allocation3 + $0x48] sm:$0xff] }
 0x380   : > { %v3586_v38 = vpop.permute.xlu1 %3585  ;;  %3667 = vst.msk [vmem:[#allocation3 + $0x40] sm:$0xff] %vm610_vm6, %v3580_v47  ;;  %v8367_v47 = vld [vmem:[#allocation2 + $0x159] sm:$0xff] }
 0x381   : > { %3670 = vst.msk [vmem:[#allocation3 + $0x58] sm:$0xff] %vm610_vm6, %v3586_v38  ;;  %3799 = vrot.lane.b32.xlu0 %v8275_v5, %s6623_s9 }
 0x382   : > { %4607 = vst.msk [vmem:[#allocation3 + $0x48] sm:$0xff] %vm279_vm0, %v4575_v43  ;;  %3137 = vrot.lane.b32.xlu1 %v8351_v18, %s6622_s8 }
 0x383   : > { %v3772_v30 = vpop.permute.xlu0 %3771  ;;  %v8355_v39 = vld [vmem:[#allocation3 + $0x50] sm:$0xff] }
 0x384   : > { %v3106_v3 = vpop.permute.xlu1 %3105  ;;  %9136 = vst [vmem:[#allocation12_spill] sm:$0xff] %v8355_v39  ;;  %v8357_v4 = vld [vmem:[#allocation3 + $0x68] sm:$0xff]  ;;  %3859 = vst.msk [vmem:[#allocation3 + $0x40] sm:$0xff] %vm803_vm7, %v3772_v30 }
 0x385   : > { %9137 = vst [vmem:[#allocation13_spill] sm:$0xff] %v8357_v4  ;;  %3189 = vst.msk [vmem:[#allocation3 + $0x60] sm:$0xff] %vm610_vm6, %v3106_v3  ;;  %3801 = vrot.lane.b32.xlu0 %v8279_v13, %s6623_s9  ;;  %v8373_v30 = vld [vmem:[#allocation2 + $0x152] sm:$0xff] }
 0x386   : > { %3477 = vst.msk [vmem:[#allocation3 + $0x50] sm:$0xff] %vm279_vm0, %v7930_v31  ;;  %3480 = vst.msk [vmem:[#allocation3 + $0x68] sm:$0xff] %vm279_vm0, %v7940_v17  ;;  %3139 = vrot.lane.b32.xlu1 %v8367_v47, %s6622_s8  ;;  %v8377_v31 = vld [vmem:[#allocation2 + $0x15a] sm:$0xff] }
 0x387   : > { %v3778_v38 = vpop.permute.xlu0 %3777 }
 0x388   : > { %v3112_v43 = vpop.permute.xlu1 %3111  ;;  %3862 = vst.msk [vmem:[#allocation3 + $0x58] sm:$0xff] %vm803_vm7, %v3778_v38 }
 0x389   : > { %3192 = vst.msk [vmem:[#allocation3 + $0x78] sm:$0xff] %vm610_vm6, %v3112_v43  ;;  %3329 = vrot.lane.b32.xlu0 %v8373_v30, %s6623_s9 }
 0x38a   : > { %3331 = vrot.lane.b32.xlu1 %v8377_v31, %s6623_s9 }
 0x38b   : > { %v3298_v17 = vpop.permute.xlu0 %3297  ;;  %v3891_v4 = vld [vmem:[#allocation3 + $0x40] sm:$0xff] }
 0x38c   : > { %v3304_v3 = vpop.permute.xlu1 %3303  ;;  %3381 = vst.msk [vmem:[#allocation3 + $0x60] sm:$0xff] %vm803_vm7, %v3298_v17  ;;  %6297 = vmatprep.mubr.msk.f32.mxu1 %vm1353_vm8, %v3891_v4 }
 0x38d   : > { %3384 = vst.msk [vmem:[#allocation3 + $0x78] sm:$0xff] %vm803_vm7, %v3304_v3  ;;  %6298 = vmatmul.mubr.msk.f32.gmra.mrb[8].mxu1 %vm1353_vm8, %v3892_v7  ;;  %3611 = vrot.lane.b32.xlu0 %v8297_v9, %s6622_s8 }
 0x38e   : > { %4606 = vst.msk [vmem:[#allocation3 + $0x40] sm:$0xff] %vm279_vm0, %v4574_v58  ;;  %3613 = vrot.lane.b32.xlu1 %v8321_v10, %s6622_s8  ;;  %v8395_v58 = vld [vmem:[#allocation2 + $0x169] sm:$0xff] }
 0x38f   : > { %v3584_v38 = vpop.permute.xlu0 %3583  ;;  %v3894_v39 = vld [vmem:[#allocation3 + $0x58] sm:$0xff] }
 0x390   : > { %v3590_v43 = vpop.permute.xlu1 %3589  ;;  %3669 = vst.msk [vmem:[#allocation3 + $0x50] sm:$0xff] %vm610_vm6, %v3584_v38 }
 0x391   : > { %3672 = vst.msk [vmem:[#allocation3 + $0x68] sm:$0xff] %vm610_vm6, %v3590_v43  ;;  %3803 = vrot.lane.b32.xlu0 %v8329_v29, %s6623_s9 }
 0x392   : > { %4609 = vst.msk [vmem:[#allocation3 + $0x58] sm:$0xff] %vm279_vm0, %v4577_v14  ;;  %3141 = vrot.lane.b32.xlu1 %v8395_v58, %s6622_s8  ;;  %v8411_v14 = vld [vmem:[#allocation2 + $0x171] sm:$0xff] }
 0x393   : > { %v3776_v7 = vpop.permute.xlu0 %3775  ;;  %v8399_v17 = vld [vmem:[#allocation3 + $0x60] sm:$0xff] }
 0x394   : > { %v3110_v4 = vpop.permute.xlu1 %3109  ;;  %9138 = vst [vmem:[#allocation14_spill] sm:$0xff] %v8399_v17  ;;  %v8401_v3 = vld [vmem:[#allocation3 + $0x78] sm:$0xff]  ;;  %3861 = vst.msk [vmem:[#allocation3 + $0x50] sm:$0xff] %vm803_vm7, %v3776_v7 }
 0x395   : > { %9139 = vst [vmem:[#allocation15_spill] sm:$0xff] %v8401_v3  ;;  %3191 = vst.msk [vmem:[#allocation3 + $0x70] sm:$0xff] %vm610_vm6, %v3110_v4  ;;  %3805 = vrot.lane.b32.xlu0 %v8333_v53, %s6623_s9  ;;  %v8417_v7 = vld [vmem:[#allocation2 + $0x16a] sm:$0xff] }
 0x396   : > { %3479 = vst.msk [vmem:[#allocation3 + $0x60] sm:$0xff] %vm279_vm0, %v7946_v37  ;;  %3482 = vst.msk [vmem:[#allocation3 + $0x78] sm:$0xff] %vm279_vm0, %v7956_v50  ;;  %3143 = vrot.lane.b32.xlu1 %v8411_v14, %s6622_s8  ;;  %v8421_v37 = vld [vmem:[#allocation2 + $0x172] sm:$0xff]  ;;  %v4576_v17 = vld [vmem:[#allocation2 + $0xa8] sm:$0xff] }
 0x397   : > { %v3782_v38 = vpop.permute.xlu0 %3781 }
 0x398   : > { %v3116_v43 = vpop.permute.xlu1 %3115  ;;  %3864 = vst.msk [vmem:[#allocation3 + $0x68] sm:$0xff] %vm803_vm7, %v3782_v38 }
 0x399   : > { %3194 = vst.msk [vmem:[#allocation3 + $0x88] sm:$0xff] %vm610_vm6, %v3116_v43  ;;  %3333 = vrot.lane.b32.xlu0 %v8417_v7, %s6623_s9 }
 0x39a   : > { %3335 = vrot.lane.b32.xlu1 %v8421_v37, %s6623_s9 }
 0x39b   : > { %v3302_v50 = vpop.permute.xlu0 %3301  ;;  %v3893_v3 = vld [vmem:[#allocation3 + $0x50] sm:$0xff] }
 0x39c   : > { %v3308_v4 = vpop.permute.xlu1 %3307  ;;  %3383 = vst.msk [vmem:[#allocation3 + $0x70] sm:$0xff] %vm803_vm7, %v3302_v50  ;;  %6300 = vmatprep.mubr.msk.f32.mxu1 %vm1353_vm8, %v3893_v3 }
 0x39d   : > { %3386 = vst.msk [vmem:[#allocation3 + $0x88] sm:$0xff] %vm803_vm7, %v3308_v4  ;;  %6301 = vmatmul.mubr.msk.f32.gmra.mrb[10].mxu1 %vm1353_vm8, %v3894_v39  ;;  %3615 = vrot.lane.b32.xlu0 %v8351_v18, %s6622_s8 }
 0x39e   : > { %4608 = vst.msk [vmem:[#allocation3 + $0x50] sm:$0xff] %vm279_vm0, %v4576_v17  ;;  %3617 = vrot.lane.b32.xlu1 %v8367_v47, %s6622_s8 }
 0x39f   : > { %v3588_v38 = vpop.permute.xlu0 %3587  ;;  %v3896_v63 = vld [vmem:[#allocation3 + $0x68] sm:$0xff] }
 0x3a0   : > { %v3594_v43 = vpop.permute.xlu1 %3593  ;;  %3671 = vst.msk [vmem:[#allocation3 + $0x60] sm:$0xff] %vm610_vm6, %v3588_v38 }
 0x3a1   : > { %3674 = vst.msk [vmem:[#allocation3 + $0x78] sm:$0xff] %vm610_vm6, %v3594_v43  ;;  %3807 = vrot.lane.b32.xlu0 %v8373_v30, %s6623_s9 }
 0x3a2   : > { %4611 = vst.msk [vmem:[#allocation3 + $0x68] sm:$0xff] %vm279_vm0, %v4579_v51  ;;  %3809 = vrot.lane.b32.xlu1 %v8377_v31, %s6623_s9 }
 0x3a3   : > { %v3780_v39 = vpop.permute.xlu0 %3779  ;;  %v8441_v3 = vld [vmem:[#allocation3 + $0x70] sm:$0xff] }
 0x3a4   : > { %v3114_v17 = vpop.permute.xlu1 %3113  ;;  %9140 = vst [vmem:[#allocation16_spill] sm:$0xff] %v8441_v3  ;;  %v8443_v50 = vld [vmem:[#allocation3 + $0x88] sm:$0xff]  ;;  %3863 = vst.msk [vmem:[#allocation3 + $0x60] sm:$0xff] %vm803_vm7, %v3780_v39 }
 0x3a5   : > { %9141 = vst [vmem:[#allocation17_spill] sm:$0xff] %v8443_v50  ;;  %3193 = vst.msk [vmem:[#allocation3 + $0x80] sm:$0xff] %vm610_vm6, %v3114_v17  ;;  %3619 = vrot.lane.b32.xlu0 %v8395_v58, %s6622_s8  ;;  %v8464_v17 = vld [vmem:[#allocation2 + $0x181] sm:$0xff] }
 0x3a6   : > { %3481 = vst.msk [vmem:[#allocation3 + $0x70] sm:$0xff] %vm279_vm0, %v7962_v61  ;;  %3484 = vst.msk [vmem:[#allocation3 + $0x88] sm:$0xff] %vm279_vm0, %v7972_v16  ;;  %3621 = vrot.lane.b32.xlu1 %v8411_v14, %s6622_s8 }
 0x3a7   : > { %v3786_v51 = vpop.permute.xlu0 %3785 }
 0x3a8   : > { %v3120_v4 = vpop.permute.xlu1 %3119  ;;  %3866 = vst.msk [vmem:[#allocation3 + $0x78] sm:$0xff] %vm803_vm7, %v3786_v51  ;;  %v8469_v51 = vld [vmem:[#allocation2 + $0x189] sm:$0xff] }
 0x3a9   : > { %3196 = vst.msk [vmem:[#allocation3 + $0x98] sm:$0xff] %vm610_vm6, %v3120_v4  ;;  %3811 = vrot.lane.b32.xlu0 %v8417_v7, %s6623_s9 }
 0x3aa   : > { %3813 = vrot.lane.b32.xlu1 %v8421_v37, %s6623_s9 }
 0x3ab   : > { %v3306_v38 = vpop.permute.xlu0 %3305  ;;  %v3895_v39 = vld [vmem:[#allocation3 + $0x60] sm:$0xff] }
 0x3ac   : > { %v3312_v43 = vpop.permute.xlu1 %3311  ;;  %3385 = vst.msk [vmem:[#allocation3 + $0x80] sm:$0xff] %vm803_vm7, %v3306_v38  ;;  %6303 = vmatprep.mubr.msk.f32.mxu1 %vm1353_vm8, %v3895_v39  ;;  %v8477_v39 = vld [vmem:[#allocation2 + $0x182] sm:$0xff] }
 0x3ad   : > { %3388 = vst.msk [vmem:[#allocation3 + $0x98] sm:$0xff] %vm803_vm7, %v3312_v43  ;;  %6304 = vmatmul.mubr.msk.f32.gmra.mrb[12].mxu1 %vm1353_vm8, %v3896_v63  ;;  %3623 = vrot.lane.b32.xlu0 %v8464_v17, %s6622_s8  ;;  %v5880_v63 = vld [vmem:[%s9109_s4 + $0x20] sm:$0xff] }
 0x3ae   : > { %4610 = vst.msk [vmem:[#allocation3 + $0x60] sm:$0xff] %vm279_vm0, %v7962_v61  ;;  %3625 = vrot.lane.b32.xlu1 %v8469_v51, %s6622_s8  ;;  %v8481_v61 = vld [vmem:[#allocation2 + $0x18a] sm:$0xff] }
 0x3af   : > { %v3592_v4 = vpop.permute.xlu0 %3591  ;;  %v3898_v43 = vld [vmem:[#allocation3 + $0x78] sm:$0xff] }
 0x3b0   : > { %v3118_v38 = vpop.permute.xlu1 %3117  ;;  %3673 = vst.msk [vmem:[#allocation3 + $0x70] sm:$0xff] %vm610_vm6, %v3592_v4  ;;  %v5881_v4 = vld [vmem:[%s9109_s4 + $0x28] sm:$0xf] }
 0x3b1   : > { %3195 = vst.msk [vmem:[#allocation3 + $0x90] sm:$0xff] %vm610_vm6, %v3118_v38  ;;  %3815 = vrot.lane.b32.xlu0 %v8477_v39, %s6623_s9  ;;  %v8493_v38 = vpack.c.bf16 %v5881_v4, %v5880_v63  ;;  %v4631_v63 = vld [vmem:[#allocation2 + $0x39] sm:$0xff] }
 0x3b2   : > { %4613 = vst.msk [vmem:[#allocation3 + $0x78] sm:$0xff] %vm279_vm0, %v7972_v16  ;;  %3817 = vrot.lane.b32.xlu1 %v8481_v61, %s6623_s9 }
 0x3b3   : > { %v3784_v50 = vpop.permute.xlu0 %3783  ;;  %v8495_v3 = vld [vmem:[#allocation3 + $0x80] sm:$0xff]  ;;  %6469 = vmatprep.subr.msk.bf16.mxu1 %vm6814_vm5, %v8493_v38 }
 0x3b4   : > { %v3124_v16 = vpop.permute.xlu1 %3123  ;;  %9142 = vst [vmem:[#allocation18_spill] sm:$0xff] %v8495_v3  ;;  %v8497_v0 = vld [vmem:[#allocation3 + $0x98] sm:$0xff]  ;;  %3865 = vst.msk [vmem:[#allocation3 + $0x70] sm:$0xff] %vm803_vm7, %v3784_v50 }
 0x3b5   : > { %9143 = vst [vmem:[#allocation19_spill] sm:$0xff] %v8497_v0  ;;  %3198 = vst.msk [vmem:[#allocation3 + $0xa8] sm:$0xff] %vm610_vm6, %v3124_v16  ;;  %4694 = vrot.lane.b32.xlu0 %v4630_v54, %s6622_s8  ;;  %v4822_v16 = vld [vmem:[#allocation2 + $0x32] sm:$0xff]  ;;  %v4823_v0 = vld [vmem:[#allocation2 + $0x3a] sm:$0xff] }
 0x3b6   : > { %3483 = vst.msk [vmem:[#allocation3 + $0x80] sm:$0xff] %vm279_vm0, %v7978_v21  ;;  %3486 = vst.msk [vmem:[#allocation3 + $0x98] sm:$0xff] %vm279_vm0, %v7988_v27  ;;  %4696 = vrot.lane.b32.xlu1 %v4631_v63, %s6622_s8  ;;  %v4632_v54 = vld [vmem:[#allocation2 + $0x49] sm:$0xff]  ;;  %v4633_v63 = vld [vmem:[#allocation2 + $0x51] sm:$0xff] }
 0x3b7   : > { %v3310_v4 = vpop.permute.xlu0 %3309 }
 0x3b8   : > { %v3316_v50 = vpop.permute.xlu1 %3315  ;;  %3387 = vst.msk [vmem:[#allocation3 + $0x90] sm:$0xff] %vm803_vm7, %v3310_v4 }
 0x3b9   : > { %3390 = vst.msk [vmem:[#allocation3 + $0xa8] sm:$0xff] %vm803_vm7, %v3316_v50  ;;  %4886 = vrot.lane.b32.xlu0 %v4822_v16, %s6623_s9 }
 0x3ba   : > { %4888 = vrot.lane.b32.xlu1 %v4823_v0, %s6623_s9 }
 0x3bb   : > { %v3314_v3 = vpop.permute.xlu0 %3313  ;;  %v3897_v8 = vld [vmem:[#allocation3 + $0x70] sm:$0xff] }
 0x3bc   : > { %v3122_v44 = vpop.permute.xlu1 %3121  ;;  %6306 = vmatprep.mubr.msk.f32.mxu1 %vm1353_vm8, %v3897_v8  ;;  %4612 = vst.msk [vmem:[#allocation3 + $0x70] sm:$0xff] %vm279_vm0, %v7978_v21  ;;  %v4825_v21 = vld [vmem:[#allocation2 + $0x52] sm:$0xff] }
 0x3bd   : > { %3197 = vst.msk [vmem:[#allocation3 + $0xa0] sm:$0xff] %vm610_vm6, %v3122_v44  ;;  %6307 = vmatmul.mubr.msk.f32.gmra.mrb[14].mxu1 %vm1353_vm8, %v3898_v43  ;;  %4698 = vrot.lane.b32.xlu0 %v4632_v54, %s6622_s8  ;;  %v4635_v43 = vld [vmem:[#allocation2 + $0x69] sm:$0xff] }
 0x3be   : > { %3389 = vst.msk [vmem:[#allocation3 + $0xa0] sm:$0xff] %vm803_vm7, %v3314_v3  ;;  %4700 = vrot.lane.b32.xlu1 %v4633_v63, %s6622_s8  ;;  %v4827_v63 = vld [vmem:[#allocation2 + $0x6a] sm:$0xff] }
 0x3bf   : > { %v3596_v0 = vpop.permute.xlu0 %3595  ;;  %v8522_v4 = vld [vmem:[#allocation3 + $0x90] sm:$0xff] }
 0x3c0   : > { %v8524_v50 = vld [vmem:[#allocation3 + $0xa8] sm:$0xff]  ;;  %3675 = vst.msk [vmem:[#allocation3 + $0x80] sm:$0xff] %vm610_vm6, %v3596_v0  ;;  %v3598_v8 = vpop.permute.xlu1 %3597 }
 0x3c1   : > { %3485 = vst.msk [vmem:[#allocation3 + $0x90] sm:$0xff] %vm279_vm0, %v7994_v60  ;;  %3488 = vst.msk [vmem:[#allocation3 + $0xa8] sm:$0xff] %vm279_vm0, %v8010_v23  ;;  %4890 = vrot.lane.b32.xlu0 %v8016_v6, %s6623_s9 }
 0x3c2   : > { %3676 = vst.msk [vmem:[#allocation3 + $0x88] sm:$0xff] %vm610_vm6, %v3598_v8  ;;  %4892 = vrot.lane.b32.xlu1 %v4825_v21, %s6623_s9 }
 0x3c3   : > { %v3788_v44 = vpop.permute.xlu0 %3787 }
 0x3c4   : > { %3867 = vst.msk [vmem:[#allocation3 + $0x80] sm:$0xff] %vm803_vm7, %v3788_v44  ;;  %v3126_v3 = vpop.permute.xlu1 %3125 }
 0x3c5   : > { %3199 = vst.msk [vmem:[#allocation3 + $0xb0] sm:$0xff] %vm610_vm6, %v3126_v3  ;;  %4702 = vrot.lane.b32.xlu0 %v8051_v36, %s6622_s8  ;;  %v8539_v16 = vld [vmem:[#allocation3 + $0xa0] sm:$0xff] }
 0x3c6   : > { %4704 = vrot.lane.b32.xlu1 %v4635_v43, %s6622_s8  ;;  %3487 = vst.msk [vmem:[#allocation3 + $0xa0] sm:$0xff] %vm279_vm0, %v8004_v41 }
 0x3c7   : > { %v3790_v6 = vpop.permute.xlu0 %3789 }
 0x3c8   : > { %3868 = vst.msk [vmem:[#allocation3 + $0x88] sm:$0xff] %vm803_vm7, %v3790_v6  ;;  %v3128_v54 = vpop.permute.xlu1 %3127 }
 0x3c9   : > { %3200 = vst.msk [vmem:[#allocation3 + $0xb8] sm:$0xff] %vm610_vm6, %v3128_v54  ;;  %4894 = vrot.lane.b32.xlu0 %v8080_v19, %s6623_s9  ;;  %v4830_v54 = vld [vmem:[#allocation2 + $0x92] sm:$0xff] }
 0x3ca   : > { %4896 = vrot.lane.b32.xlu1 %v4827_v63, %s6623_s9  ;;  %v4831_v63 = vld [vmem:[#allocation2 + $0x9a] sm:$0xff] }
 0x3cb   : > { %v3318_v36 = vpop.permute.xlu0 %3317  ;;  %v3899_v0 = vld [vmem:[#allocation3 + $0x80] sm:$0xff] }
 0x3cc   : > { %3391 = vst.msk [vmem:[#allocation3 + $0xb0] sm:$0xff] %vm803_vm7, %v3318_v36  ;;  %v3320_v8 = vpop.permute.xlu1 %3319  ;;  %6309 = vmatprep.mubr.msk.f32.mxu1 %vm1353_vm8, %v3899_v0 }
 0x3cd   : > { %4614 = vst.msk [vmem:[#allocation3 + $0x80] sm:$0xff] %vm279_vm0, %v7994_v60  ;;  %4706 = vrot.lane.b32.xlu0 %v8089_v25, %s6622_s8  ;;  %v4829_v60 = vld [vmem:[#allocation2 + $0x82] sm:$0xff] }
 0x3ce   : > { %3392 = vst.msk [vmem:[#allocation3 + $0xb8] sm:$0xff] %vm803_vm7, %v3320_v8  ;;  %4708 = vrot.lane.b32.xlu1 %v8067_v20, %s6622_s8  ;;  %v4640_v8 = vld [vmem:[#allocation2 + $0xa9] sm:$0xff] }
 0x3cf   : > { %v3600_v19 = vpop.permute.xlu0 %3599  ;;  %v3900_v21 = vld [vmem:[#allocation3 + $0x88] sm:$0xff] }
 0x3d0   : > { %3677 = vst.msk [vmem:[#allocation3 + $0x90] sm:$0xff] %vm610_vm6, %v3600_v19  ;;  %v3602_v44 = vpop.permute.xlu1 %3601  ;;  %6310 = vmatmul.mubr.msk.f32.gmra.mrb[16].mxu1 %vm1353_vm8, %v3900_v21  ;;  %v4641_v19 = vld [vmem:[#allocation2 + $0xb1] sm:$0xff] }
 0x3d1   : > { %4615 = vst.msk [vmem:[#allocation3 + $0x88] sm:$0xff] %vm279_vm0, %v7988_v27  ;;  %4898 = vrot.lane.b32.xlu0 %v8097_v33, %s6623_s9  ;;  %v4639_v27 = vld [vmem:[#allocation2 + $0x99] sm:$0xff] }
 0x3d2   : > { %3678 = vst.msk [vmem:[#allocation3 + $0x98] sm:$0xff] %vm610_vm6, %v3602_v44  ;;  %4900 = vrot.lane.b32.xlu1 %v4829_v60, %s6623_s9 }
 0x3d3   : > { %v3792_v25 = vpop.permute.xlu0 %3791  ;;  %v8566_v20 = vld [vmem:[#allocation3 + $0xb0] sm:$0xff] }
 0x3d4   : > { %3869 = vst.msk [vmem:[#allocation3 + $0x90] sm:$0xff] %vm803_vm7, %v3792_v25  ;;  %v3130_v3 = vpop.permute.xlu1 %3129  ;;  %v4832_v25 = vld [vmem:[#allocation2 + $0xaa] sm:$0xff] }
 0x3d5   : > { %3489 = vst.msk [vmem:[#allocation3 + $0xb0] sm:$0xff] %vm279_vm0, %v8023_v62  ;;  %v8571_v43 = vld [vmem:[#allocation3 + $0xb8] sm:$0xff]  ;;  %4710 = vrot.lane.b32.xlu0 %v8105_v46, %s6622_s8 }
 0x3d6   : > { %3201 = vst.msk [vmem:[#allocation3 + $0xc0] sm:$0xff] %vm610_vm6, %v3130_v3  ;;  %4712 = vrot.lane.b32.xlu1 %v4639_v27, %s6622_s8 }
 0x3d7   : > { %3490 = vst.msk [vmem:[#allocation3 + $0xb8] sm:$0xff] %vm279_vm0, %v8029_v49  ;;  %v3794_v33 = vpop.permute.xlu0 %3793 }
 0x3d8   : > { %3870 = vst.msk [vmem:[#allocation3 + $0x98] sm:$0xff] %vm803_vm7, %v3794_v33  ;;  %v3132_v6 = vpop.permute.xlu1 %3131 }
 0x3d9   : > { %3202 = vst.msk [vmem:[#allocation3 + $0xc8] sm:$0xff] %vm610_vm6, %v3132_v6  ;;  %4902 = vrot.lane.b32.xlu0 %v4830_v54, %s6623_s9  ;;  %v4642_v6 = vld [vmem:[#allocation2 + $0xc1] sm:$0xff] }
 0x3da   : > { %4904 = vrot.lane.b32.xlu1 %v4831_v63, %s6623_s9 }
 0x3db   : > { %v3322_v36 = vpop.permute.xlu0 %3321  ;;  %v3901_v0 = vld [vmem:[#allocation3 + $0x90] sm:$0xff] }
 0x3dc   : > { %3393 = vst.msk [vmem:[#allocation3 + $0xc0] sm:$0xff] %vm803_vm7, %v3322_v36  ;;  %v3324_v46 = vpop.permute.xlu1 %3323  ;;  %6312 = vmatprep.mubr.msk.f32.mxu1 %vm1353_vm8, %v3901_v0  ;;  %v4835_v0 = vld [vmem:[#allocation2 + $0xca] sm:$0xff] }
 0x3dd   : > { %4616 = vst.msk [vmem:[#allocation3 + $0x90] sm:$0xff] %vm279_vm0, %v8004_v41  ;;  %4714 = vrot.lane.b32.xlu0 %v4640_v8, %s6622_s8  ;;  %v4833_v41 = vld [vmem:[#allocation2 + $0xb2] sm:$0xff] }
 0x3de   : > { %3394 = vst.msk [vmem:[#allocation3 + $0xc8] sm:$0xff] %vm803_vm7, %v3324_v46  ;;  %4716 = vrot.lane.b32.xlu1 %v4641_v19, %s6622_s8 }
 0x3df   : > { %v3604_v21 = vpop.permute.xlu0 %3603  ;;  %v3902_v44 = vld [vmem:[#allocation3 + $0x98] sm:$0xff] }
 0x3e0   : > { %3679 = vst.msk [vmem:[#allocation3 + $0xa0] sm:$0xff] %vm610_vm6, %v3604_v21  ;;  %v3606_v60 = vpop.permute.xlu1 %3605  ;;  %6313 = vmatmul.mubr.msk.f32.gmra.mrb[18].mxu1 %vm1353_vm8, %v3902_v44  ;;  %v4645_v21 = vld [vmem:[#allocation2 + $0xe1] sm:$0xff] }
 0x3e1   : > { %4617 = vst.msk [vmem:[#allocation3 + $0x98] sm:$0xff] %vm279_vm0, %v8010_v23  ;;  %4906 = vrot.lane.b32.xlu0 %v4832_v25, %s6623_s9  ;;  %v4643_v23 = vld [vmem:[#allocation2 + $0xc9] sm:$0xff] }
 0x3e2   : > { %3680 = vst.msk [vmem:[#allocation3 + $0xa8] sm:$0xff] %vm610_vm6, %v3606_v60  ;;  %4908 = vrot.lane.b32.xlu1 %v4833_v41, %s6623_s9 }
 0x3e3   : > { %v3796_v3 = vpop.permute.xlu0 %3795  ;;  %v8597_v27 = vld [vmem:[#allocation3 + $0xc0] sm:$0xff] }
 0x3e4   : > { %3871 = vst.msk [vmem:[#allocation3 + $0xa0] sm:$0xff] %vm803_vm7, %v3796_v3  ;;  %v3134_v33 = vpop.permute.xlu1 %3133 }
 0x3e5   : > { %3491 = vst.msk [vmem:[#allocation3 + $0xc0] sm:$0xff] %vm279_vm0, %v8039_v22  ;;  %v8602_v54 = vld [vmem:[#allocation3 + $0xc8] sm:$0xff]  ;;  %4718 = vrot.lane.b32.xlu0 %v4642_v6, %s6622_s8 }
 0x3e6   : > { %3203 = vst.msk [vmem:[#allocation3 + $0xd0] sm:$0xff] %vm610_vm6, %v3134_v33  ;;  %4720 = vrot.lane.b32.xlu1 %v4643_v23, %s6622_s8  ;;  %v4839_v6 = vld [vmem:[#allocation2 + $0xfa] sm:$0xff] }
 0x3e7   : > { %3492 = vst.msk [vmem:[#allocation3 + $0xc8] sm:$0xff] %vm279_vm0, %v8045_v24  ;;  %v3798_v63 = vpop.permute.xlu0 %3797 }
 0x3e8   : > { %3872 = vst.msk [vmem:[#allocation3 + $0xa8] sm:$0xff] %vm803_vm7, %v3798_v63  ;;  %v3136_v36 = vpop.permute.xlu1 %3135 }
 0x3e9   : > { %3204 = vst.msk [vmem:[#allocation3 + $0xd8] sm:$0xff] %vm610_vm6, %v3136_v36  ;;  %4910 = vrot.lane.b32.xlu0 %v8138_v56, %s6623_s9 }
 0x3ea   : > { %4912 = vrot.lane.b32.xlu1 %v4835_v0, %s6623_s9 }
 0x3eb   : > { %v3326_v46 = vpop.permute.xlu0 %3325  ;;  %v3903_v8 = vld [vmem:[#allocation3 + $0xa0] sm:$0xff] }
 0x3ec   : > { %3395 = vst.msk [vmem:[#allocation3 + $0xd0] sm:$0xff] %vm803_vm7, %v3326_v46  ;;  %v3328_v19 = vpop.permute.xlu1 %3327  ;;  %6315 = vmatprep.mubr.msk.f32.mxu1 %vm1353_vm8, %v3903_v8 }
 0x3ed   : > { %4618 = vst.msk [vmem:[#allocation3 + $0xa0] sm:$0xff] %vm279_vm0, %v8023_v62  ;;  %4722 = vrot.lane.b32.xlu0 %v8151_v34, %s6622_s8  ;;  %v4837_v62 = vld [vmem:[#allocation2 + $0xe2] sm:$0xff] }
 0x3ee   : > { %3396 = vst.msk [vmem:[#allocation3 + $0xd8] sm:$0xff] %vm803_vm7, %v3328_v19  ;;  %4724 = vrot.lane.b32.xlu1 %v4645_v21, %s6622_s8 }
 0x3ef   : > { %v3608_v56 = vpop.permute.xlu0 %3607  ;;  %v3904_v44 = vld [vmem:[#allocation3 + $0xa8] sm:$0xff] }
 0x3f0   : > { %3681 = vst.msk [vmem:[#allocation3 + $0xb0] sm:$0xff] %vm610_vm6, %v3608_v56  ;;  %v3610_v60 = vpop.permute.xlu1 %3609  ;;  %6316 = vmatmul.mubr.msk.f32.gmra.mrb[20].mxu1 %vm1353_vm8, %v3904_v44  ;;  %v3466_v56 = vld [vmem:[#allocation2 + $0x188] sm:$0xff] }
 0x3f1   : > { %4619 = vst.msk [vmem:[#allocation3 + $0xa8] sm:$0xff] %vm279_vm0, %v8029_v49  ;;  %4914 = vrot.lane.b32.xlu0 %v8172_v32, %s6623_s9  ;;  %v4647_v49 = vld [vmem:[#allocation2 + $0xf9] sm:$0xff] }
 0x3f2   : > { %3682 = vst.msk [vmem:[#allocation3 + $0xb8] sm:$0xff] %vm610_vm6, %v3610_v60  ;;  %4916 = vrot.lane.b32.xlu1 %v4837_v62, %s6623_s9  ;;  %v4660_v62 = vld [vmem:[#allocation2 + $0x199] sm:$0xff] }
 0x3f3   : > { %v3800_v34 = vpop.permute.xlu0 %3799  ;;  %v8630_v25 = vld [vmem:[#allocation3 + $0xd0] sm:$0xff] }
 0x3f4   : > { %3873 = vst.msk [vmem:[#allocation3 + $0xb0] sm:$0xff] %vm803_vm7, %v3800_v34  ;;  %v3138_v41 = vpop.permute.xlu1 %3137 }
 0x3f5   : > { %3493 = vst.msk [vmem:[#allocation3 + $0xd0] sm:$0xff] %vm279_vm0, %v8058_v35  ;;  %v8635_v3 = vld [vmem:[#allocation3 + $0xd8] sm:$0xff]  ;;  %4726 = vrot.lane.b32.xlu0 %v8194_v1, %s6622_s8 }
 0x3f6   : > { %3205 = vst.msk [vmem:[#allocation3 + $0xe0] sm:$0xff] %vm610_vm6, %v3138_v41  ;;  %4728 = vrot.lane.b32.xlu1 %v4647_v49, %s6622_s8  ;;  %v4661_v49 = vld [vmem:[#allocation2 + $0x1a1] sm:$0xff] }
 0x3f7   : > { %3494 = vst.msk [vmem:[#allocation3 + $0xd8] sm:$0xff] %vm279_vm0, %v8063_v57  ;;  %v3802_v32 = vpop.permute.xlu0 %3801 }
 0x3f8   : > { %3874 = vst.msk [vmem:[#allocation3 + $0xb8] sm:$0xff] %vm803_vm7, %v3802_v32  ;;  %v3140_v33 = vpop.permute.xlu1 %3139 }
 0x3f9   : > { %3206 = vst.msk [vmem:[#allocation3 + $0xe8] sm:$0xff] %vm610_vm6, %v3140_v33  ;;  %4918 = vrot.lane.b32.xlu0 %v8186_v59, %s6623_s9  ;;  %v4853_v33 = vld [vmem:[#allocation2 + $0x1a2] sm:$0xff] }
 0x3fa   : > { %4920 = vrot.lane.b32.xlu1 %v4839_v6, %s6623_s9 }
 0x3fb   : > { %v3330_v23 = vpop.permute.xlu0 %3329  ;;  %v3905_v63 = vld [vmem:[#allocation3 + $0xb0] sm:$0xff] }
 0x3fc   : > { %3397 = vst.msk [vmem:[#allocation3 + $0xe0] sm:$0xff] %vm803_vm7, %v3330_v23  ;;  %v3332_v1 = vpop.permute.xlu1 %3331  ;;  %6318 = vmatprep.mubr.msk.f32.mxu1 %vm1353_vm8, %v3905_v63  ;;  %v9144_v63 = vld [vmem:[#allocation4_spill] sm:$0xff] }
 0x3fd   : > { %4620 = vst.msk [vmem:[#allocation3 + $0xb0] sm:$0xff] %vm279_vm0, %v8039_v22  ;;  %4730 = vrot.lane.b32.xlu0 %v8209_v2, %s6622_s8 }
 0x3fe   : > { %3398 = vst.msk [vmem:[#allocation3 + $0xe8] sm:$0xff] %vm803_vm7, %v3332_v1  ;;  %4732 = vrot.lane.b32.xlu1 %v8225_v26, %s6622_s8  ;;  %v9145_v1 = vld [vmem:[#allocation6_spill] sm:$0xff] }
 0x3ff   : > { %v3612_v59 = vpop.permute.xlu0 %3611  ;;  %v3906_v36 = vld [vmem:[#allocation3 + $0xb8] sm:$0xff] }
 0x400   : > { %3683 = vst.msk [vmem:[#allocation3 + $0xc0] sm:$0xff] %vm610_vm6, %v3612_v59  ;;  %v3614_v0 = vpop.permute.xlu1 %3613  ;;  %6319 = vmatmul.mubr.msk.f32.gmra.mrb[22].mxu1 %vm1353_vm8, %v3906_v36 }
 0x401   : > { %4621 = vst.msk [vmem:[#allocation3 + $0xb8] sm:$0xff] %vm279_vm0, %v8045_v24  ;;  %4922 = vrot.lane.b32.xlu0 %v8231_v15, %s6623_s9 }
 0x402   : > { %3684 = vst.msk [vmem:[#allocation3 + $0xc8] sm:$0xff] %vm610_vm6, %v3614_v0  ;;  %4924 = vrot.lane.b32.xlu1 %v8235_v12, %s6623_s9  ;;  %v9148_v0 = vld [vmem:[#allocation7_spill] sm:$0xff] }
 0x403   : > { %v3804_v22 = vpop.permute.xlu0 %3803  ;;  %v8666_v2 = vld [vmem:[#allocation3 + $0xe0] sm:$0xff] }
 0x404   : > { %3875 = vst.msk [vmem:[#allocation3 + $0xc0] sm:$0xff] %vm803_vm7, %v3804_v22  ;;  %v3142_v26 = vpop.permute.xlu1 %3141  ;;  %v9149_v22 = vld [vmem:[#allocation10_spill] sm:$0xff] }
 0x405   : > { %3495 = vst.msk [vmem:[#allocation3 + $0xe0] sm:$0xff] %vm279_vm0, %v8072_v52  ;;  %v8671_v46 = vld [vmem:[#allocation3 + $0xe8] sm:$0xff]  ;;  %4734 = vrot.lane.b32.xlu0 %v8253_v42, %s6622_s8 }
 0x406   : > { %3207 = vst.msk [vmem:[#allocation3 + $0xf0] sm:$0xff] %vm610_vm6, %v3142_v26  ;;  %4736 = vrot.lane.b32.xlu1 %v8269_v55, %s6622_s8 }
 0x407   : > { %3496 = vst.msk [vmem:[#allocation3 + $0xe8] sm:$0xff] %vm279_vm0, %v8076_v40  ;;  %v3806_v24 = vpop.permute.xlu0 %3805 }
 0x408   : > { %3876 = vst.msk [vmem:[#allocation3 + $0xc8] sm:$0xff] %vm803_vm7, %v3806_v24  ;;  %v3144_v15 = vpop.permute.xlu1 %3143 }
 0x409   : > { %3208 = vst.msk [vmem:[#allocation3 + $0xf8] sm:$0xff] %vm610_vm6, %v3144_v15  ;;  %4926 = vrot.lane.b32.xlu0 %v8275_v5, %s6623_s9  ;;  %v9150_v15 = vld [vmem:[#allocation9_spill] sm:$0xff] }
 0x40a   : > { %4928 = vrot.lane.b32.xlu1 %v8279_v13, %s6623_s9 }
 0x40b   : > { %v3334_v12 = vpop.permute.xlu0 %3333  ;;  %v3907_v42 = vld [vmem:[#allocation3 + $0xc0] sm:$0xff] }
 0x40c   : > { %3399 = vst.msk [vmem:[#allocation3 + $0xf0] sm:$0xff] %vm803_vm7, %v3334_v12  ;;  %v3336_v8 = vpop.permute.xlu1 %3335  ;;  %6321 = vmatprep.mubr.msk.f32.mxu1 %vm1353_vm8, %v3907_v42  ;;  %v9151_v12 = vld [vmem:[#allocation12_spill] sm:$0xff] }
 0x40d   : > { %4622 = vst.msk [vmem:[#allocation3 + $0xc0] sm:$0xff] %vm279_vm0, %v8058_v35  ;;  %4738 = vrot.lane.b32.xlu0 %v8297_v9, %s6622_s8 }
 0x40e   : > { %3400 = vst.msk [vmem:[#allocation3 + $0xf8] sm:$0xff] %vm803_vm7, %v3336_v8  ;;  %4740 = vrot.lane.b32.xlu1 %v8321_v10, %s6622_s8  ;;  %v3465_v10 = vld [vmem:[#allocation2 + $0x180] sm:$0xff] }
 0x40f   : > { %v3616_v55 = vpop.permute.xlu0 %3615  ;;  %v3908_v5 = vld [vmem:[#allocation3 + $0xc8] sm:$0xff] }
 0x410   : > { %3685 = vst.msk [vmem:[#allocation3 + $0xd0] sm:$0xff] %vm610_vm6, %v3616_v55  ;;  %v3618_v13 = vpop.permute.xlu1 %3617  ;;  %6322 = vmatmul.mubr.msk.f32.gmra.mrb[24].mxu1 %vm1353_vm8, %v3908_v5  ;;  %v9152_v55 = vld [vmem:[#allocation11_spill] sm:$0xff]  ;;  %v9153_v5 = vld [vmem:[#allocation14_spill] sm:$0xff] }
 0x411   : > { %4623 = vst.msk [vmem:[#allocation3 + $0xc8] sm:$0xff] %vm279_vm0, %v8063_v57  ;;  %4930 = vrot.lane.b32.xlu0 %v8329_v29, %s6623_s9 }
 0x412   : > { %3686 = vst.msk [vmem:[#allocation3 + $0xd8] sm:$0xff] %vm610_vm6, %v3618_v13  ;;  %4932 = vrot.lane.b32.xlu1 %v8333_v53, %s6623_s9 }
 0x413   : > { %v3808_v35 = vpop.permute.xlu0 %3807  ;;  %v8704_v9 = vld [vmem:[#allocation3 + $0xf0] sm:$0xff] }
 0x414   : > { %3877 = vst.msk [vmem:[#allocation3 + $0xd0] sm:$0xff] %vm803_vm7, %v3808_v35  ;;  %v3810_v19 = vpop.permute.xlu1 %3809 }
 0x415   : > { %v8707_v21 = vld [vmem:[#allocation3 + $0xf8] sm:$0xff]  ;;  %3497 = vst.msk [vmem:[#allocation3 + $0xf0] sm:$0xff] %vm279_vm0, %v3465_v10  ;;  %4742 = vrot.lane.b32.xlu0 %v8351_v18, %s6622_s8 }
 0x416   : > { %3878 = vst.msk [vmem:[#allocation3 + $0xd8] sm:$0xff] %vm803_vm7, %v3810_v19  ;;  %4744 = vrot.lane.b32.xlu1 %v8367_v47, %s6622_s8  ;;  %v9155_v19 = vld [vmem:[#allocation16_spill] sm:$0xff] }
 0x417   : > { %3498 = vst.msk [vmem:[#allocation3 + $0xf8] sm:$0xff] %vm279_vm0, %v3466_v56  ;;  %v3620_v57 = vpop.permute.xlu0 %3619 }
 0x418   : > { %3687 = vst.msk [vmem:[#allocation3 + $0xe0] sm:$0xff] %vm610_vm6, %v3620_v57  ;;  %v3622_v29 = vpop.permute.xlu1 %3621 }
 0x419   : > { %3688 = vst.msk [vmem:[#allocation3 + $0xe8] sm:$0xff] %vm610_vm6, %v3622_v29  ;;  %4934 = vrot.lane.b32.xlu0 %v8373_v30, %s6623_s9  ;;  %v9156_v29 = vld [vmem:[#allocation15_spill] sm:$0xff] }
 0x41a   : > { %4936 = vrot.lane.b32.xlu1 %v8377_v31, %s6623_s9 }
 0x41b   : > { %v3812_v53 = vpop.permute.xlu0 %3811  ;;  %v3909_v44 = vld [vmem:[#allocation3 + $0xd0] sm:$0xff] }
 0x41c   : > { %3879 = vst.msk [vmem:[#allocation3 + $0xe0] sm:$0xff] %vm803_vm7, %v3812_v53  ;;  %v3814_v18 = vpop.permute.xlu1 %3813  ;;  %6324 = vmatprep.mubr.msk.f32.mxu1 %vm1353_vm8, %v3909_v44  ;;  %v9157_v53 = vld [vmem:[#allocation18_spill] sm:$0xff] }
 0x41d   : > { %v3910_v47 = vld [vmem:[#allocation3 + $0xd8] sm:$0xff]  ;;  %4624 = vst.msk [vmem:[#allocation3 + $0xd0] sm:$0xff] %vm279_vm0, %v8072_v52  ;;  %4746 = vrot.lane.b32.xlu0 %v8395_v58, %s6622_s8 }
 0x41e   : > { %3880 = vst.msk [vmem:[#allocation3 + $0xe8] sm:$0xff] %vm803_vm7, %v3814_v18  ;;  %6325 = vmatmul.mubr.msk.f32.gmra.mrb[26].mxu1 %vm1353_vm8, %v3910_v47  ;;  %4748 = vrot.lane.b32.xlu1 %v8411_v14, %s6622_s8  ;;  %v9158_v47 = vld [vmem:[#allocation17_spill] sm:$0xff] }
 0x41f   : > { %4625 = vst.msk [vmem:[#allocation3 + $0xd8] sm:$0xff] %vm279_vm0, %v8076_v40  ;;  %v3624_v30 = vpop.permute.xlu0 %3623 }
 0x420   : > { %v3626_v31 = vpop.permute.xlu1 %3625  ;;  %3689 = vst.msk [vmem:[#allocation3 + $0xf0] sm:$0xff] %vm610_vm6, %v3624_v30 }
 0x421   : > { %3690 = vst.msk [vmem:[#allocation3 + $0xf8] sm:$0xff] %vm610_vm6, %v3626_v31  ;;  %4938 = vrot.lane.b32.xlu0 %v8417_v7, %s6623_s9 }
 0x422   : > { %4940 = vrot.lane.b32.xlu1 %v8421_v37, %s6623_s9  ;;  %v4596_v37 = vld [vmem:[#allocation2 + $0x198] sm:$0xff] }
 0x423   : > { %v3816_v52 = vpop.permute.xlu0 %3815  ;;  %v3911_v58 = vld [vmem:[#allocation3 + $0xe0] sm:$0xff] }
 0x424   : > { %v3818_v60 = vpop.permute.xlu1 %3817  ;;  %3881 = vst.msk [vmem:[#allocation3 + $0xf0] sm:$0xff] %vm803_vm7, %v3816_v52  ;;  %6327 = vmatprep.mubr.msk.f32.mxu1 %vm1353_vm8, %v3911_v58  ;;  %v9159_v52 = vld [vmem:[#allocation19_spill] sm:$0xff] }
 0x425   : > { %v3912_v40 = vld [vmem:[#allocation3 + $0xe8] sm:$0xff]  ;;  %4626 = vst.msk [vmem:[#allocation3 + $0xe0] sm:$0xff] %vm279_vm0, %v3465_v10  ;;  %4750 = vrot.lane.b32.xlu0 %v8464_v17, %s6622_s8  ;;  %v4597_v17 = vld [vmem:[#allocation2 + $0x1a0] sm:$0xff] }
 0x426   : > { %3882 = vst.msk [vmem:[#allocation3 + $0xf8] sm:$0xff] %vm803_vm7, %v3818_v60  ;;  %6328 = vmatmul.mubr.msk.f32.gmra.mrb[28].mxu1 %vm1353_vm8, %v3912_v40  ;;  %4752 = vrot.lane.b32.xlu1 %v8469_v51, %s6622_s8  ;;  %v9154_v10 = vld [vmem:[#allocation13_spill] sm:$0xff] }
 0x427   : > { %4627 = vst.msk [vmem:[#allocation3 + $0xe8] sm:$0xff] %vm279_vm0, %v3466_v56  ;;  %v4695_v14 = vpop.permute.xlu0 %4694 }
 0x428   : > { %v4697_v7 = vpop.permute.xlu1 %4696  ;;  %4790 = vst.msk [vmem:[#allocation3] sm:$0xff] %vm610_vm6, %v4695_v14 }
 0x429   : > { %4791 = vst.msk [vmem:[#allocation3 + $0x8] sm:$0xff] %vm610_vm6, %v4697_v7  ;;  %4942 = vrot.lane.b32.xlu0 %v8477_v39, %s6623_s9  ;;  %v4852_v39 = vld [vmem:[#allocation2 + $0x19a] sm:$0xff] }
 0x42a   : > { %4944 = vrot.lane.b32.xlu1 %v8481_v61, %s6623_s9 }
 0x42b   : > { %v4887_v34 = vpop.permute.xlu0 %4886  ;;  %v3913_v41 = vld [vmem:[#allocation3 + $0xf0] sm:$0xff] }
 0x42c   : > { %v4889_v32 = vpop.permute.xlu1 %4888  ;;  %4982 = vst.msk [vmem:[#allocation3] sm:$0xff] %vm803_vm7, %v4887_v34  ;;  %6330 = vmatprep.mubr.msk.f32.mxu1 %vm1353_vm8, %v3913_v41 }
 0x42d   : > { %v3914_v51 = vld [vmem:[#allocation3 + $0xf8] sm:$0xff]  ;;  %4628 = vst.msk [vmem:[#allocation3 + $0xf0] sm:$0xff] %vm279_vm0, %v4596_v37  ;;  %4754 = vrot.lane.b32.xlu0 %v4660_v62, %s6622_s8 }
 0x42e   : > { %4983 = vst.msk [vmem:[#allocation3 + $0x8] sm:$0xff] %vm803_vm7, %v4889_v32  ;;  %6331 = vmatmul.mubr.msk.f32.gmra.mrb[30].mxu1 %vm1353_vm8, %v3914_v51  ;;  %4756 = vrot.lane.b32.xlu1 %v4661_v49, %s6622_s8 }
 0x42f   : > { %4629 = vst.msk [vmem:[#allocation3 + $0xf8] sm:$0xff] %vm279_vm0, %v4597_v17  ;;  %6337 = vmatprep.mubr.msk.f32.mxu1 %vm1353_vm8, %v7832_v48  ;;  %v4699_v61 = vpop.permute.xlu0 %4698 }
 0x430   : > { %v4701_v6 = vpop.permute.xlu1 %4700  ;;  %4792 = vst.msk [vmem:[#allocation3 + $0x10] sm:$0xff] %vm610_vm6, %v4699_v61 }
 0x431   : > { %4793 = vst.msk [vmem:[#allocation3 + $0x18] sm:$0xff] %vm610_vm6, %v4701_v6  ;;  %4946 = vrot.lane.b32.xlu0 %v4852_v39, %s6623_s9 }
 0x432   : > { %6338 = vmatmul.mubr.msk.f32.vlgmr.msra.gmra.mrb[0].mxu1 %vm1353_vm8, %v7829_v28  ;;  %4948 = vrot.lane.b32.xlu1 %v4853_v33, %s6623_s9 }
 0x433   : > { %6472 = vmatpush3.bf16.msk.msra.mxu1 %vm6814_vm5, %v8493_v38  ;;  %6340 = vmatprep.mubr.msk.f32.mxu1 %vm1353_vm8, %v8158_v11  ;;  %v4891_v48 = vpop.permute.xlu0 %4890  ;;  %v9146_v38 = vld [vmem:[#allocation5_spill] sm:$0xff]  ;;  %v9147_v11 = vld [vmem:[#allocation8_spill] sm:$0xff] }
 0x434   : > { %v4893_v23 = vpop.permute.xlu1 %4892  ;;  %4984 = vst.msk [vmem:[#allocation3 + $0x10] sm:$0xff] %vm803_vm7, %v4891_v48 }
 0x435   : > { %4985 = vst.msk [vmem:[#allocation3 + $0x18] sm:$0xff] %vm803_vm7, %v4893_v23 }
 0x436   : > { %6341 = vmatmul.mubr.msk.f32.gmra.mrb[2].mxu1 %vm1353_vm8, %v9144_v63 }
 0x437   : > { %6343 = vmatprep.mubr.msk.f32.mxu1 %vm1353_vm8, %v9145_v1  ;;  %v4703_v28 = vpop.permute.xlu0 %4702 }
 0x438   : > { %v4705_v45 = vpop.permute.xlu1 %4704  ;;  %4794 = vst.msk [vmem:[#allocation3 + $0x20] sm:$0xff] %vm610_vm6, %v4703_v28 }
 0x439   : > { %4795 = vst.msk [vmem:[#allocation3 + $0x28] sm:$0xff] %vm610_vm6, %v4705_v45 }
 0x43a   : > { %6344 = vmatmul.mubr.msk.f32.gmra.mrb[4].mxu1 %vm1353_vm8, %v9146_v38 }
 0x43b   : > { %6346 = vmatprep.mubr.msk.f32.mxu1 %vm1353_vm8, %v9147_v11  ;;  %v4895_v59 = vpop.permute.xlu0 %4894 }
 0x43c   : > { %v4897_v36 = vpop.permute.xlu1 %4896  ;;  %4986 = vst.msk [vmem:[#allocation3 + $0x20] sm:$0xff] %vm803_vm7, %v4895_v59 }
 0x43d   : > { %4987 = vst.msk [vmem:[#allocation3 + $0x28] sm:$0xff] %vm803_vm7, %v4897_v36 }
 0x43e   : > { %6347 = vmatmul.mubr.msk.f32.gmra.mrb[6].mxu1 %vm1353_vm8, %v9148_v0 }
 0x43f   : > { %6349 = vmatprep.mubr.msk.f32.mxu1 %vm1353_vm8, %v9149_v22  ;;  %v4707_v26 = vpop.permute.xlu0 %4706 }
 0x440   : > { %v4709_v24 = vpop.permute.xlu1 %4708  ;;  %4796 = vst.msk [vmem:[#allocation3 + $0x30] sm:$0xff] %vm610_vm6, %v4707_v26 }
 0x441   : > { %4797 = vst.msk [vmem:[#allocation3 + $0x38] sm:$0xff] %vm610_vm6, %v4709_v24 }
 0x442   : > { %6350 = vmatmul.mubr.msk.f32.gmra.mrb[8].mxu1 %vm1353_vm8, %v9150_v15 }
 0x443   : > { %6352 = vmatprep.mubr.msk.f32.mxu1 %vm1353_vm8, %v9151_v12  ;;  %v4899_v42 = vpop.permute.xlu0 %4898  ;;  %v5018_v17 = vld [vmem:[#allocation3 + $0x20] sm:$0xff] }
 0x444   : > { %v4901_v8 = vpop.permute.xlu1 %4900  ;;  %4988 = vst.msk [vmem:[#allocation3 + $0x30] sm:$0xff] %vm803_vm7, %v4899_v42  ;;  %v5019_v49 = vld [vmem:[#allocation3 + $0x28] sm:$0xff] }
 0x445   : > { %4989 = vst.msk [vmem:[#allocation3 + $0x38] sm:$0xff] %vm803_vm7, %v4901_v8 }
 0x446   : > { %6353 = vmatmul.mubr.msk.f32.gmra.mrb[10].mxu1 %vm1353_vm8, %v9152_v55 }
 0x447   : > { %6355 = vmatprep.mubr.msk.f32.mxu1 %vm1353_vm8, %v9153_v5  ;;  %v4711_v13 = vpop.permute.xlu0 %4710 }
 0x448   : > { %v4713_v35 = vpop.permute.xlu1 %4712  ;;  %4798 = vst.msk [vmem:[#allocation3 + $0x40] sm:$0xff] %vm610_vm6, %v4711_v13 }
 0x449   : > { %4799 = vst.msk [vmem:[#allocation3 + $0x48] sm:$0xff] %vm610_vm6, %v4713_v35 }
 0x44a   : > { %6356 = vmatmul.mubr.msk.f32.gmra.mrb[12].mxu1 %vm1353_vm8, %v9154_v10 }
 0x44b   : > { %6358 = vmatprep.mubr.msk.f32.mxu1 %vm1353_vm8, %v9155_v19  ;;  %v4903_v56 = vpop.permute.xlu0 %4902  ;;  %v5020_v32 = vld [vmem:[#allocation3 + $0x30] sm:$0xff] }
 0x44c   : > { %v4905_v57 = vpop.permute.xlu1 %4904  ;;  %4990 = vst.msk [vmem:[#allocation3 + $0x40] sm:$0xff] %vm803_vm7, %v4903_v56  ;;  %v5021_v61 = vld [vmem:[#allocation3 + $0x38] sm:$0xff] }
 0x44d   : > { %4991 = vst.msk [vmem:[#allocation3 + $0x48] sm:$0xff] %vm803_vm7, %v4905_v57 }
 0x44e   : > { %6359 = vmatmul.mubr.msk.f32.gmra.mrb[14].mxu1 %vm1353_vm8, %v9156_v29 }
 0x44f   : > { %6361 = vmatprep.mubr.msk.f32.mxu1 %vm1353_vm8, %v9157_v53  ;;  %v4715_v44 = vpop.permute.xlu0 %4714 }
 0x450   : > { %v4717_v18 = vpop.permute.xlu1 %4716  ;;  %4800 = vst.msk [vmem:[#allocation3 + $0x50] sm:$0xff] %vm610_vm6, %v4715_v44 }
 0x451   : > { %4801 = vst.msk [vmem:[#allocation3 + $0x58] sm:$0xff] %vm610_vm6, %v4717_v18 }
 0x452   : > { %6362 = vmatmul.mubr.msk.f32.gmra.mrb[16].mxu1 %vm1353_vm8, %v9158_v47 }
 0x453   : > { %6364 = vmatprep.mubr.msk.f32.mxu1 %vm1353_vm8, %v8522_v4  ;;  %v4907_v30 = vpop.permute.xlu0 %4906  ;;  %v5022_v33 = vld [vmem:[#allocation3 + $0x40] sm:$0xff] }
 0x454   : > { %v4909_v31 = vpop.permute.xlu1 %4908  ;;  %4992 = vst.msk [vmem:[#allocation3 + $0x50] sm:$0xff] %vm803_vm7, %v4907_v30  ;;  %v5023_v23 = vld [vmem:[#allocation3 + $0x48] sm:$0xff] }
 0x455   : > { %4993 = vst.msk [vmem:[#allocation3 + $0x58] sm:$0xff] %vm803_vm7, %v4909_v31 }
 0x456   : > { %6365 = vmatmul.mubr.msk.f32.gmra.mrb[18].mxu1 %vm1353_vm8, %v9159_v52 }
 0x457   : > { %6367 = vmatprep.mubr.msk.f32.mxu1 %vm1353_vm8, %v8539_v16  ;;  %v4719_v58 = vpop.permute.xlu0 %4718 }
 0x458   : > { %v4721_v60 = vpop.permute.xlu1 %4720  ;;  %4802 = vst.msk [vmem:[#allocation3 + $0x60] sm:$0xff] %vm610_vm6, %v4719_v58 }
 0x459   : > { %4803 = vst.msk [vmem:[#allocation3 + $0x68] sm:$0xff] %vm610_vm6, %v4721_v60 }
 0x45a   : > { %6368 = vmatmul.mubr.msk.f32.gmra.mrb[20].mxu1 %vm1353_vm8, %v8524_v50 }
 0x45b   : > { %6370 = vmatprep.mubr.msk.f32.mxu1 %vm1353_vm8, %v8566_v20  ;;  %v4911_v4 = vpop.permute.xlu0 %4910  ;;  %v5024_v63 = vld [vmem:[#allocation3 + $0x50] sm:$0xff] }
 0x45c   : > { %v4913_v40 = vpop.permute.xlu1 %4912  ;;  %4994 = vst.msk [vmem:[#allocation3 + $0x60] sm:$0xff] %vm803_vm7, %v4911_v4  ;;  %v5025_v45 = vld [vmem:[#allocation3 + $0x58] sm:$0xff] }
 0x45d   : > { %4995 = vst.msk [vmem:[#allocation3 + $0x68] sm:$0xff] %vm803_vm7, %v4913_v40 }
 0x45e   : > { %6371 = vmatmul.mubr.msk.f32.gmra.mrb[22].mxu1 %vm1353_vm8, %v8571_v43 }
 0x45f   : > { %6373 = vmatprep.mubr.msk.f32.mxu1 %vm1353_vm8, %v8597_v27  ;;  %v4723_v16 = vpop.permute.xlu0 %4722 }
 0x460   : > { %v4725_v14 = vpop.permute.xlu1 %4724  ;;  %4804 = vst.msk [vmem:[#allocation3 + $0x70] sm:$0xff] %vm610_vm6, %v4723_v16 }
 0x461   : > { %4805 = vst.msk [vmem:[#allocation3 + $0x78] sm:$0xff] %vm610_vm6, %v4725_v14 }
 0x462   : > { %6374 = vmatmul.mubr.msk.f32.gmra.mrb[24].mxu1 %vm1353_vm8, %v8602_v54 }
 0x463   : > { %6376 = vmatprep.mubr.msk.f32.mxu1 %vm1353_vm8, %v8630_v25  ;;  %v4915_v50 = vpop.permute.xlu0 %4914  ;;  %v5026_v38 = vld [vmem:[#allocation3 + $0x60] sm:$0xff] }
 0x464   : > { %v4917_v20 = vpop.permute.xlu1 %4916  ;;  %4996 = vst.msk [vmem:[#allocation3 + $0x70] sm:$0xff] %vm803_vm7, %v4915_v50  ;;  %v5027_v36 = vld [vmem:[#allocation3 + $0x68] sm:$0xff] }
 0x465   : > { %4997 = vst.msk [vmem:[#allocation3 + $0x78] sm:$0xff] %vm803_vm7, %v4917_v20 }
 0x466   : > { %6377 = vmatmul.mubr.msk.f32.gmra.mrb[26].mxu1 %vm1353_vm8, %v8635_v3  ;;  %v5014_v3 = vld [vmem:[#allocation3] sm:$0xff] }
 0x467   : > { %6379 = vmatprep.mubr.msk.f32.mxu1 %vm1353_vm8, %v8666_v2  ;;  %v4727_v43 = vpop.permute.xlu0 %4726 }
 0x468   : > { %v4729_v27 = vpop.permute.xlu1 %4728  ;;  %4806 = vst.msk [vmem:[#allocation3 + $0x80] sm:$0xff] %vm610_vm6, %v4727_v43  ;;  %v8928_v43 = vld [vmem:[%s9110_s5] ss:$0 sm:$0xff] }
 0x469   : > { %4807 = vst.msk [vmem:[#allocation3 + $0x88] sm:$0xff] %vm610_vm6, %v4729_v27 }
 0x46a   : > { %6380 = vmatmul.mubr.msk.f32.gmra.mrb[28].mxu1 %vm1353_vm8, %v8671_v46  ;;  %v5015_v46 = vld [vmem:[#allocation3 + $0x8] sm:$0xff] }
 0x46b   : > { %6382 = vmatprep.mubr.msk.f32.mxu1 %vm1353_vm8, %v8704_v9  ;;  %v4919_v54 = vpop.permute.xlu0 %4918  ;;  %v5016_v9 = vld [vmem:[#allocation3 + $0x10] sm:$0xff] }
 0x46c   : > { %v4921_v25 = vpop.permute.xlu1 %4920  ;;  %4998 = vst.msk [vmem:[#allocation3 + $0x80] sm:$0xff] %vm803_vm7, %v4919_v54  ;;  %v5028_v0 = vld [vmem:[#allocation3 + $0x70] sm:$0xff]  ;;  %v5029_v24 = vld [vmem:[#allocation3 + $0x78] sm:$0xff] }
 0x46d   : > { %4999 = vst.msk [vmem:[#allocation3 + $0x88] sm:$0xff] %vm803_vm7, %v4921_v25  ;;  %v8933_v54 = vld [vmem:[%s9111_s6] ss:$0 sm:$0xff] }
 0x46e   : > { %6383 = vmatmul.mubr.msk.f32.gmra.mrb[30].mxu1 %vm1353_vm8, %v8707_v21  ;;  %v5017_v21 = vld [vmem:[#allocation3 + $0x18] sm:$0xff] }
 0x46f   : > { %6389 = vmatprep.mubr.msk.f32.mxu1 %vm1353_vm8, %v5014_v3  ;;  %v4731_v2 = vpop.permute.xlu0 %4730 }
 0x470   : > { %v4733_v7 = vpop.permute.xlu1 %4732  ;;  %4808 = vst.msk [vmem:[#allocation3 + $0x90] sm:$0xff] %vm610_vm6, %v4731_v2 }
 0x471   : > { %4809 = vst.msk [vmem:[#allocation3 + $0x98] sm:$0xff] %vm610_vm6, %v4733_v7 }
 0x472   : > { %6390 = vmatmul.mubr.msk.f32.vlgmr.msra.gmra.mrb[0].mxu1 %vm1353_vm8, %v5015_v46  ;;  %v5516_v46 = vld [vmem:[%s6727_s30 + $0x8] sm:$0xff] }
 0x473   : > { %6392 = vmatprep.mubr.msk.f32.mxu1 %vm1353_vm8, %v5016_v9  ;;  %v4923_v37 = vpop.permute.xlu0 %4922  ;;  %v5030_v15 = vld [vmem:[#allocation3 + $0x80] sm:$0xff] }
 0x474   : > { %v4925_v62 = vpop.permute.xlu1 %4924  ;;  %5000 = vst.msk [vmem:[#allocation3 + $0x90] sm:$0xff] %vm803_vm7, %v4923_v37  ;;  %v5031_v8 = vld [vmem:[#allocation3 + $0x88] sm:$0xff] }
 0x475   : > { %5001 = vst.msk [vmem:[#allocation3 + $0x98] sm:$0xff] %vm803_vm7, %v4925_v62 }
 0x476   : > { %6393 = vmatmul.mubr.msk.f32.gmra.mrb[2].mxu1 %vm1353_vm8, %v5017_v21  ;;  %v5515_v21 = vld [vmem:[%s6727_s30] sm:$0xff] }
 0x477   : > { %6395 = vmatprep.mubr.msk.f32.mxu1 %vm1353_vm8, %v5018_v17  ;;  %v4735_v34 = vpop.permute.xlu0 %4734 }
 0x478   : > { %v4737_v41 = vpop.permute.xlu1 %4736  ;;  %4810 = vst.msk [vmem:[#allocation3 + $0xa0] sm:$0xff] %vm610_vm6, %v4735_v34 }
 0x479   : > { %4811 = vst.msk [vmem:[#allocation3 + $0xa8] sm:$0xff] %vm610_vm6, %v4737_v41 }
 0x47a   : > { %6396 = vmatmul.mubr.msk.f32.gmra.mrb[4].mxu1 %vm1353_vm8, %v5019_v49 }
 0x47b   : > { %6398 = vmatprep.mubr.msk.f32.mxu1 %vm1353_vm8, %v5020_v32  ;;  %v4927_v51 = vpop.permute.xlu0 %4926  ;;  %v5032_v55 = vld [vmem:[#allocation3 + $0x90] sm:$0xff] }
 0x47c   : > { %v4929_v39 = vpop.permute.xlu1 %4928  ;;  %5002 = vst.msk [vmem:[#allocation3 + $0xa0] sm:$0xff] %vm803_vm7, %v4927_v51  ;;  %v5033_v35 = vld [vmem:[#allocation3 + $0x98] sm:$0xff] }
 0x47d   : > { %5003 = vst.msk [vmem:[#allocation3 + $0xa8] sm:$0xff] %vm803_vm7, %v4929_v39 }
 0x47e   : > { %6399 = vmatmul.mubr.msk.f32.gmra.mrb[6].mxu1 %vm1353_vm8, %v5021_v61  ;;  %v5518_v61 = vld [vmem:[%s6727_s30 + $0x18] sm:$0xff] }
 0x47f   : > { %6401 = vmatprep.mubr.msk.f32.mxu1 %vm1353_vm8, %v5022_v33  ;;  %v4739_v6 = vpop.permute.xlu0 %4738 }
 0x480   : > { %v4741_v48 = vpop.permute.xlu1 %4740  ;;  %4812 = vst.msk [vmem:[#allocation3 + $0xb0] sm:$0xff] %vm610_vm6, %v4739_v6 }
 0x481   : > { %4813 = vst.msk [vmem:[#allocation3 + $0xb8] sm:$0xff] %vm610_vm6, %v4741_v48 }
 0x482   : > { %6402 = vmatmul.mubr.msk.f32.gmra.mrb[8].mxu1 %vm1353_vm8, %v5023_v23 }
 0x483   : > { %6404 = vmatprep.mubr.msk.f32.mxu1 %vm1353_vm8, %v5024_v63  ;;  %v4931_v1 = vpop.permute.xlu0 %4930  ;;  %v5034_v10 = vld [vmem:[#allocation3 + $0xa0] sm:$0xff] }
 0x484   : > { %v4933_v28 = vpop.permute.xlu1 %4932  ;;  %5004 = vst.msk [vmem:[#allocation3 + $0xb0] sm:$0xff] %vm803_vm7, %v4931_v1  ;;  %v5035_v57 = vld [vmem:[#allocation3 + $0xa8] sm:$0xff]  ;;  %v5517_v63 = vld [vmem:[%s6727_s30 + $0x10] sm:$0xff] }
 0x485   : > { %5005 = vst.msk [vmem:[#allocation3 + $0xb8] sm:$0xff] %vm803_vm7, %v4933_v28 }
 0x486   : > { %6405 = vmatmul.mubr.msk.f32.gmra.mrb[10].mxu1 %vm1353_vm8, %v5025_v45 }
 0x487   : > { %6407 = vmatprep.mubr.msk.f32.mxu1 %vm1353_vm8, %v5026_v38  ;;  %v4743_v11 = vpop.permute.xlu0 %4742 }
 0x488   : > { %v4745_v59 = vpop.permute.xlu1 %4744  ;;  %4814 = vst.msk [vmem:[#allocation3 + $0xc0] sm:$0xff] %vm610_vm6, %v4743_v11 }
 0x489   : > { %4815 = vst.msk [vmem:[#allocation3 + $0xc8] sm:$0xff] %vm610_vm6, %v4745_v59 }
 0x48a   : > { %6408 = vmatmul.mubr.msk.f32.gmra.mrb[12].mxu1 %vm1353_vm8, %v5027_v36 }
 0x48b   : > { %6410 = vmatprep.mubr.msk.f32.mxu1 %vm1353_vm8, %v5028_v0  ;;  %v4935_v22 = vpop.permute.xlu0 %4934  ;;  %v5036_v29 = vld [vmem:[#allocation3 + $0xb0] sm:$0xff] }
 0x48c   : > { %v4937_v26 = vpop.permute.xlu1 %4936  ;;  %5006 = vst.msk [vmem:[#allocation3 + $0xc0] sm:$0xff] %vm803_vm7, %v4935_v22  ;;  %v5037_v18 = vld [vmem:[#allocation3 + $0xb8] sm:$0xff] }
 0x48d   : > { %5007 = vst.msk [vmem:[#allocation3 + $0xc8] sm:$0xff] %vm803_vm7, %v4937_v26  ;;  %v5520_v22 = vld [vmem:[%s6727_s30 + $0x28] sm:$0xff] }
 0x48e   : > { %6411 = vmatmul.mubr.msk.f32.gmra.mrb[14].mxu1 %vm1353_vm8, %v5029_v24 }
 0x48f   : > { %6413 = vmatprep.mubr.msk.f32.mxu1 %vm1353_vm8, %v5030_v15  ;;  %v4747_v12 = vpop.permute.xlu0 %4746 }
 0x490   : > { %v4749_v42 = vpop.permute.xlu1 %4748  ;;  %4816 = vst.msk [vmem:[#allocation3 + $0xd0] sm:$0xff] %vm610_vm6, %v4747_v12 }
 0x491   : > { %4817 = vst.msk [vmem:[#allocation3 + $0xd8] sm:$0xff] %vm610_vm6, %v4749_v42  ;;  %v5519_v42 = vld [vmem:[%s6727_s30 + $0x20] sm:$0xff] }
 0x492   : > { %6414 = vmatmul.mubr.msk.f32.gmra.mrb[16].mxu1 %vm1353_vm8, %v5031_v8 }
 0x493   : > { %6416 = vmatprep.mubr.msk.f32.mxu1 %vm1353_vm8, %v5032_v55  ;;  %v4939_v5 = vpop.permute.xlu0 %4938  ;;  %v5038_v47 = vld [vmem:[#allocation3 + $0xc0] sm:$0xff] }
 0x494   : > { %v4941_v13 = vpop.permute.xlu1 %4940  ;;  %5008 = vst.msk [vmem:[#allocation3 + $0xd0] sm:$0xff] %vm803_vm7, %v4939_v5  ;;  %v5039_v52 = vld [vmem:[#allocation3 + $0xc8] sm:$0xff] }
 0x495   : > { %5009 = vst.msk [vmem:[#allocation3 + $0xd8] sm:$0xff] %vm803_vm7, %v4941_v13 }
 0x496   : > { %6417 = vmatmul.mubr.msk.f32.gmra.mrb[18].mxu1 %vm1353_vm8, %v5033_v35 }
 0x497   : > { %6419 = vmatprep.mubr.msk.f32.mxu1 %vm1353_vm8, %v5034_v10  ;;  %v4751_v19 = vpop.permute.xlu0 %4750 }
 0x498   : > { %v4753_v56 = vpop.permute.xlu1 %4752  ;;  %4818 = vst.msk [vmem:[#allocation3 + $0xe0] sm:$0xff] %vm610_vm6, %v4751_v19 }
 0x499   : > { %4819 = vst.msk [vmem:[#allocation3 + $0xe8] sm:$0xff] %vm610_vm6, %v4753_v56 }
 0x49a   : > { %6420 = vmatmul.mubr.msk.f32.gmra.mrb[20].mxu1 %vm1353_vm8, %v5035_v57  ;;  %v5522_v57 = vld [vmem:[%s6727_s30 + $0x38] sm:$0xff] }
 0x49b   : > { %6422 = vmatprep.mubr.msk.f32.mxu1 %vm1353_vm8, %v5036_v29  ;;  %v4943_v53 = vpop.permute.xlu0 %4942  ;;  %v5040_v58 = vld [vmem:[#allocation3 + $0xd0] sm:$0xff] }
 0x49c   : > { %v4945_v44 = vpop.permute.xlu1 %4944  ;;  %5010 = vst.msk [vmem:[#allocation3 + $0xe0] sm:$0xff] %vm803_vm7, %v4943_v53  ;;  %v5041_v40 = vld [vmem:[#allocation3 + $0xd8] sm:$0xff] }
 0x49d   : > { %5011 = vst.msk [vmem:[#allocation3 + $0xe8] sm:$0xff] %vm803_vm7, %v4945_v44 }
 0x49e   : > { %6423 = vmatmul.mubr.msk.f32.gmra.mrb[22].mxu1 %vm1353_vm8, %v5037_v18 }
 0x49f   : > { %6425 = vmatprep.mubr.msk.f32.mxu1 %vm1353_vm8, %v5038_v47  ;;  %v4755_v30 = vpop.permute.xlu0 %4754  ;;  %v5521_v47 = vld [vmem:[%s6727_s30 + $0x30] sm:$0xff] }
 0x4a0   : > { %4820 = vst.msk [vmem:[#allocation3 + $0xf0] sm:$0xff] %vm610_vm6, %v4755_v30  ;;  %v4757_v31 = vpop.permute.xlu1 %4756 }
 0x4a1   : > { %4821 = vst.msk [vmem:[#allocation3 + $0xf8] sm:$0xff] %vm610_vm6, %v4757_v31 }
 0x4a2   : > { %6426 = vmatmul.mubr.msk.f32.gmra.mrb[24].mxu1 %vm1353_vm8, %v5039_v52 }
 0x4a3   : > { %6428 = vmatprep.mubr.msk.f32.mxu1 %vm1353_vm8, %v5040_v58  ;;  %v4947_v60 = vpop.permute.xlu0 %4946  ;;  %v5042_v16 = vld [vmem:[#allocation3 + $0xe0] sm:$0xff] }
 0x4a4   : > { %5012 = vst.msk [vmem:[#allocation3 + $0xf0] sm:$0xff] %vm803_vm7, %v4947_v60  ;;  %v4949_v4 = vpop.permute.xlu1 %4948  ;;  %v5043_v14 = vld [vmem:[#allocation3 + $0xe8] sm:$0xff] }
 0x4a5   : > { %5013 = vst.msk [vmem:[#allocation3 + $0xf8] sm:$0xff] %vm803_vm7, %v4949_v4 }
 0x4a6   : > { %6429 = vmatmul.mubr.msk.f32.gmra.mrb[26].mxu1 %vm1353_vm8, %v5041_v40 }
 0x4a7   : > { %6431 = vmatprep.mubr.msk.f32.mxu1 %vm1353_vm8, %v5042_v16 }
 0x4aa   : > { %6432 = vmatmul.mubr.msk.f32.gmra.mrb[28].mxu1 %vm1353_vm8, %v5043_v14  ;;  %v5524_v14 = vld [vmem:[%s6727_s30 + $0x48] sm:$0xff] }
 0x4ab   : > { %v5044_v50 = vld [vmem:[#allocation3 + $0xf0] sm:$0xff] }
 0x4ac   : > { %6434 = vmatprep.mubr.msk.f32.mxu1 %vm1353_vm8, %v5044_v50  ;;  %v5045_v20 = vld [vmem:[#allocation3 + $0xf8] sm:$0xff] }
 0x4ae   : > { %6435 = vmatmul.mubr.msk.f32.gmra.mrb[30].mxu1 %vm1353_vm8, %v5045_v20 }
 0x545   : > { %v6391_v27 = vpop.f32.mrb[0].mxu1 }
 0x546   : > { %v5413_v25 = vmul.f32 %v6391_v27, %v8928_v43  ;;  %v5214_v3 = vpop.f32.mrb[1].mxu1 }
 0x547   : > { %v5412_v2 = vmul.f32 %v8928_v43, %v5214_v3  ;;  %v5523_v3 = vld [vmem:[%s6727_s30 + $0x40] sm:$0xff] }
 0x548   : > { %v5452_v7 = vadd.f32 %v8933_v54, %v5413_v25 }
 0x549   : > { %v5451_v9 = vadd.f32 %v8933_v54, %v5412_v2  ;;  %v6394_v37 = vpop.f32.mrb[2].mxu1 }
 0x54a   : > { %v5484_v62 = vmax.f32 %v5452_v7, 0.0  ;;  %v5415_v17 = vmul.f32 %v6394_v37, %v8928_v43  ;;  %v5224_v34 = vpop.f32.mrb[3].mxu1 }
 0x54b   : > { %v5483_v41 = vmax.f32 %v5451_v9, 0.0  ;;  %v5414_v49 = vmul.f32 %v8928_v43, %v5224_v34  ;;  %v5526_v34 = vld [vmem:[%s6727_s30 + $0x58] sm:$0xff] }
 0x54c   : > { %v5548_v32 = vadd.f32 %v5516_v46, %v5484_v62  ;;  %v5454_v51 = vadd.f32 %v8933_v54, %v5415_v17 }
 0x54d   : > { %v5547_v39 = vadd.f32 %v5515_v21, %v5483_v41  ;;  %v5453_v33 = vadd.f32 %v8933_v54, %v5414_v49  ;;  %v6397_v6 = vpop.f32.mrb[4].mxu1 }
 0x54e   : > { %v5580_v48 = vmax.f32 %v5548_v32, 0.0  ;;  %v5486_v23 = vmax.f32 %v5454_v51, 0.0  ;;  %v5417_v1 = vmul.f32 %v6397_v6, %v8928_v43  ;;  %v5234_v28 = vpop.f32.mrb[5].mxu1 }
 0x54f   : > { %v5579_v45 = vmax.f32 %v5547_v39, 0.0  ;;  %v5485_v38 = vmax.f32 %v5453_v33, 0.0  ;;  %v5416_v11 = vmul.f32 %v8928_v43, %v5234_v28  ;;  %v5525_v39 = vld [vmem:[%s6727_s30 + $0x50] sm:$0xff] }
 0x550   : > { %5612 = vst.msk [vmem:[%s8949_s28 + $0x8] sm:$0xff] %vm279_vm0, %v5580_v48  ;;  %v5550_v59 = vadd.f32 %v5518_v61, %v5486_v23  ;;  %v5456_v36 = vadd.f32 %v8933_v54, %v5417_v1 }
 0x551   : > { %5611 = vst.msk [vmem:[%s8949_s28] sm:$0xff] %vm279_vm0, %v5579_v45  ;;  %v5549_v0 = vadd.f32 %v5517_v63, %v5485_v38  ;;  %v5455_v26 = vadd.f32 %v8933_v54, %v5416_v11  ;;  %v6400_v24 = vpop.f32.mrb[6].mxu1  ;;  %v5528_v45 = vld [vmem:[%s6727_s30 + $0x68] sm:$0xff] }
 0x552   : > { %v5582_v15 = vmax.f32 %v5550_v59, 0.0  ;;  %v5488_v12 = vmax.f32 %v5456_v36, 0.0  ;;  %v5419_v8 = vmul.f32 %v6400_v24, %v8928_v43  ;;  %v5244_v55 = vpop.f32.mrb[7].mxu1 }
 0x553   : > { %v5581_v5 = vmax.f32 %v5549_v0, 0.0  ;;  %v5487_v13 = vmax.f32 %v5455_v26, 0.0  ;;  %v5418_v35 = vmul.f32 %v8928_v43, %v5244_v55  ;;  %v5527_v0 = vld [vmem:[%s6727_s30 + $0x60] sm:$0xff] }
 0x554   : > { %5614 = vst.msk [vmem:[%s8949_s28 + $0x18] sm:$0xff] %vm279_vm0, %v5582_v15  ;;  %v5552_v10 = vadd.f32 %v5520_v22, %v5488_v12  ;;  %v5458_v19 = vadd.f32 %v8933_v54, %v5419_v8 }
 0x555   : > { %5613 = vst.msk [vmem:[%s8949_s28 + $0x10] sm:$0xff] %vm279_vm0, %v5581_v5  ;;  %v5551_v56 = vadd.f32 %v5519_v42, %v5487_v13  ;;  %v5457_v29 = vadd.f32 %v8933_v54, %v5418_v35  ;;  %v6403_v53 = vpop.f32.mrb[8].mxu1  ;;  %v5530_v5 = vld [vmem:[%s6727_s30 + $0x78] sm:$0xff] }
 0x556   : > { %v5584_v44 = vmax.f32 %v5552_v10, 0.0  ;;  %v5490_v18 = vmax.f32 %v5458_v19, 0.0  ;;  %v5421_v30 = vmul.f32 %v6403_v53, %v8928_v43  ;;  %v5254_v31 = vpop.f32.mrb[9].mxu1 }
 0x557   : > { %v5583_v52 = vmax.f32 %v5551_v56, 0.0  ;;  %v5489_v58 = vmax.f32 %v5457_v29, 0.0  ;;  %v5420_v60 = vmul.f32 %v8928_v43, %v5254_v31  ;;  %v5529_v56 = vld [vmem:[%s6727_s30 + $0x70] sm:$0xff] }
 0x558   : > { %5616 = vst.msk [vmem:[%s8949_s28 + $0x28] sm:$0xff] %vm279_vm0, %v5584_v44  ;;  %v5554_v4 = vadd.f32 %v5522_v57, %v5490_v18  ;;  %v5460_v40 = vadd.f32 %v8933_v54, %v5421_v30 }
 0x559   : > { %5615 = vst.msk [vmem:[%s8949_s28 + $0x20] sm:$0xff] %vm279_vm0, %v5583_v52  ;;  %v5553_v16 = vadd.f32 %v5521_v47, %v5489_v58  ;;  %v5459_v50 = vadd.f32 %v8933_v54, %v5420_v60  ;;  %v6406_v20 = vpop.f32.mrb[10].mxu1  ;;  %v5532_v52 = vld [vmem:[%s6727_s30 + $0x88] sm:$0xff] }
 0x55a   : > { %v5586_v27 = vmax.f32 %v5554_v4, 0.0  ;;  %v5492_v25 = vmax.f32 %v5460_v40, 0.0  ;;  %v5423_v2 = vmul.f32 %v6406_v20, %v8928_v43  ;;  %v5264_v7 = vpop.f32.mrb[11].mxu1 }
 0x55b   : > { %v5585_v46 = vmax.f32 %v5553_v16, 0.0  ;;  %v5491_v9 = vmax.f32 %v5459_v50, 0.0  ;;  %v5422_v37 = vmul.f32 %v8928_v43, %v5264_v7  ;;  %v5531_v16 = vld [vmem:[%s6727_s30 + $0x80] sm:$0xff] }
 0x55c   : > { %5618 = vst.msk [vmem:[%s8949_s28 + $0x38] sm:$0xff] %vm279_vm0, %v5586_v27  ;;  %v5556_v62 = vadd.f32 %v5524_v14, %v5492_v25  ;;  %v5462_v21 = vadd.f32 %v8933_v54, %v5423_v2 }
 0x55d   : > { %5617 = vst.msk [vmem:[%s8949_s28 + $0x30] sm:$0xff] %vm279_vm0, %v5585_v46  ;;  %v5555_v17 = vadd.f32 %v5523_v3, %v5491_v9  ;;  %v5461_v41 = vadd.f32 %v8933_v54, %v5422_v37  ;;  %v6409_v49 = vpop.f32.mrb[12].mxu1  ;;  %v5534_v46 = vld [vmem:[%s6727_s30 + $0x98] sm:$0xff] }
 0x55e   : > { %v5588_v32 = vmax.f32 %v5556_v62, 0.0  ;;  %v5494_v51 = vmax.f32 %v5462_v21, 0.0  ;;  %v5425_v61 = vmul.f32 %v6409_v49, %v8928_v43  ;;  %v5274_v33 = vpop.f32.mrb[13].mxu1 }
 0x55f   : > { %v5587_v6 = vmax.f32 %v5555_v17, 0.0  ;;  %v5493_v48 = vmax.f32 %v5461_v41, 0.0  ;;  %v5424_v23 = vmul.f32 %v8928_v43, %v5274_v33  ;;  %v5533_v17 = vld [vmem:[%s6727_s30 + $0x90] sm:$0xff] }
 0x560   : > { %5620 = vst.msk [vmem:[%s8949_s28 + $0x48] sm:$0xff] %vm279_vm0, %v5588_v32  ;;  %v5558_v63 = vadd.f32 %v5526_v34, %v5494_v51  ;;  %v5464_v1 = vadd.f32 %v8933_v54, %v5425_v61 }
 0x561   : > { %5619 = vst.msk [vmem:[%s8949_s28 + $0x40] sm:$0xff] %vm279_vm0, %v5587_v6  ;;  %v5557_v28 = vadd.f32 %v5525_v39, %v5493_v48  ;;  %v5463_v38 = vadd.f32 %v8933_v54, %v5424_v23  ;;  %v6412_v11 = vpop.f32.mrb[14].mxu1  ;;  %v5536_v6 = vld [vmem:[%s6727_s30 + $0xa8] sm:$0xff] }
 0x562   : > { %v5590_v59 = vmax.f32 %v5558_v63, 0.0  ;;  %v5496_v36 = vmax.f32 %v5464_v1, 0.0  ;;  %v5427_v22 = vmul.f32 %v6412_v11, %v8928_v43  ;;  %v5284_v26 = vpop.f32.mrb[15].mxu1 }
 0x563   : > { %v5589_v24 = vmax.f32 %v5557_v28, 0.0  ;;  %v5495_v15 = vmax.f32 %v5463_v38, 0.0  ;;  %v5426_v12 = vmul.f32 %v8928_v43, %v5284_v26  ;;  %v5535_v28 = vld [vmem:[%s6727_s30 + $0xa0] sm:$0xff] }
 0x564   : > { %5622 = vst.msk [vmem:[%s8949_s28 + $0x58] sm:$0xff] %vm279_vm0, %v5590_v59  ;;  %v5560_v42 = vadd.f32 %v5528_v45, %v5496_v36  ;;  %v5466_v8 = vadd.f32 %v8933_v54, %v5427_v22 }
 0x565   : > { %5621 = vst.msk [vmem:[%s8949_s28 + $0x50] sm:$0xff] %vm279_vm0, %v5589_v24  ;;  %v5559_v55 = vadd.f32 %v5527_v0, %v5495_v15  ;;  %v5465_v13 = vadd.f32 %v8933_v54, %v5426_v12  ;;  %v6415_v35 = vpop.f32.mrb[16].mxu1  ;;  %v5538_v24 = vld [vmem:[%s6727_s30 + $0xb8] sm:$0xff] }
 0x566   : > { %v5592_v10 = vmax.f32 %v5560_v42, 0.0  ;;  %v5498_v19 = vmax.f32 %v5466_v8, 0.0  ;;  %v5429_v57 = vmul.f32 %v6415_v35, %v8928_v43  ;;  %v5294_v29 = vpop.f32.mrb[17].mxu1 }
 0x567   : > { %v5591_v53 = vmax.f32 %v5559_v55, 0.0  ;;  %v5497_v44 = vmax.f32 %v5465_v13, 0.0  ;;  %v5428_v18 = vmul.f32 %v8928_v43, %v5294_v29  ;;  %v5537_v55 = vld [vmem:[%s6727_s30 + $0xb0] sm:$0xff] }
 0x568   : > { %5624 = vst.msk [vmem:[%s8949_s28 + $0x68] sm:$0xff] %vm279_vm0, %v5592_v10  ;;  %v5562_v47 = vadd.f32 %v5530_v5, %v5498_v19  ;;  %v5468_v30 = vadd.f32 %v8933_v54, %v5429_v57 }
 0x569   : > { %5623 = vst.msk [vmem:[%s8949_s28 + $0x60] sm:$0xff] %vm279_vm0, %v5591_v53  ;;  %v5561_v31 = vadd.f32 %v5529_v56, %v5497_v44  ;;  %v5467_v58 = vadd.f32 %v8933_v54, %v5428_v18  ;;  %v6418_v60 = vpop.f32.mrb[18].mxu1  ;;  %v5540_v53 = vld [vmem:[%s6727_s30 + $0xc8] sm:$0xff] }
 0x56a   : > { %v5594_v4 = vmax.f32 %v5562_v47, 0.0  ;;  %v5500_v40 = vmax.f32 %v5468_v30, 0.0  ;;  %v5431_v14 = vmul.f32 %v6418_v60, %v8928_v43  ;;  %v5304_v50 = vpop.f32.mrb[19].mxu1 }
 0x56b   : > { %v5593_v20 = vmax.f32 %v5561_v31, 0.0  ;;  %v5499_v27 = vmax.f32 %v5467_v58, 0.0  ;;  %v5430_v25 = vmul.f32 %v8928_v43, %v5304_v50  ;;  %v5539_v31 = vld [vmem:[%s6727_s30 + $0xc0] sm:$0xff] }
 0x56c   : > { %5626 = vst.msk [vmem:[%s8949_s28 + $0x78] sm:$0xff] %vm279_vm0, %v5594_v4  ;;  %v5564_v3 = vadd.f32 %v5532_v52, %v5500_v40  ;;  %v5470_v2 = vadd.f32 %v8933_v54, %v5431_v14 }
 0x56d   : > { %5625 = vst.msk [vmem:[%s8949_s28 + $0x70] sm:$0xff] %vm279_vm0, %v5593_v20  ;;  %v5563_v7 = vadd.f32 %v5531_v16, %v5499_v27  ;;  %v5469_v9 = vadd.f32 %v8933_v54, %v5430_v25  ;;  %v6421_v37 = vpop.f32.mrb[20].mxu1  ;;  %v5542_v20 = vld [vmem:[%s6727_s30 + $0xd8] sm:$0xff] }
 0x56e   : > { %v5596_v62 = vmax.f32 %v5564_v3, 0.0  ;;  %v5502_v21 = vmax.f32 %v5470_v2, 0.0  ;;  %v5433_v34 = vmul.f32 %v6421_v37, %v8928_v43  ;;  %v5314_v41 = vpop.f32.mrb[21].mxu1 }
 0x56f   : > { %v5595_v49 = vmax.f32 %v5563_v7, 0.0  ;;  %v5501_v32 = vmax.f32 %v5469_v9, 0.0  ;;  %v5432_v51 = vmul.f32 %v8928_v43, %v5314_v41  ;;  %v5541_v7 = vld [vmem:[%s6727_s30 + $0xd0] sm:$0xff] }
 0x570   : > { %5628 = vst.msk [vmem:[%s8949_s28 + $0x88] sm:$0xff] %vm279_vm0, %v5596_v62  ;;  %v5566_v39 = vadd.f32 %v5534_v46, %v5502_v21  ;;  %v5472_v61 = vadd.f32 %v8933_v54, %v5433_v34 }
 0x571   : > { %5627 = vst.msk [vmem:[%s8949_s28 + $0x80] sm:$0xff] %vm279_vm0, %v5595_v49  ;;  %v5565_v33 = vadd.f32 %v5533_v17, %v5501_v32  ;;  %v5471_v48 = vadd.f32 %v8933_v54, %v5432_v51  ;;  %v6424_v23 = vpop.f32.mrb[22].mxu1  ;;  %v5544_v49 = vld [vmem:[%s6727_s30 + $0xe8] sm:$0xff] }
 0x572   : > { %v5598_v63 = vmax.f32 %v5566_v39, 0.0  ;;  %v5504_v1 = vmax.f32 %v5472_v61, 0.0  ;;  %v5435_v45 = vmul.f32 %v6424_v23, %v8928_v43  ;;  %v5324_v38 = vpop.f32.mrb[23].mxu1 }
 0x573   : > { %v5597_v11 = vmax.f32 %v5565_v33, 0.0  ;;  %v5503_v59 = vmax.f32 %v5471_v48, 0.0  ;;  %v5434_v36 = vmul.f32 %v8928_v43, %v5324_v38  ;;  %v5543_v33 = vld [vmem:[%s6727_s30 + $0xe0] sm:$0xff] }
 0x574   : > { %5630 = vst.msk [vmem:[%s8949_s28 + $0x98] sm:$0xff] %vm279_vm0, %v5598_v63  ;;  %v5568_v0 = vadd.f32 %v5536_v6, %v5504_v1  ;;  %v5474_v22 = vadd.f32 %v8933_v54, %v5435_v45 }
 0x575   : > { %5629 = vst.msk [vmem:[%s8949_s28 + $0x90] sm:$0xff] %vm279_vm0, %v5597_v11  ;;  %v5567_v26 = vadd.f32 %v5535_v28, %v5503_v59  ;;  %v5473_v15 = vadd.f32 %v8933_v54, %v5434_v36  ;;  %v6427_v12 = vpop.f32.mrb[24].mxu1  ;;  %v5546_v11 = vld [vmem:[%s6727_s30 + $0xf8] sm:$0xff] }
 0x576   : > { %v5600_v42 = vmax.f32 %v5568_v0, 0.0  ;;  %v5506_v8 = vmax.f32 %v5474_v22, 0.0  ;;  %v5437_v5 = vmul.f32 %v6427_v12, %v8928_v43  ;;  %v5334_v13 = vpop.f32.mrb[25].mxu1  ;;  %v5545_v22 = vld [vmem:[%s6727_s30 + $0xf0] sm:$0xff] }
 0x577   : > { %v5599_v35 = vmax.f32 %v5567_v26, 0.0  ;;  %v5505_v10 = vmax.f32 %v5473_v15, 0.0  ;;  %v5436_v19 = vmul.f32 %v8928_v43, %v5334_v13 }
 0x578   : > { %5632 = vst.msk [vmem:[%s8949_s28 + $0xa8] sm:$0xff] %vm279_vm0, %v5600_v42  ;;  %v5570_v56 = vadd.f32 %v5538_v24, %v5506_v8  ;;  %v5476_v57 = vadd.f32 %v8933_v54, %v5437_v5 }
 0x579   : > { %5631 = vst.msk [vmem:[%s8949_s28 + $0xa0] sm:$0xff] %vm279_vm0, %v5599_v35  ;;  %v5569_v29 = vadd.f32 %v5537_v55, %v5505_v10  ;;  %v5475_v44 = vadd.f32 %v8933_v54, %v5436_v19  ;;  %v6430_v18 = vpop.f32.mrb[26].mxu1 }
 0x57a   : > { %v5602_v47 = vmax.f32 %v5570_v56, 0.0  ;;  %v5508_v30 = vmax.f32 %v5476_v57, 0.0  ;;  %v5439_v52 = vmul.f32 %v6430_v18, %v8928_v43  ;;  %v5344_v58 = vpop.f32.mrb[27].mxu1 }
 0x57b   : > { %v5601_v60 = vmax.f32 %v5569_v29, 0.0  ;;  %v5507_v4 = vmax.f32 %v5475_v44, 0.0  ;;  %v5438_v40 = vmul.f32 %v8928_v43, %v5344_v58 }
 0x57c   : > { %5634 = vst.msk [vmem:[%s8949_s28 + $0xb8] sm:$0xff] %vm279_vm0, %v5602_v47  ;;  %v5572_v16 = vadd.f32 %v5540_v53, %v5508_v30  ;;  %v5478_v14 = vadd.f32 %v8933_v54, %v5439_v52 }
 0x57d   : > { %5633 = vst.msk [vmem:[%s8949_s28 + $0xb0] sm:$0xff] %vm279_vm0, %v5601_v60  ;;  %v5571_v50 = vadd.f32 %v5539_v31, %v5507_v4  ;;  %v5477_v27 = vadd.f32 %v8933_v54, %v5438_v40  ;;  %v6433_v25 = vpop.f32.mrb[28].mxu1 }
 0x57e   : > { %v5604_v3 = vmax.f32 %v5572_v16, 0.0  ;;  %v5510_v2 = vmax.f32 %v5478_v14, 0.0  ;;  %v5441_v46 = vmul.f32 %v6433_v25, %v8928_v43  ;;  %v5354_v9 = vpop.f32.mrb[29].mxu1 }
 0x57f   : > { %v5603_v37 = vmax.f32 %v5571_v50, 0.0  ;;  %v5509_v62 = vmax.f32 %v5477_v27, 0.0  ;;  %v5440_v21 = vmul.f32 %v8928_v43, %v5354_v9 }
 0x580   : > { %5636 = vst.msk [vmem:[%s8949_s28 + $0xc8] sm:$0xff] %vm279_vm0, %v5604_v3  ;;  %v5574_v17 = vadd.f32 %v5542_v20, %v5510_v2  ;;  %v5480_v34 = vadd.f32 %v8933_v54, %v5441_v46 }
 0x581   : > { %5635 = vst.msk [vmem:[%s8949_s28 + $0xc0] sm:$0xff] %vm279_vm0, %v5603_v37  ;;  %v5573_v41 = vadd.f32 %v5541_v7, %v5509_v62  ;;  %v5479_v32 = vadd.f32 %v8933_v54, %v5440_v21  ;;  %v6436_v51 = vpop.f32.mrb[30].mxu1 }
 0x582   : > { %v5606_v39 = vmax.f32 %v5574_v17, 0.0  ;;  %v5512_v61 = vmax.f32 %v5480_v34, 0.0  ;;  %v5443_v6 = vmul.f32 %v6436_v51, %v8928_v43  ;;  %v5364_v48 = vpop.f32.mrb[31].mxu1 }
 0x583   : > { %v5605_v23 = vmax.f32 %v5573_v41, 0.0  ;;  %v5511_v63 = vmax.f32 %v5479_v32, 0.0  ;;  %v5442_v1 = vmul.f32 %v8928_v43, %v5364_v48 }
 0x584   : > { %5638 = vst.msk [vmem:[%s8949_s28 + $0xd8] sm:$0xff] %vm279_vm0, %v5606_v39  ;;  %v5576_v28 = vadd.f32 %v5544_v49, %v5512_v61  ;;  %v5482_v45 = vadd.f32 %v8933_v54, %v5443_v6 }
 0x585   : > { %5637 = vst.msk [vmem:[%s8949_s28 + $0xd0] sm:$0xff] %vm279_vm0, %v5605_v23  ;;  %v5575_v38 = vadd.f32 %v5543_v33, %v5511_v63  ;;  %v5481_v59 = vadd.f32 %v8933_v54, %v5442_v1 }
 0x586   : > { %v5608_v36 = vmax.f32 %v5576_v28, 0.0  ;;  %v5514_v0 = vmax.f32 %v5482_v45, 0.0 }
 0x587   : > { %v5607_v26 = vmax.f32 %v5575_v38, 0.0  ;;  %v5513_v24 = vmax.f32 %v5481_v59, 0.0 }
 0x588   : > { %5640 = vst.msk [vmem:[%s8949_s28 + $0xe8] sm:$0xff] %vm279_vm0, %v5608_v36  ;;  %v5578_v43 = vadd.f32 %v5546_v11, %v5514_v0 }
 0x589   : > { %5639 = vst.msk [vmem:[%s8949_s28 + $0xe0] sm:$0xff] %vm279_vm0, %v5607_v26  ;;  %v5577_v15 = vadd.f32 %v5545_v22, %v5513_v24 }
 0x58a   : > { %v5610_v12 = vmax.f32 %v5578_v43, 0.0 }
 0x58b   : > { %v5609_v42 = vmax.f32 %v5577_v15, 0.0 }
 0x58c   : > { %5642 = vst.msk [vmem:[%s8949_s28 + $0xf8] sm:$0xff] %vm279_vm0, %v5610_v12 }
 0x58d   : > { %5641 = vst.msk [vmem:[%s8949_s28 + $0xf0] sm:$0xff] %vm279_vm0, %v5609_v42 }
 0x58e PF: > { %s17_s24 = sadd.s32 1, %s6619_s24  }
 0x58f   : > { %p14_p4 = scmp.ge.s32.totalorder %s17_s24, 4  }
 0x591   :  { %16 = sbr.rel (!%p14_p4) target bundleno = 1 (0x1), region = 85 }

</bundles_post_ra>
